<compile_context>
chip_gen: v7x
topology: tpu7x:2x2x1
jax: 0.10.0
libtpu: 0.0.40
codegen_flags: <defaults>
</compile_context>

<pallas_src>
import functools

import jax
import jax.numpy as jnp
from jax import lax
from jax.experimental import pallas as pl
from jax.experimental.pallas import tpu as pltpu

MAX_ANSWER_LEN = 15           # HF question-answering pipeline default
_LANES = 128                  # output packing width (one unmasked vst per text)
_TB_CAP = 32                  # texts/step cap: keeps the unrolled band scan
                              # within the 64-vreg file (≈8 live (tb,128) f32)
_BLOCK_BYTES_CAP = 16 << 20   # per hidden block; x2 double-buffer <= 32 MiB (v7x-safe)
_VMEM_LIMIT_BYTES = 48 << 20  # above default scoped limits (16/32 MiB), below
                              # v7x's 64 MiB physical VMEM


def _pick_texts_per_step(T, S, H, itemsize):
    """Texts fused per grid step.

    Big enough to amortize per-step overhead and reach the HBM roofline
    (>= ~1 MiB DMA when possible), small enough that the double-buffered
    hidden block fits the v7x VMEM budget and the 15-way unrolled band scan
    does not spill.
    """
    per_text = S * H * itemsize
    tb = min(_TB_CAP, max(1, _BLOCK_BYTES_CAP // per_text))
    tb = max(8, (tb // 8) * 8)   # multiple of 8 -> aligned (tb, 128) output tile
    if T <= tb:
        return T                 # single full-extent block (no alignment needed)
    return tb


def _qa_span_kernel(h_ref, w_ref, o_ref):
    """One (ensemble member, text block).

    h_ref: (TB, S, H) bf16   encoder hidden states for TB texts
    w_ref: (2, H)     bf16   QA head weight (row 0 = start, row 1 = end)
    o_ref: (TB, 128)  f32    row t -> [best span prob, start idx, end idx, 0...]
    """
    TB, S, H = h_ref.shape

    # QA head as a TB-batched (2,H) x (H,S) MXU contraction — same pattern as
    # attention's 'bqd,bkd->bqk' — so logits land with S on lanes and TB on
    # sublanes, avoiding a lane->sublane relayout of a (2, TB*S) result.
    w_b = jnp.broadcast_to(w_ref[...], (TB, 2, H))
    logits = jnp.einsum("tch,tsh->tcs", w_b, h_ref[...],
                        preferred_element_type=jnp.float32)      # (TB, 2, S)
    start_logits = logits[:, 0, :]                               # (TB, S)
    end_logits = logits[:, 1, :]                                 # (TB, S)

    # NOTE: the QA-head bias is intentionally omitted — softmax over the
    # sequence axis is invariant to a per-row constant, so the bias cannot
    # change the probabilities or the selected span.

    # Numerically-stable softmax over the sequence (lane) axis.  Exact divide
    # (no approx reciprocal): scores feed the threshold and cross-model
    # comparisons, so numerical parity with the reference matters.
    sp = jnp.exp(start_logits - jnp.max(start_logits, axis=-1, keepdims=True))
    sp = sp / jnp.sum(sp, axis=-1, keepdims=True)
    ep = jnp.exp(end_logits - jnp.max(end_logits, axis=-1, keepdims=True))
    ep = ep / jnp.sum(ep, axis=-1, keepdims=True)

    # Banded span scan: score(i, d) = p_start[i] * p_end[i + d],
    # 0 <= d < MAX_ANSWER_LEN, i + d < S.  Running max + arg-d per lane;
    # the rolls ride the otherwise-idle XLU slot.
    col = lax.broadcasted_iota(jnp.int32, (TB, S), 1)
    best = jnp.full((TB, S), -1.0, jnp.float32)
    best_d = jnp.zeros((TB, S), jnp.int32)
    for d in range(MAX_ANSWER_LEN):                # static unroll (15 diagonals)
        ep_d = ep if d == 0 else pltpu.roll(ep, shift=S - d, axis=1)
        sc = jnp.where(col < S - d, sp * ep_d, -1.0)   # mask wraparound tail
        upd = sc > best                                # strict > keeps smallest d
        best = jnp.where(upd, sc, best)
        best_d = jnp.where(upd, d, best_d)

    # Per-text lane argmax with first-occurrence (smallest start) tie-break,
    # matching HF's row-major flattened argmax.
    row_best = jnp.max(best, axis=-1, keepdims=True)                    # (TB, 1)
    start_idx = jnp.min(jnp.where(best == row_best, col, S),
                        axis=-1, keepdims=True)                         # (TB, 1)
    d_sel = jnp.min(jnp.where(col == start_idx, best_d, MAX_ANSWER_LEN),
                    axis=-1, keepdims=True)                             # (TB, 1)
    end_idx = start_idx + d_sel

    # Pack: row t = [score, start, end, 0, ...]; one lane-dense (TB,128) store.
    lane = lax.broadcasted_iota(jnp.int32, (TB, _LANES), 1)
    o_ref[...] = jnp.where(lane == 0, row_best,
                 jnp.where(lane == 1, start_idx.astype(jnp.float32),
                 jnp.where(lane == 2, end_idx.astype(jnp.float32), 0.0)))


def qa_span_scores(hidden, qa_w, *, texts_per_step=None):
    """hidden: (M, T, S, H) bf16; qa_w: (M, 2, H) bf16.

    Returns (M, G*tb, 128) f32 where row t (global text index, t < T) holds
    [best span prob, start token, end token, 0, ...].  Rows >= T (ragged tail
    of the last text block) are undefined and must be sliced off by the caller.
    """
    M, T, S, H = hidden.shape
    tb = texts_per_step or _pick_texts_per_step(T, S, H, hidden.dtype.itemsize)
    G = pl.cdiv(T, tb)

    # No jnp.pad of `hidden`: a partial last text block is handled by Pallas's
    # clipped boundary DMA; the stale tail rows never reach the selection.
    grid_spec = pltpu.PrefetchScalarGridSpec(
        num_scalar_prefetch=0,
        grid=(M, G),   # G innermost: the (2,H) weight block index is constant
                       # across inner steps, so it is not re-DMA'd.
        in_specs=[
            # If profiling shows exposed DMA at step boundaries, add
            # pipeline_mode=pl.Buffered(3) here (costs one extra block of VMEM).
            pl.BlockSpec((None, tb, S, H), lambda m, g: (m, g, 0, 0)),
            pl.BlockSpec((None, 2, H), lambda m, g: (m, 0, 0)),
        ],
        out_specs=pl.BlockSpec((None, tb, _LANES), lambda m, g: (m, g, 0)),
    )
    return pl.pallas_call(
        _qa_span_kernel,
        out_shape=jax.ShapeDtypeStruct((M, G * tb, _LANES), jnp.float32),
        grid_spec=grid_spec,
        compiler_params=pltpu.CompilerParams(
            dimension_semantics=("parallel", "parallel"),
            vmem_limit_bytes=_VMEM_LIMIT_BYTES),
    )(hidden, qa_w)


@functools.partial(jax.jit, static_argnames=("T",))
def _qa_select(packed, ranking_scores, thr, *, T):
    """On-device ensemble reduction (threshold / reweight / argmax)."""
    flat = packed[:, :T, :]                      # drop ragged-tail rows
    scores = flat[:, :, 0]                       # raw span probabilities (M, T)
    starts = flat[:, :, 1].astype(jnp.int32)
    ends = flat[:, :, 2].astype(jnp.int32)

    above = scores > thr
    has_any = jnp.any(above)

    # Reference `i == 0` branch: model-0 score reweighted by ranking_scores.
    weighted = scores[0] * ranking_scores
    t0 = jnp.argmax(weighted)                    # first-occurrence tie-break
    has_best0 = weighted[t0] > 0.0
    s0 = starts[0, t0]
    e0 = ends[0, t0]

    t_idx = jnp.arange(T)[None, :]
    answer_above_thr = jnp.any(above & (t_idx == t0) & (starts == s0) & (ends == e0))

    # Fallback: highest-scoring thresholded span across the whole ensemble.
    masked = jnp.where(above, scores, -1.0).reshape(-1)
    fb = jnp.argmax(masked)
    fb_m = fb // T
    fb_t = fb % T
    return (has_any, has_best0, answer_above_thr,
            t0, s0, e0, fb_t, starts[fb_m, fb_t], ends[fb_m, fb_t])


def qa_ensemble_forward(hidden, qa_w, qa_b=None, ranking_scores=None, thr=0.1):
    """Mirrors QAEnsembleModel.forward on top of the Pallas span kernel.

    An "answer" is a (text_index, start_token, end_token) triple — there is no
    tokenizer / string decoding here.  `qa_b` is accepted for API parity but
    unused: softmax over the sequence is invariant to the per-row bias, so it
    cannot change any returned value.
    """
    del qa_b
    M, T, S, H = hidden.shape
    if ranking_scores is None:
        ranking_scores = jnp.ones((T,), jnp.float32)

    packed = qa_span_scores(hidden, qa_w)
    out = _qa_select(packed, jnp.asarray(ranking_scores, jnp.float32),
                     jnp.float32(thr), T=T)
    (has_any, has_best0, ans_above, t0, s0, e0, fb_t, fb_s, fb_e) = [
        int(v) for v in jax.device_get(out)]

    if not has_any:
        return None
    if has_best0 and ans_above:
        return (t0, s0, e0)
    # TODO(synk): `find_best_cluster` is undefined in the reference source; fall
    # back to the highest-scoring thresholded span when the model-0 best answer
    # did not itself clear the threshold.
    return (fb_t, fb_s, fb_e)


if __name__ == "__main__":
    M, T, S, H = 2, 12, 128, 128   # ensemble members, texts, seq len, hidden dim
    key = jax.random.PRNGKey(0)
    k1, k2 = jax.random.split(key, 2)

    # Synthetic encoder hidden states per (model, text) — the transformer body
    # itself is not reproduced here (checkpoints / tokenizer not available).
    hidden = jax.random.normal(k1, (M, T, S, H), jnp.float32).astype(jnp.bfloat16)
    # QA head (qa_outputs: Linear(hidden, 2)) weight per ensemble member.
    qa_w = (jax.random.normal(k2, (M, 2, H), jnp.float32) / jnp.sqrt(H)
            ).astype(jnp.bfloat16)
    ranking_scores = jnp.ones((T,), jnp.float32)

    packed = qa_span_scores(hidden, qa_w)
    jax.block_until_ready(packed)

    # Pure-JAX reference of the per-(model, text) HF span selection
    # (tie-robust spot check: compares scores, not raw argmax indices).
    flat = packed[:, :T, :]
    k_scores = flat[:, :, 0]
    k_starts = flat[:, :, 1].astype(jnp.int32)
    k_ends = flat[:, :, 2].astype(jnp.int32)

    logits = jnp.einsum("mtsh,mch->mcts", hidden, qa_w,
                        preferred_element_type=jnp.float32)
    r_sp = jax.nn.softmax(logits[:, 0], axis=-1)
    r_ep = jax.nn.softmax(logits[:, 1], axis=-1)
    outer = r_sp[..., :, None] * r_ep[..., None, :]          # (M, T, S, S)
    ii = jnp.arange(S)[:, None]
    jj = jnp.arange(S)[None, :]
    band = (jj >= ii) & (jj - ii < MAX_ANSWER_LEN)
    cand = jnp.where(band, outer, -1.0)
    r_best = jnp.max(cand.reshape(M, T, -1), axis=-1)

    mm, tt = jnp.meshgrid(jnp.arange(M), jnp.arange(T), indexing="ij")
    k_at = cand[mm, tt, k_starts, k_ends]

    assert jnp.allclose(k_scores, r_best, rtol=5e-3, atol=1e-5), "span score mismatch"
    assert jnp.allclose(k_at, r_best, rtol=5e-3, atol=1e-5), "span index mismatch"
    assert bool(jnp.all((k_ends >= k_starts) & (k_ends - k_starts < MAX_ANSWER_LEN)))

    result = qa_ensemble_forward(hidden, qa_w, None, ranking_scores, thr=0.1)
    _ = result  # may be None if no span clears the threshold, as in the module

    print("KERNEL_OK")
</pallas_src>

<mosaic_0001>
module attributes {stable_mosaic.version = 11 : i64} {
  func.func @_qa_span_kernel(%arg0: i32, %arg1: i32, %arg2: memref<1x12x128x128xbf16, #tpu.memory_space<vmem>>, %arg3: memref<1x2x128xbf16, #tpu.memory_space<vmem>>, %arg4: memref<1x12x128xf32, #tpu.memory_space<vmem>>) attributes {dimension_semantics = [#tpu.dimension_semantics<parallel>, #tpu.dimension_semantics<parallel>], iteration_bounds = array<i64: 2, 1>, scalar_prefetch = 0 : i64, scratch_operands = 0 : i64, tpu.core_type = #tpu.core_type<tc>, window_params = [{transform_indices = @transform_0, window_bounds = array<i64: 1, 12, 128, 128>}, {transform_indices = @transform_1, window_bounds = array<i64: 1, 2, 128>}, {transform_indices = @transform_2, window_bounds = array<i64: 1, 12, 128>}]} {
    %c0 = arith.constant 0 : index
    %c0_0 = arith.constant 0 : index
    %c0_1 = arith.constant 0 : index
    %0 = vector.load %arg3[%c0, %c0_0, %c0_1] : memref<1x2x128xbf16, #tpu.memory_space<vmem>>, vector<1x2x128xbf16>
    %1 = vector.shape_cast %0 : vector<1x2x128xbf16> to vector<2x128xbf16>
    %2 = vector.shape_cast %1 : vector<2x128xbf16> to vector<1x2x128xbf16>
    %3 = vector.broadcast %2 : vector<1x2x128xbf16> to vector<12x2x128xbf16>
    %c0_2 = arith.constant 0 : index
    %c0_3 = arith.constant 0 : index
    %c0_4 = arith.constant 0 : index
    %c0_5 = arith.constant 0 : index
    %4 = vector.load %arg2[%c0_2, %c0_3, %c0_4, %c0_5] : memref<1x12x128x128xbf16, #tpu.memory_space<vmem>>, vector<1x12x128x128xbf16>
    %5 = vector.shape_cast %4 : vector<1x12x128x128xbf16> to vector<12x128x128xbf16>
    "tpu.trace_start"() <{level = 10 : i32, message = "tch,tsh->tcs"}> : () -> ()
    %cst = arith.constant dense<0.000000e+00> : vector<12x2x128xf32>
    %6 = tpu.matmul %3, %5, %cst {dimension_numbers = #tpu.dot_dimension_numbers<[2], [2], [1], [1], [0, 0, 0, 1, 1, 1], [0], [0]>} : vector<12x2x128xbf16>, vector<12x128x128xbf16>, vector<12x2x128xf32> -> vector<12x2x128xf32>
    "tpu.trace_stop"() : () -> ()
    %7 = vector.extract_strided_slice %6 {offsets = [0, 0, 0], sizes = [12, 1, 128], strides = [1, 1, 1]} : vector<12x2x128xf32> to vector<12x1x128xf32>
    %8 = vector.shape_cast %7 : vector<12x1x128xf32> to vector<12x128xf32>
    %9 = vector.extract_strided_slice %6 {offsets = [0, 1, 0], sizes = [12, 1, 128], strides = [1, 1, 1]} : vector<12x2x128xf32> to vector<12x1x128xf32>
    %10 = vector.shape_cast %9 : vector<12x1x128xf32> to vector<12x128xf32>
    %cst_6 = arith.constant dense<0xFF800000> : vector<12xf32>
    %11 = vector.multi_reduction <maximumf>, %8, %cst_6 [1] : vector<12x128xf32> to vector<12xf32>
    %12 = vector.shape_cast %11 : vector<12xf32> to vector<12x1xf32>
    %13 = vector.broadcast %12 : vector<12x1xf32> to vector<12x128xf32>
    %14 = arith.subf %8, %13 : vector<12x128xf32>
    %15 = math.exp %14 : vector<12x128xf32>
    %cst_7 = arith.constant dense<0.000000e+00> : vector<12xf32>
    %16 = vector.multi_reduction <add>, %15, %cst_7 [1] : vector<12x128xf32> to vector<12xf32>
    %17 = vector.shape_cast %16 : vector<12xf32> to vector<12x1xf32>
    %18 = vector.broadcast %17 : vector<12x1xf32> to vector<12x128xf32>
    %19 = arith.divf %15, %18 : vector<12x128xf32>
    %cst_8 = arith.constant dense<0xFF800000> : vector<12xf32>
    %20 = vector.multi_reduction <maximumf>, %10, %cst_8 [1] : vector<12x128xf32> to vector<12xf32>
    %21 = vector.shape_cast %20 : vector<12xf32> to vector<12x1xf32>
    %22 = vector.broadcast %21 : vector<12x1xf32> to vector<12x128xf32>
    %23 = arith.subf %10, %22 : vector<12x128xf32>
    %24 = math.exp %23 : vector<12x128xf32>
    %cst_9 = arith.constant dense<0.000000e+00> : vector<12xf32>
    %25 = vector.multi_reduction <add>, %24, %cst_9 [1] : vector<12x128xf32> to vector<12xf32>
    %26 = vector.shape_cast %25 : vector<12xf32> to vector<12x1xf32>
    %27 = vector.broadcast %26 : vector<12x1xf32> to vector<12x128xf32>
    %28 = arith.divf %24, %27 : vector<12x128xf32>
    %29 = tpu.iota {dimensions = array<i32: 1>} : vector<12x128xi32>
    %cst_10 = arith.constant -1.000000e+00 : f32
    %30 = vector.broadcast %cst_10 : f32 to vector<12x128xf32>
    %c0_i32 = arith.constant 0 : i32
    %31 = vector.broadcast %c0_i32 : i32 to vector<12x128xi32>
    %c128_i32 = arith.constant 128 : i32
    %32 = vector.broadcast %c128_i32 : i32 to vector<12x128xi32>
    %33 = arith.cmpi slt, %29, %32 : vector<12x128xi32>
    %34 = arith.mulf %19, %28 : vector<12x128xf32>
    %cst_11 = arith.constant -1.000000e+00 : f32
    %35 = vector.broadcast %cst_11 : f32 to vector<12x128xf32>
    %36 = arith.select %33, %34, %35 : vector<12x128xi1>, vector<12x128xf32>
    %37 = arith.cmpf ogt, %36, %30 : vector<12x128xf32>
    %38 = arith.select %37, %36, %30 : vector<12x128xi1>, vector<12x128xf32>
    %c0_i32_12 = arith.constant 0 : i32
    %39 = vector.broadcast %c0_i32_12 : i32 to vector<12x128xi32>
    %40 = arith.select %37, %39, %31 : vector<12x128xi1>, vector<12x128xi32>
    %c127_i32 = arith.constant 127 : i32
    %41 = tpu.dynamic_rotate %28 by %c127_i32 dim 1 : vector<12x128xf32>, i32 -> vector<12x128xf32>
    %c127_i32_13 = arith.constant 127 : i32
    %42 = vector.broadcast %c127_i32_13 : i32 to vector<12x128xi32>
    %43 = arith.cmpi slt, %29, %42 : vector<12x128xi32>
    %44 = arith.mulf %19, %41 : vector<12x128xf32>
    %cst_14 = arith.constant -1.000000e+00 : f32
    %45 = vector.broadcast %cst_14 : f32 to vector<12x128xf32>
    %46 = arith.select %43, %44, %45 : vector<12x128xi1>, vector<12x128xf32>
    %47 = arith.cmpf ogt, %46, %38 : vector<12x128xf32>
    %48 = arith.select %47, %46, %38 : vector<12x128xi1>, vector<12x128xf32>
    %c1_i32 = arith.constant 1 : i32
    %49 = vector.broadcast %c1_i32 : i32 to vector<12x128xi32>
    %50 = arith.select %47, %49, %40 : vector<12x128xi1>, vector<12x128xi32>
    %c126_i32 = arith.constant 126 : i32
    %51 = tpu.dynamic_rotate %28 by %c126_i32 dim 1 : vector<12x128xf32>, i32 -> vector<12x128xf32>
    %c126_i32_15 = arith.constant 126 : i32
    %52 = vector.broadcast %c126_i32_15 : i32 to vector<12x128xi32>
    %53 = arith.cmpi slt, %29, %52 : vector<12x128xi32>
    %54 = arith.mulf %19, %51 : vector<12x128xf32>
    %cst_16 = arith.constant -1.000000e+00 : f32
    %55 = vector.broadcast %cst_16 : f32 to vector<12x128xf32>
    %56 = arith.select %53, %54, %55 : vector<12x128xi1>, vector<12x128xf32>
    %57 = arith.cmpf ogt, %56, %48 : vector<12x128xf32>
    %58 = arith.select %57, %56, %48 : vector<12x128xi1>, vector<12x128xf32>
    %c2_i32 = arith.constant 2 : i32
    %59 = vector.broadcast %c2_i32 : i32 to vector<12x128xi32>
    %60 = arith.select %57, %59, %50 : vector<12x128xi1>, vector<12x128xi32>
    %c125_i32 = arith.constant 125 : i32
    %61 = tpu.dynamic_rotate %28 by %c125_i32 dim 1 : vector<12x128xf32>, i32 -> vector<12x128xf32>
    %c125_i32_17 = arith.constant 125 : i32
    %62 = vector.broadcast %c125_i32_17 : i32 to vector<12x128xi32>
    %63 = arith.cmpi slt, %29, %62 : vector<12x128xi32>
    %64 = arith.mulf %19, %61 : vector<12x128xf32>
    %cst_18 = arith.constant -1.000000e+00 : f32
    %65 = vector.broadcast %cst_18 : f32 to vector<12x128xf32>
    %66 = arith.select %63, %64, %65 : vector<12x128xi1>, vector<12x128xf32>
    %67 = arith.cmpf ogt, %66, %58 : vector<12x128xf32>
    %68 = arith.select %67, %66, %58 : vector<12x128xi1>, vector<12x128xf32>
    %c3_i32 = arith.constant 3 : i32
    %69 = vector.broadcast %c3_i32 : i32 to vector<12x128xi32>
    %70 = arith.select %67, %69, %60 : vector<12x128xi1>, vector<12x128xi32>
    %c124_i32 = arith.constant 124 : i32
    %71 = tpu.dynamic_rotate %28 by %c124_i32 dim 1 : vector<12x128xf32>, i32 -> vector<12x128xf32>
    %c124_i32_19 = arith.constant 124 : i32
    %72 = vector.broadcast %c124_i32_19 : i32 to vector<12x128xi32>
    %73 = arith.cmpi slt, %29, %72 : vector<12x128xi32>
    %74 = arith.mulf %19, %71 : vector<12x128xf32>
    %cst_20 = arith.constant -1.000000e+00 : f32
    %75 = vector.broadcast %cst_20 : f32 to vector<12x128xf32>
    %76 = arith.select %73, %74, %75 : vector<12x128xi1>, vector<12x128xf32>
    %77 = arith.cmpf ogt, %76, %68 : vector<12x128xf32>
    %78 = arith.select %77, %76, %68 : vector<12x128xi1>, vector<12x128xf32>
    %c4_i32 = arith.constant 4 : i32
    %79 = vector.broadcast %c4_i32 : i32 to vector<12x128xi32>
    %80 = arith.select %77, %79, %70 : vector<12x128xi1>, vector<12x128xi32>
    %c123_i32 = arith.constant 123 : i32
    %81 = tpu.dynamic_rotate %28 by %c123_i32 dim 1 : vector<12x128xf32>, i32 -> vector<12x128xf32>
    %c123_i32_21 = arith.constant 123 : i32
    %82 = vector.broadcast %c123_i32_21 : i32 to vector<12x128xi32>
    %83 = arith.cmpi slt, %29, %82 : vector<12x128xi32>
    %84 = arith.mulf %19, %81 : vector<12x128xf32>
    %cst_22 = arith.constant -1.000000e+00 : f32
    %85 = vector.broadcast %cst_22 : f32 to vector<12x128xf32>
    %86 = arith.select %83, %84, %85 : vector<12x128xi1>, vector<12x128xf32>
    %87 = arith.cmpf ogt, %86, %78 : vector<12x128xf32>
    %88 = arith.select %87, %86, %78 : vector<12x128xi1>, vector<12x128xf32>
    %c5_i32 = arith.constant 5 : i32
    %89 = vector.broadcast %c5_i32 : i32 to vector<12x128xi32>
    %90 = arith.select %87, %89, %80 : vector<12x128xi1>, vector<12x128xi32>
    %c122_i32 = arith.constant 122 : i32
    %91 = tpu.dynamic_rotate %28 by %c122_i32 dim 1 : vector<12x128xf32>, i32 -> vector<12x128xf32>
    %c122_i32_23 = arith.constant 122 : i32
    %92 = vector.broadcast %c122_i32_23 : i32 to vector<12x128xi32>
    %93 = arith.cmpi slt, %29, %92 : vector<12x128xi32>
    %94 = arith.mulf %19, %91 : vector<12x128xf32>
    %cst_24 = arith.constant -1.000000e+00 : f32
    %95 = vector.broadcast %cst_24 : f32 to vector<12x128xf32>
    %96 = arith.select %93, %94, %95 : vector<12x128xi1>, vector<12x128xf32>
    %97 = arith.cmpf ogt, %96, %88 : vector<12x128xf32>
    %98 = arith.select %97, %96, %88 : vector<12x128xi1>, vector<12x128xf32>
    %c6_i32 = arith.constant 6 : i32
    %99 = vector.broadcast %c6_i32 : i32 to vector<12x128xi32>
    %100 = arith.select %97, %99, %90 : vector<12x128xi1>, vector<12x128xi32>
    %c121_i32 = arith.constant 121 : i32
    %101 = tpu.dynamic_rotate %28 by %c121_i32 dim 1 : vector<12x128xf32>, i32 -> vector<12x128xf32>
    %c121_i32_25 = arith.constant 121 : i32
    %102 = vector.broadcast %c121_i32_25 : i32 to vector<12x128xi32>
    %103 = arith.cmpi slt, %29, %102 : vector<12x128xi32>
    %104 = arith.mulf %19, %101 : vector<12x128xf32>
    %cst_26 = arith.constant -1.000000e+00 : f32
    %105 = vector.broadcast %cst_26 : f32 to vector<12x128xf32>
    %106 = arith.select %103, %104, %105 : vector<12x128xi1>, vector<12x128xf32>
    %107 = arith.cmpf ogt, %106, %98 : vector<12x128xf32>
    %108 = arith.select %107, %106, %98 : vector<12x128xi1>, vector<12x128xf32>
    %c7_i32 = arith.constant 7 : i32
    %109 = vector.broadcast %c7_i32 : i32 to vector<12x128xi32>
    %110 = arith.select %107, %109, %100 : vector<12x128xi1>, vector<12x128xi32>
    %c120_i32 = arith.constant 120 : i32
    %111 = tpu.dynamic_rotate %28 by %c120_i32 dim 1 : vector<12x128xf32>, i32 -> vector<12x128xf32>
    %c120_i32_27 = arith.constant 120 : i32
    %112 = vector.broadcast %c120_i32_27 : i32 to vector<12x128xi32>
    %113 = arith.cmpi slt, %29, %112 : vector<12x128xi32>
    %114 = arith.mulf %19, %111 : vector<12x128xf32>
    %cst_28 = arith.constant -1.000000e+00 : f32
    %115 = vector.broadcast %cst_28 : f32 to vector<12x128xf32>
    %116 = arith.select %113, %114, %115 : vector<12x128xi1>, vector<12x128xf32>
    %117 = arith.cmpf ogt, %116, %108 : vector<12x128xf32>
    %118 = arith.select %117, %116, %108 : vector<12x128xi1>, vector<12x128xf32>
    %c8_i32 = arith.constant 8 : i32
    %119 = vector.broadcast %c8_i32 : i32 to vector<12x128xi32>
    %120 = arith.select %117, %119, %110 : vector<12x128xi1>, vector<12x128xi32>
    %c119_i32 = arith.constant 119 : i32
    %121 = tpu.dynamic_rotate %28 by %c119_i32 dim 1 : vector<12x128xf32>, i32 -> vector<12x128xf32>
    %c119_i32_29 = arith.constant 119 : i32
    %122 = vector.broadcast %c119_i32_29 : i32 to vector<12x128xi32>
    %123 = arith.cmpi slt, %29, %122 : vector<12x128xi32>
    %124 = arith.mulf %19, %121 : vector<12x128xf32>
    %cst_30 = arith.constant -1.000000e+00 : f32
    %125 = vector.broadcast %cst_30 : f32 to vector<12x128xf32>
    %126 = arith.select %123, %124, %125 : vector<12x128xi1>, vector<12x128xf32>
    %127 = arith.cmpf ogt, %126, %118 : vector<12x128xf32>
    %128 = arith.select %127, %126, %118 : vector<12x128xi1>, vector<12x128xf32>
    %c9_i32 = arith.constant 9 : i32
    %129 = vector.broadcast %c9_i32 : i32 to vector<12x128xi32>
    %130 = arith.select %127, %129, %120 : vector<12x128xi1>, vector<12x128xi32>
    %c118_i32 = arith.constant 118 : i32
    %131 = tpu.dynamic_rotate %28 by %c118_i32 dim 1 : vector<12x128xf32>, i32 -> vector<12x128xf32>
    %c118_i32_31 = arith.constant 118 : i32
    %132 = vector.broadcast %c118_i32_31 : i32 to vector<12x128xi32>
    %133 = arith.cmpi slt, %29, %132 : vector<12x128xi32>
    %134 = arith.mulf %19, %131 : vector<12x128xf32>
    %cst_32 = arith.constant -1.000000e+00 : f32
    %135 = vector.broadcast %cst_32 : f32 to vector<12x128xf32>
    %136 = arith.select %133, %134, %135 : vector<12x128xi1>, vector<12x128xf32>
    %137 = arith.cmpf ogt, %136, %128 : vector<12x128xf32>
    %138 = arith.select %137, %136, %128 : vector<12x128xi1>, vector<12x128xf32>
    %c10_i32 = arith.constant 10 : i32
    %139 = vector.broadcast %c10_i32 : i32 to vector<12x128xi32>
    %140 = arith.select %137, %139, %130 : vector<12x128xi1>, vector<12x128xi32>
    %c117_i32 = arith.constant 117 : i32
    %141 = tpu.dynamic_rotate %28 by %c117_i32 dim 1 : vector<12x128xf32>, i32 -> vector<12x128xf32>
    %c117_i32_33 = arith.constant 117 : i32
    %142 = vector.broadcast %c117_i32_33 : i32 to vector<12x128xi32>
    %143 = arith.cmpi slt, %29, %142 : vector<12x128xi32>
    %144 = arith.mulf %19, %141 : vector<12x128xf32>
    %cst_34 = arith.constant -1.000000e+00 : f32
    %145 = vector.broadcast %cst_34 : f32 to vector<12x128xf32>
    %146 = arith.select %143, %144, %145 : vector<12x128xi1>, vector<12x128xf32>
    %147 = arith.cmpf ogt, %146, %138 : vector<12x128xf32>
    %148 = arith.select %147, %146, %138 : vector<12x128xi1>, vector<12x128xf32>
    %c11_i32 = arith.constant 11 : i32
    %149 = vector.broadcast %c11_i32 : i32 to vector<12x128xi32>
    %150 = arith.select %147, %149, %140 : vector<12x128xi1>, vector<12x128xi32>
    %c116_i32 = arith.constant 116 : i32
    %151 = tpu.dynamic_rotate %28 by %c116_i32 dim 1 : vector<12x128xf32>, i32 -> vector<12x128xf32>
    %c116_i32_35 = arith.constant 116 : i32
    %152 = vector.broadcast %c116_i32_35 : i32 to vector<12x128xi32>
    %153 = arith.cmpi slt, %29, %152 : vector<12x128xi32>
    %154 = arith.mulf %19, %151 : vector<12x128xf32>
    %cst_36 = arith.constant -1.000000e+00 : f32
    %155 = vector.broadcast %cst_36 : f32 to vector<12x128xf32>
    %156 = arith.select %153, %154, %155 : vector<12x128xi1>, vector<12x128xf32>
    %157 = arith.cmpf ogt, %156, %148 : vector<12x128xf32>
    %158 = arith.select %157, %156, %148 : vector<12x128xi1>, vector<12x128xf32>
    %c12_i32 = arith.constant 12 : i32
    %159 = vector.broadcast %c12_i32 : i32 to vector<12x128xi32>
    %160 = arith.select %157, %159, %150 : vector<12x128xi1>, vector<12x128xi32>
    %c115_i32 = arith.constant 115 : i32
    %161 = tpu.dynamic_rotate %28 by %c115_i32 dim 1 : vector<12x128xf32>, i32 -> vector<12x128xf32>
    %c115_i32_37 = arith.constant 115 : i32
    %162 = vector.broadcast %c115_i32_37 : i32 to vector<12x128xi32>
    %163 = arith.cmpi slt, %29, %162 : vector<12x128xi32>
    %164 = arith.mulf %19, %161 : vector<12x128xf32>
    %cst_38 = arith.constant -1.000000e+00 : f32
    %165 = vector.broadcast %cst_38 : f32 to vector<12x128xf32>
    %166 = arith.select %163, %164, %165 : vector<12x128xi1>, vector<12x128xf32>
    %167 = arith.cmpf ogt, %166, %158 : vector<12x128xf32>
    %168 = arith.select %167, %166, %158 : vector<12x128xi1>, vector<12x128xf32>
    %c13_i32 = arith.constant 13 : i32
    %169 = vector.broadcast %c13_i32 : i32 to vector<12x128xi32>
    %170 = arith.select %167, %169, %160 : vector<12x128xi1>, vector<12x128xi32>
    %c114_i32 = arith.constant 114 : i32
    %171 = tpu.dynamic_rotate %28 by %c114_i32 dim 1 : vector<12x128xf32>, i32 -> vector<12x128xf32>
    %c114_i32_39 = arith.constant 114 : i32
    %172 = vector.broadcast %c114_i32_39 : i32 to vector<12x128xi32>
    %173 = arith.cmpi slt, %29, %172 : vector<12x128xi32>
    %174 = arith.mulf %19, %171 : vector<12x128xf32>
    %cst_40 = arith.constant -1.000000e+00 : f32
    %175 = vector.broadcast %cst_40 : f32 to vector<12x128xf32>
    %176 = arith.select %173, %174, %175 : vector<12x128xi1>, vector<12x128xf32>
    %177 = arith.cmpf ogt, %176, %168 : vector<12x128xf32>
    %178 = arith.select %177, %176, %168 : vector<12x128xi1>, vector<12x128xf32>
    %c14_i32 = arith.constant 14 : i32
    %179 = vector.broadcast %c14_i32 : i32 to vector<12x128xi32>
    %180 = arith.select %177, %179, %170 : vector<12x128xi1>, vector<12x128xi32>
    %cst_41 = arith.constant dense<0xFF800000> : vector<12xf32>
    %181 = vector.multi_reduction <maximumf>, %178, %cst_41 [1] : vector<12x128xf32> to vector<12xf32>
    %182 = vector.shape_cast %181 : vector<12xf32> to vector<12x1xf32>
    %183 = vector.broadcast %182 : vector<12x1xf32> to vector<12x128xf32>
    %184 = arith.cmpf oeq, %178, %183 : vector<12x128xf32>
    %c128_i32_42 = arith.constant 128 : i32
    %185 = vector.broadcast %c128_i32_42 : i32 to vector<12x128xi32>
    %186 = arith.select %184, %29, %185 : vector<12x128xi1>, vector<12x128xi32>
    %cst_43 = arith.constant dense<2147483647> : vector<12xi32>
    %187 = vector.multi_reduction <minsi>, %186, %cst_43 [1] : vector<12x128xi32> to vector<12xi32>
    %188 = vector.shape_cast %187 : vector<12xi32> to vector<12x1xi32>
    %189 = vector.broadcast %188 : vector<12x1xi32> to vector<12x128xi32>
    %190 = arith.cmpi eq, %29, %189 : vector<12x128xi32>
    %c15_i32 = arith.constant 15 : i32
    %191 = vector.broadcast %c15_i32 : i32 to vector<12x128xi32>
    %192 = arith.select %190, %180, %191 : vector<12x128xi1>, vector<12x128xi32>
    %cst_44 = arith.constant dense<2147483647> : vector<12xi32>
    %193 = vector.multi_reduction <minsi>, %192, %cst_44 [1] : vector<12x128xi32> to vector<12xi32>
    %194 = vector.shape_cast %193 : vector<12xi32> to vector<12x1xi32>
    %195 = arith.addi %188, %194 : vector<12x1xi32>
    %196 = tpu.iota {dimensions = array<i32: 1>} : vector<12x128xi32>
    %c0_i32_45 = arith.constant 0 : i32
    %197 = vector.broadcast %c0_i32_45 : i32 to vector<12x128xi32>
    %198 = arith.cmpi eq, %196, %197 : vector<12x128xi32>
    %c1_i32_46 = arith.constant 1 : i32
    %199 = vector.broadcast %c1_i32_46 : i32 to vector<12x128xi32>
    %200 = arith.cmpi eq, %196, %199 : vector<12x128xi32>
    %201 = arith.sitofp %188 : vector<12x1xi32> to vector<12x1xf32>
    %c2_i32_47 = arith.constant 2 : i32
    %202 = vector.broadcast %c2_i32_47 : i32 to vector<12x128xi32>
    %203 = arith.cmpi eq, %196, %202 : vector<12x128xi32>
    %204 = arith.sitofp %195 : vector<12x1xi32> to vector<12x1xf32>
    %cst_48 = arith.constant 0.000000e+00 : f32
    %205 = vector.shape_cast %204 : vector<12x1xf32> to vector<12x1xf32>
    %206 = vector.broadcast %205 : vector<12x1xf32> to vector<12x128xf32>
    %207 = vector.broadcast %cst_48 : f32 to vector<12x128xf32>
    %208 = arith.select %203, %206, %207 : vector<12x128xi1>, vector<12x128xf32>
    %209 = vector.shape_cast %201 : vector<12x1xf32> to vector<12x1xf32>
    %210 = vector.broadcast %209 : vector<12x1xf32> to vector<12x128xf32>
    %211 = arith.select %200, %210, %208 : vector<12x128xi1>, vector<12x128xf32>
    %212 = vector.shape_cast %182 : vector<12x1xf32> to vector<12x1xf32>
    %213 = vector.broadcast %212 : vector<12x1xf32> to vector<12x128xf32>
    %214 = arith.select %198, %213, %211 : vector<12x128xi1>, vector<12x128xf32>
    %c0_49 = arith.constant 0 : index
    %c0_50 = arith.constant 0 : index
    %c0_51 = arith.constant 0 : index
    %215 = vector.load %arg4[%c0_49, %c0_50, %c0_51] : memref<1x12x128xf32, #tpu.memory_space<vmem>>, vector<1x12x128xf32>
    %216 = vector.shape_cast %215 : vector<1x12x128xf32> to vector<12x128xf32>
    %217 = vector.shape_cast %214 : vector<12x128xf32> to vector<1x12x128xf32>
    tpu.vector_store %arg4[%c0_49, %c0_50, %c0_51], %217 {strides = array<i32>} : memref<1x12x128xf32, #tpu.memory_space<vmem>>, vector<1x12x128xf32>,
    return
  }
  func.func @transform_0(%arg0: i32, %arg1: i32) -> (i32, i32, i32, i32) {
    %c0_i32 = arith.constant 0 : i32
    %c0_i32_0 = arith.constant 0 : i32
    %c0_i32_1 = arith.constant 0 : i32
    return %arg0, %arg1, %c0_i32, %c0_i32_0 : i32, i32, i32, i32
  }
  func.func @transform_1(%arg0: i32, %arg1: i32) -> (i32, i32, i32) {
    %c0_i32 = arith.constant 0 : i32
    %c0_i32_0 = arith.constant 0 : i32
    %c0_i32_1 = arith.constant 0 : i32
    return %arg0, %c0_i32, %c0_i32_0 : i32, i32, i32
  }
  func.func @transform_2(%arg0: i32, %arg1: i32) -> (i32, i32, i32) {
    %c0_i32 = arith.constant 0 : i32
    %c0_i32_0 = arith.constant 0 : i32
    return %arg0, %arg1, %c0_i32 : i32, i32, i32
  }
}

</mosaic_0001>

<bundles_post_ra>
// kernel: tpu_custom_call.1
= control target key start
LH: loop header
LB: loop body
LE: loop exit
PB: predicated region body
PF: predicated region fallthrough
CT: control target
= control target key end

     0   :  { %7 = vsyncpa [#allocation3], 0  ;;  %s5808_s0 = inlined_call_operand.hbm [shape: bf16[2,12,128,128], index: 0, kind: input, shape index: {}]   ;;  %s5809_s1 = inlined_call_operand.vmem [shape: bf16[2,2,128], index: 1, kind: input, shape index: {}]   ;;  %s5810_s2 = inlined_call_operand.vmem [shape: f32[2,12,128], index: 2, kind: output, shape index: {}]  }
   0x1   :  { %9 = vsyncpa [#allocation3 + $0x1], 0  ;;  %s4125_s9 = smov 0   ;;  %s4127_s10 = smov 0  }
   0x2   :  { %s4129_s11 = smov 0   ;;  %s4131_s12 = smov 0  }
   0x3   :  { %s4133_s13 = smov 0   ;;  %s4135_s14 = smov 0  }
   0x4 LB: > { %s3284_s15 = sadd.s32 4294967295, %s4088_s14   ;;  %s27_s16 = sadd.s32 1, %s4084_s13  ;;  %s4088_s14 = sphi %s4135_s14, %s15_s14   ;;  %s4084_s13 = sphi %s4133_s13, %s6011_s13   ;;  %s4080_s12 = sphi %s4131_s12, %s6010_s12   ;;  %s4076_s11 = sphi %s4129_s11, %s6009_s11   ;;  %s4072_s10 = sphi %s4127_s10, %s6008_s10   ;;  %s4068_s9 = sphi %s4125_s9, %s6007_s9  }
   0x5   : > { %p29_p0 = scmp.ge.s32.totalorder %s27_s16, 2  ;;  %s36_s17 = sadd.s32 1, %s4076_s11 }
   0x6   : > { %p43_p1 = scmp.ne.s32.totalorder %s4076_s11, %s4072_s10  ;;  %p44_p2 = scmp.eq.s32.totalorder %s4088_s14, 0 }
   0x7   : > { %s6013_s16 = smov (%p29_p0, %s27_s16), 0  ;;  %p49_p4 = scmp.ne.s32.totalorder %s4072_s10, %s4068_s9 }
   0x8   : > { %p45_p3 = por %p44_p2, %p43_p1  ;;  %s31_s18 = ssub.s32 %s4084_s13, %s6013_s16 }
   0x9   : > { %p50_p5 = scmp.eq.s32.totalorder %s3284_s15, 0  ;;  %p34_p6 = scmp.eq.s32.totalorder %s31_s18, 0 }
   0xa   : > { %p3748_p8 = scmp.lt.s32.totalorder %s4088_s14, 2  ;;  %s127_s21 = sand.u32 1, %s4076_s11  }
   0xb   : > { %p4164_p7 = por %p50_p5, %p49_p4  ;;  %s3740_s22 = smul.u32 12288, %s4084_s13 }
   0xc   : > { %s4170_s20 = scalar_select %p34_p6, %s4076_s11, %s36_s17  }
   0xd   : > { %s3739_s23 = smul.u32 768, %s127_s21  ;;  %s4177_s26 = scalar_lea.hbm %s5808_s0, %s3740_s22 }
   0xe   : > { %p4179_p9 = pnand %p3748_p8, %p45_p3  ;;  %s4185_s30 = scalar_lea.sflag [#allocation3], %s127_s21 }
   0xf   : > { %s131_s28 = scalar_lea.vmem [#allocation2], %s3739_s23  ;;  %s4008_s3 = scalar_lea.hbm %s4177_s26, 12288 }
  0x10   : > { %s141_s29 = sshll.u32 %s131_s28, 4  ;;  %p4009_p10 = scmp.ne.s32.totalorder %s4177_s26, %s4008_s3  ;;  %s4183_s29 = int_to_ptr.vmem [resolvable:$true] %s141_s29 }
  0x11   : > { %p4010_p11 = pneg %p4179_p9  ;;  %s4013_s6 = scalar_lea.hbm %s5808_s0, 24576 }
  0x12   : > { %p4014_p0 = scmp.lt.u32.totalorder %s4177_s26, %s5808_s0  ;;  %p4015_p1 = scmp.lt.u32.totalorder %s4013_s6, %s4008_s3 }
  0x13   : > { %p4011_p12 = pnand %p4010_p11, %p4009_p10  ;;  %p4017_p3 = scmp.lt.u32.totalorder %s4008_s3, %s4177_s26 }
  0x14   : > { %p4016_p2 = por %p4015_p1, %p4014_p0 }
  0x15   : > { %p4012_p13 = pneg %p4011_p12 }
  0x16   : > { %p4018_p4 = por %p4017_p3, %p4016_p2 }
  0x18   : > { %p4019_p5 = pnand %p4018_p4, %p4012_p13 }
  0x1a   : > { %4022 = shalt.err (!%p4019_p5)
}
  0x1b   : > { %s4023_s9 = scalar_lea.vmem %s4183_s29, 12288  ;;  %s4090_s15 = smov [#allocation2]  }
  0x1c   : > { %p4024_p6 = scmp.ne.s32.totalorder %s4183_s29, %s4023_s9  ;;  %s4028_s17 = sshll.u32 %s4090_s15, 4  ;;  %s4029_s17 = int_to_ptr.vmem [resolvable:$false] %s4028_s17 }
  0x1d   : > { %s4030_s18 = scalar_lea.vmem %s4029_s17, 24576  ;;  %p4031_p12 = scmp.lt.s32.totalorder %s4183_s29, %s4029_s17 }
  0x1e   : > { %p4026_p8 = pnand %p4024_p6, %p4010_p11  ;;  %p4032_p0 = scmp.lt.s32.totalorder %s4030_s18, %s4023_s9 }
  0x20   : > { %p4027_p10 = pneg %p4026_p8  ;;  %p4033_p1 = por %p4032_p0, %p4031_p12 }
  0x22   : > { %p4034_p2 = pnand %p4033_p1, %p4027_p10 }
  0x24   : > { %4037 = shalt.err (!%p4034_p2)
}
  0x25   : > { %s4091_s21 = smov 64   ;;  %s4092_s22 = smov 4  }
  0x26   : > { %3747 = dma.hbm_to_vmem [thread:$0]  (!%p4179_p9), %s4177_s26, 12288, %s4183_s29, %s4185_s30, %s4091_s21, %s4091_s21, %s4092_s22  }
  0x27   : > { %p3289_p11 = scmp.ge.s32.totalorder %s4088_s14, 1  ;;  %p155_p13 = scmp.lt.s32.totalorder %s4088_s14, 3 }
  0x29   : > { %p156_p3 = pnand %p3289_p11, %p155_p13 }
  0x2b   : > { %159 = sbr.rel (%p156_p3) target bundleno = 2029 (0x7ed), region = 28 }
  0x32   : > { %s161_s23 = sand.u32 1, %s4072_s10  }
  0x33   : > { %s3741_s24 = smul.u32 768, %s161_s23  ;;  %s162_s25 = scalar_lea.sflag [#allocation3], %s161_s23 }
  0x35   : > { %s4216_s28 = scalar_lea.vmem [#allocation2], %s3741_s24 }
  0x36   : > { %4063 = dma.done.wait (%p4164_p7), %s162_s25, 12288  }
  0x37   : > { %4065 = vsyncadd (%p4164_p7), %s162_s25, 4294955008  ;;  %v4093_v0 = vmov 0.0   ;;  %vm4094_vm0 = vmmov 0   ;;  %v3816_v1 = vld [vmem:[%s4216_s28] sm:$0xff]   ;;  %v3818_v3 = vld [vmem:[%s4216_s28 + $0x8] sm:$0xff]   ;;  %p194_p7 = scmp.lt.s32.totalorder %s4080_s12, 1 }
  0x38   : > { %3499 = vmatprep.subr.bf16.mxu0 %v4093_v0  ;;  %3519 = vmatprep.subr.bf16.mxu1 %v4093_v0  ;;  %v3817_v2 = vld [vmem:[%s4216_s28 + $0x40] sm:$0xff]   ;;  %v3819_v4 = vld [vmem:[%s4216_s28 + $0x48] sm:$0xff]   ;;  %v3820_v5 = vld [vmem:[%s4216_s28 + $0x10] sm:$0xff]   ;;  %vm1470_vm1 = vcmask 1041409   ;;  %vm1473_vm2 = vcmask 1042434   ;;  %vm1476_vm3 = vcmask 1043459  }
  0x39   : > { %3515 = vmatprep.mubr.msk.bf16.mxu0 %vm4094_vm0, %v4093_v0  ;;  %3535 = vmatprep.mubr.msk.bf16.mxu1 %vm4094_vm0, %v4093_v0  ;;  %v3821_v6 = vld [vmem:[%s4216_s28 + $0x50] sm:$0xff]   ;;  %v3822_v7 = vld [vmem:[%s4216_s28 + $0x18] sm:$0xff]   ;;  %v3824_v9 = vld [vmem:[%s4216_s28 + $0x20] sm:$0xff]   ;;  %s6015_s12 = smov (!%p194_p7, %s4080_s12), 1  ;;  %vm1479_vm4 = vcmask 1044484   ;;  %vm1482_vm5 = vcmask 1045509  }
  0x3a   : > { %3500 = vmatpush3.bf16.xpose.msra.mxu0 %v3816_v1  ;;  %3520 = vmatpush3.bf16.xpose.msra.mxu1 %v3817_v2  ;;  %v3823_v8 = vld [vmem:[%s4216_s28 + $0x58] sm:$0xff]   ;;  %v3825_v10 = vld [vmem:[%s4216_s28 + $0x60] sm:$0xff]   ;;  %v3826_v11 = vld [vmem:[%s4216_s28 + $0x28] sm:$0xff]   ;;  %s196_s27 = scalar_lea.vmem %s5809_s1, %s6015_s12  ;;  %vm1485_vm6 = vcmask 1046534   ;;  %vm1488_vm7 = vcmask 1047559   ;;  %vm1663_vm8 = vcmask 1047553  }
  0x3b   : > { %3501 = vmatprep.subr.bf16.mxu0 %v4093_v0  ;;  %3521 = vmatprep.subr.bf16.mxu1 %v4093_v0  ;;  %v3827_v12 = vld [vmem:[%s4216_s28 + $0x68] sm:$0xff]   ;;  %v3828_v13 = vld [vmem:[%s4216_s28 + $0x30] sm:$0xff]   ;;  %v3830_v15 = vld [vmem:[%s4216_s28 + $0x38] sm:$0xff]   ;;  %vm1667_vm9 = vcmask 1044480   ;;  %vm5852_vm10 = vcmask 1043456   ;;  %s4095_s29 = smov 126  }
  0x3c   : > { %v3829_v14 = vld [vmem:[%s4216_s28 + $0x70] sm:$0xff]   ;;  %v3831_v16 = vld [vmem:[%s4216_s28 + $0x78] sm:$0xff]   ;;  %v4267_v17 = vld [vmem:[%s196_s27] sm:$0x1]  ;;  %s4096_s30 = smov 127   ;;  %s4097_s3 = smov 125  }
  0x3d   : > { %v3832_v18 = vld [vmem:[%s4216_s28 + $0x80] sm:$0xff]   ;;  %v3834_v20 = vld [vmem:[%s4216_s28 + $0x88] sm:$0xff]   ;;  %v3836_v22 = vld [vmem:[%s4216_s28 + $0x90] sm:$0xff]   ;;  %s4098_s4 = smov 124   ;;  %s4099_s5 = smov 123  }
  0x3e   : > { %v3833_v19 = vld [vmem:[%s4216_s28 + $0xc0] sm:$0xff]   ;;  %v3835_v21 = vld [vmem:[%s4216_s28 + $0xc8] sm:$0xff]   ;;  %v3837_v23 = vld [vmem:[%s4216_s28 + $0xd0] sm:$0xff]   ;;  %s4100_s6 = smov 122   ;;  %s4101_s7 = smov 121  }
  0x3f   : > { %v3838_v24 = vld [vmem:[%s4216_s28 + $0x98] sm:$0xff]   ;;  %v3840_v26 = vld [vmem:[%s4216_s28 + $0xa0] sm:$0xff]   ;;  %v3842_v28 = vld [vmem:[%s4216_s28 + $0xa8] sm:$0xff]   ;;  %s4102_s8 = smov 120   ;;  %s4103_s9 = smov 119  }
  0x40   : > { %v3839_v25 = vld [vmem:[%s4216_s28 + $0xd8] sm:$0xff]   ;;  %v3841_v27 = vld [vmem:[%s4216_s28 + $0xe0] sm:$0xff]   ;;  %v3843_v29 = vld [vmem:[%s4216_s28 + $0xe8] sm:$0xff]   ;;  %s4104_s15 = smov 118   ;;  %s4105_s17 = smov 117  }
  0x41   : > { %v3844_v30 = vld [vmem:[%s4216_s28 + $0xb0] sm:$0xff]   ;;  %v3846_v32 = vld [vmem:[%s4216_s28 + $0xb8] sm:$0xff]   ;;  %v3848_v34 = vld [vmem:[%s4216_s28 + $0x100] sm:$0xff]   ;;  %s4106_s18 = smov 116   ;;  %s4107_s21 = smov 115  }
  0x42   : > { %3502 = vmatpush3.bf16.xpose.msra.mxu0 %v3818_v3  ;;  %3522 = vmatpush3.bf16.xpose.msra.mxu1 %v3819_v4  ;;  %v3845_v31 = vld [vmem:[%s4216_s28 + $0xf0] sm:$0xff]   ;;  %v3847_v33 = vld [vmem:[%s4216_s28 + $0xf8] sm:$0xff]   ;;  %v3849_v35 = vld [vmem:[%s4216_s28 + $0x140] sm:$0xff]   ;;  %s4108_s22 = smov 114   ;;  %s3390_s23 = sshll.u32 %s6015_s12, 4 }
  0x43   : > { %3503 = vmatprep.subr.bf16.mxu0 %v4093_v0  ;;  %3523 = vmatprep.subr.bf16.mxu1 %v4093_v0  ;;  %v3850_v36 = vld [vmem:[%s4216_s28 + $0x108] sm:$0xff]   ;;  %v3852_v38 = vld [vmem:[%s4216_s28 + $0x110] sm:$0xff]   ;;  %v3854_v40 = vld [vmem:[%s4216_s28 + $0x118] sm:$0xff]  }
  0x44   : > { %v3851_v37 = vld [vmem:[%s4216_s28 + $0x148] sm:$0xff]   ;;  %v3853_v39 = vld [vmem:[%s4216_s28 + $0x150] sm:$0xff]   ;;  %v3855_v41 = vld [vmem:[%s4216_s28 + $0x158] sm:$0xff]  }
  0x45   : > { %v3856_v42 = vld [vmem:[%s4216_s28 + $0x120] sm:$0xff]   ;;  %v3858_v44 = vld [vmem:[%s4216_s28 + $0x128] sm:$0xff]   ;;  %v3860_v46 = vld [vmem:[%s4216_s28 + $0x130] sm:$0xff]  }
  0x46   : > { %v3857_v43 = vld [vmem:[%s4216_s28 + $0x160] sm:$0xff]   ;;  %v3859_v45 = vld [vmem:[%s4216_s28 + $0x168] sm:$0xff]   ;;  %v3861_v47 = vld [vmem:[%s4216_s28 + $0x170] sm:$0xff]  }
  0x47   : > { %v3862_v48 = vld [vmem:[%s4216_s28 + $0x138] sm:$0xff]   ;;  %v3864_v50 = vld [vmem:[%s4216_s28 + $0x180] sm:$0xff]   ;;  %v3866_v52 = vld [vmem:[%s4216_s28 + $0x188] sm:$0xff]  }
  0x48   : > { %v3863_v49 = vld [vmem:[%s4216_s28 + $0x178] sm:$0xff]   ;;  %v3865_v51 = vld [vmem:[%s4216_s28 + $0x1c0] sm:$0xff]   ;;  %v3867_v53 = vld [vmem:[%s4216_s28 + $0x1c8] sm:$0xff]  }
  0x49   : > { %v3868_v54 = vld [vmem:[%s4216_s28 + $0x190] sm:$0xff]   ;;  %v3870_v56 = vld [vmem:[%s4216_s28 + $0x198] sm:$0xff]   ;;  %v3872_v58 = vld [vmem:[%s4216_s28 + $0x1a0] sm:$0xff]  }
  0x4a   : > { %3504 = vmatpush3.bf16.xpose.msra.mxu0 %v3820_v5  ;;  %3524 = vmatpush3.bf16.xpose.msra.mxu1 %v3821_v6  ;;  %v3869_v55 = vld [vmem:[%s4216_s28 + $0x1d0] sm:$0xff]   ;;  %v3871_v57 = vld [vmem:[%s4216_s28 + $0x1d8] sm:$0xff]   ;;  %v3873_v59 = vld [vmem:[%s4216_s28 + $0x1e0] sm:$0xff]  }
  0x4b   : > { %3505 = vmatprep.subr.bf16.mxu0 %v4093_v0  ;;  %3525 = vmatprep.subr.bf16.mxu1 %v4093_v0  ;;  %v3874_v60 = vld [vmem:[%s4216_s28 + $0x1a8] sm:$0xff]   ;;  %v3876_v62 = vld [vmem:[%s4216_s28 + $0x1b0] sm:$0xff]   ;;  %v3878_v1 = vld [vmem:[%s4216_s28 + $0x1b8] sm:$0xff]  }
  0x4c   : > { %v3875_v61 = vld [vmem:[%s4216_s28 + $0x1e8] sm:$0xff]   ;;  %v3877_v63 = vld [vmem:[%s4216_s28 + $0x1f0] sm:$0xff]   ;;  %v3879_v2 = vld [vmem:[%s4216_s28 + $0x1f8] sm:$0xff]  }
  0x4d   : > { %v3880_v3 = vld [vmem:[%s4216_s28 + $0x200] sm:$0xff]   ;;  %v3882_v5 = vld [vmem:[%s4216_s28 + $0x208] sm:$0xff]  }
  0x4e   : > { %v3881_v4 = vld [vmem:[%s4216_s28 + $0x240] sm:$0xff]   ;;  %v3883_v6 = vld [vmem:[%s4216_s28 + $0x248] sm:$0xff]  }
  0x52   : > { %3506 = vmatpush3.bf16.xpose.msra.mxu0 %v3822_v7  ;;  %3526 = vmatpush3.bf16.xpose.msra.mxu1 %v3823_v8  ;;  %v3884_v7 = vld [vmem:[%s4216_s28 + $0x210] sm:$0xff]  }
  0x53   : > { %3507 = vmatprep.subr.bf16.mxu0 %v4093_v0  ;;  %3527 = vmatprep.subr.bf16.mxu1 %v4093_v0  ;;  %v3885_v8 = vld [vmem:[%s4216_s28 + $0x250] sm:$0xff]  }
  0x5a   : > { %3508 = vmatpush3.bf16.xpose.msra.mxu0 %v3824_v9  ;;  %3528 = vmatpush3.bf16.xpose.msra.mxu1 %v3825_v10 }
  0x5b   : > { %3509 = vmatprep.subr.bf16.mxu0 %v4093_v0  ;;  %3529 = vmatprep.subr.bf16.mxu1 %v4093_v0 }
  0x62   : > { %3510 = vmatpush3.bf16.xpose.msra.mxu0 %v3826_v11  ;;  %3530 = vmatpush3.bf16.xpose.msra.mxu1 %v3827_v12 }
  0x63   : > { %3511 = vmatprep.subr.bf16.mxu0 %v4093_v0  ;;  %3531 = vmatprep.subr.bf16.mxu1 %v4093_v0 }
  0x6a   : > { %3512 = vmatpush3.bf16.xpose.msra.mxu0 %v3828_v13  ;;  %3532 = vmatpush3.bf16.xpose.msra.mxu1 %v3829_v14 }
  0x6b   : > { %3513 = vmatprep.subr.bf16.mxu0 %v4093_v0  ;;  %3533 = vmatprep.subr.bf16.mxu1 %v4093_v0 }
  0x72   : > { %3514 = vmatpush3.bf16.xpose.msra.mxu0 %v3830_v15  ;;  %3534 = vmatpush3.bf16.xpose.msra.mxu1 %v3831_v16  ;;  %v3886_v15 = vld [vmem:[%s4216_s28 + $0x218] sm:$0xff]  }
  0x73   : > { %3539 = vmatprep.subr.bf16.mxu0 %v4093_v0  ;;  %3559 = vmatprep.subr.bf16.mxu1 %v4093_v0 }
  0x79   : > { %3516 = vmatmul.mubr.bf16.vlgmr.msra.gmra.mrb[0].mxu0 %v4267_v17  ;;  %3536 = vmatmul.mubr.bf16.vlgmr.msra.gmra.mrb[0].mxu1 %v4267_v17 }
  0x7a   : > { %3540 = vmatpush3.bf16.xpose.msra.mxu0 %v3832_v18  ;;  %3560 = vmatpush3.bf16.xpose.msra.mxu1 %v3833_v19  ;;  %v3887_v19 = vld [vmem:[%s4216_s28 + $0x258] sm:$0xff]  }
  0x7b   : > { %3541 = vmatprep.subr.bf16.mxu0 %v4093_v0  ;;  %3561 = vmatprep.subr.bf16.mxu1 %v4093_v0 }
  0x7c   : > { %3555 = vmatprep.mubr.msk.bf16.mxu0 %vm4094_vm0, %v4093_v0  ;;  %3575 = vmatprep.mubr.msk.bf16.mxu1 %vm4094_vm0, %v4093_v0 }
  0x82   : > { %3542 = vmatpush3.bf16.xpose.msra.mxu0 %v3834_v20  ;;  %3562 = vmatpush3.bf16.xpose.msra.mxu1 %v3835_v21 }
  0x83   : > { %3543 = vmatprep.subr.bf16.mxu0 %v4093_v0  ;;  %3563 = vmatprep.subr.bf16.mxu1 %v4093_v0 }
  0x8a   : > { %3544 = vmatpush3.bf16.xpose.msra.mxu0 %v3836_v22  ;;  %3564 = vmatpush3.bf16.xpose.msra.mxu1 %v3837_v23  ;;  %v3888_v23 = vld [vmem:[%s4216_s28 + $0x220] sm:$0xff]  }
  0x8b   : > { %3545 = vmatprep.subr.bf16.mxu0 %v4093_v0  ;;  %3565 = vmatprep.subr.bf16.mxu1 %v4093_v0 }
  0x92   : > { %3546 = vmatpush3.bf16.xpose.msra.mxu0 %v3838_v24  ;;  %3566 = vmatpush3.bf16.xpose.msra.mxu1 %v3839_v25  ;;  %v3889_v24 = vld [vmem:[%s4216_s28 + $0x260] sm:$0xff]   ;;  %v3890_v25 = vld [vmem:[%s4216_s28 + $0x228] sm:$0xff]  }
  0x93   : > { %3547 = vmatprep.subr.bf16.mxu0 %v4093_v0  ;;  %3567 = vmatprep.subr.bf16.mxu1 %v4093_v0 }
  0x9a   : > { %3548 = vmatpush3.bf16.xpose.msra.mxu0 %v3840_v26  ;;  %3568 = vmatpush3.bf16.xpose.msra.mxu1 %v3841_v27  ;;  %v3891_v26 = vld [vmem:[%s4216_s28 + $0x268] sm:$0xff]   ;;  %v3892_v27 = vld [vmem:[%s4216_s28 + $0x230] sm:$0xff]  }
  0x9b   : > { %3549 = vmatprep.subr.bf16.mxu0 %v4093_v0  ;;  %3569 = vmatprep.subr.bf16.mxu1 %v4093_v0 }
  0xa2   : > { %3550 = vmatpush3.bf16.xpose.msra.mxu0 %v3842_v28  ;;  %3570 = vmatpush3.bf16.xpose.msra.mxu1 %v3843_v29  ;;  %v3893_v28 = vld [vmem:[%s4216_s28 + $0x270] sm:$0xff]   ;;  %v3894_v29 = vld [vmem:[%s4216_s28 + $0x238] sm:$0xff]  }
  0xa3   : > { %3551 = vmatprep.subr.bf16.mxu0 %v4093_v0  ;;  %3571 = vmatprep.subr.bf16.mxu1 %v4093_v0 }
  0xaa   : > { %3552 = vmatpush3.bf16.xpose.msra.mxu0 %v3844_v30  ;;  %3572 = vmatpush3.bf16.xpose.msra.mxu1 %v3845_v31  ;;  %v3895_v30 = vld [vmem:[%s4216_s28 + $0x278] sm:$0xff]   ;;  %v3896_v31 = vld [vmem:[%s4216_s28 + $0x280] sm:$0xff]  }
  0xab   : > { %3553 = vmatprep.subr.bf16.mxu0 %v4093_v0  ;;  %3573 = vmatprep.subr.bf16.mxu1 %v4093_v0 }
  0xb2   : > { %3554 = vmatpush3.bf16.xpose.msra.mxu0 %v3846_v32  ;;  %3574 = vmatpush3.bf16.xpose.msra.mxu1 %v3847_v33  ;;  %v3897_v32 = vld [vmem:[%s4216_s28 + $0x2c0] sm:$0xff]   ;;  %v3898_v33 = vld [vmem:[%s4216_s28 + $0x288] sm:$0xff]  }
  0xb3   : > { %3579 = vmatprep.subr.bf16.mxu0 %v4093_v0  ;;  %3599 = vmatprep.subr.bf16.mxu1 %v4093_v0 }
  0xb9   : > { %3556 = vmatmul.mubr.bf16.vlgmr.msra.gmra.mrb[4].mxu0 %v4267_v17  ;;  %3576 = vmatmul.mubr.bf16.vlgmr.msra.gmra.mrb[4].mxu1 %v4267_v17 }
  0xba   : > { %3580 = vmatpush3.bf16.xpose.msra.mxu0 %v3848_v34  ;;  %3600 = vmatpush3.bf16.xpose.msra.mxu1 %v3849_v35  ;;  %v3899_v34 = vld [vmem:[%s4216_s28 + $0x2c8] sm:$0xff]   ;;  %v3900_v35 = vld [vmem:[%s4216_s28 + $0x290] sm:$0xff]  }
  0xbb   : > { %3581 = vmatprep.subr.bf16.mxu0 %v4093_v0  ;;  %3601 = vmatprep.subr.bf16.mxu1 %v4093_v0 }
  0xbc   : > { %3595 = vmatprep.mubr.msk.bf16.mxu0 %vm4094_vm0, %v4093_v0  ;;  %3615 = vmatprep.mubr.msk.bf16.mxu1 %vm4094_vm0, %v4093_v0 }
  0xc2   : > { %3582 = vmatpush3.bf16.xpose.msra.mxu0 %v3850_v36  ;;  %3602 = vmatpush3.bf16.xpose.msra.mxu1 %v3851_v37  ;;  %v3901_v36 = vld [vmem:[%s4216_s28 + $0x2d0] sm:$0xff]  }
  0xc3   : > { %3583 = vmatprep.subr.bf16.mxu0 %v4093_v0  ;;  %3603 = vmatprep.subr.bf16.mxu1 %v4093_v0 }
  0xca   : > { %3584 = vmatpush3.bf16.xpose.msra.mxu0 %v3852_v38  ;;  %3604 = vmatpush3.bf16.xpose.msra.mxu1 %v3853_v39 }
  0xcb   : > { %3585 = vmatprep.subr.bf16.mxu0 %v4093_v0  ;;  %3605 = vmatprep.subr.bf16.mxu1 %v4093_v0 }
  0xd2   : > { %3586 = vmatpush3.bf16.xpose.msra.mxu0 %v3854_v40  ;;  %3606 = vmatpush3.bf16.xpose.msra.mxu1 %v3855_v41 }
  0xd3   : > { %3587 = vmatprep.subr.bf16.mxu0 %v4093_v0  ;;  %3607 = vmatprep.subr.bf16.mxu1 %v4093_v0 }
  0xda   : > { %3588 = vmatpush3.bf16.xpose.msra.mxu0 %v3856_v42  ;;  %3608 = vmatpush3.bf16.xpose.msra.mxu1 %v3857_v43 }
  0xdb   : > { %3589 = vmatprep.subr.bf16.mxu0 %v4093_v0  ;;  %3609 = vmatprep.subr.bf16.mxu1 %v4093_v0 }
  0xe2   : > { %3590 = vmatpush3.bf16.xpose.msra.mxu0 %v3858_v44  ;;  %3610 = vmatpush3.bf16.xpose.msra.mxu1 %v3859_v45  ;;  %v3902_v44 = vld [vmem:[%s4216_s28 + $0x298] sm:$0xff]  }
  0xe3   : > { %3591 = vmatprep.subr.bf16.mxu0 %v4093_v0  ;;  %3611 = vmatprep.subr.bf16.mxu1 %v4093_v0 }
  0xea   : > { %3592 = vmatpush3.bf16.xpose.msra.mxu0 %v3860_v46  ;;  %3612 = vmatpush3.bf16.xpose.msra.mxu1 %v3861_v47 }
  0xeb   : > { %3593 = vmatprep.subr.bf16.mxu0 %v4093_v0  ;;  %3613 = vmatprep.subr.bf16.mxu1 %v4093_v0 }
  0xf2   : > { %3594 = vmatpush3.bf16.xpose.msra.mxu0 %v3862_v48  ;;  %3614 = vmatpush3.bf16.xpose.msra.mxu1 %v3863_v49  ;;  %v3903_v49 = vld [vmem:[%s4216_s28 + $0x2d8] sm:$0xff]  }
  0xf3   : > { %3619 = vmatprep.subr.bf16.mxu0 %v4093_v0  ;;  %3639 = vmatprep.subr.bf16.mxu1 %v4093_v0 }
  0xf9   : > { %3596 = vmatmul.mubr.bf16.vlgmr.msra.gmra.mrb[8].mxu0 %v4267_v17  ;;  %3616 = vmatmul.mubr.bf16.vlgmr.msra.gmra.mrb[8].mxu1 %v4267_v17 }
  0xfa   : > { %3620 = vmatpush3.bf16.xpose.msra.mxu0 %v3864_v50  ;;  %3640 = vmatpush3.bf16.xpose.msra.mxu1 %v3865_v51 }
  0xfb   : > { %3621 = vmatprep.subr.bf16.mxu0 %v4093_v0  ;;  %3641 = vmatprep.subr.bf16.mxu1 %v4093_v0 }
  0xfc   : > { %3635 = vmatprep.mubr.msk.bf16.mxu0 %vm4094_vm0, %v4093_v0  ;;  %3655 = vmatprep.mubr.msk.bf16.mxu1 %vm4094_vm0, %v4093_v0 }
 0x102   : > { %3622 = vmatpush3.bf16.xpose.msra.mxu0 %v3866_v52  ;;  %3642 = vmatpush3.bf16.xpose.msra.mxu1 %v3867_v53  ;;  %v3904_v53 = vld [vmem:[%s4216_s28 + $0x2a0] sm:$0xff]  }
 0x103   : > { %3623 = vmatprep.subr.bf16.mxu0 %v4093_v0  ;;  %3643 = vmatprep.subr.bf16.mxu1 %v4093_v0 }
 0x10a   : > { %3624 = vmatpush3.bf16.xpose.msra.mxu0 %v3868_v54  ;;  %3644 = vmatpush3.bf16.xpose.msra.mxu1 %v3869_v55  ;;  %v3905_v54 = vld [vmem:[%s4216_s28 + $0x2e0] sm:$0xff]   ;;  %v3906_v55 = vld [vmem:[%s4216_s28 + $0x2a8] sm:$0xff]  }
 0x10b   : > { %3625 = vmatprep.subr.bf16.mxu0 %v4093_v0  ;;  %3645 = vmatprep.subr.bf16.mxu1 %v4093_v0 }
 0x112   : > { %3626 = vmatpush3.bf16.xpose.msra.mxu0 %v3870_v56  ;;  %3646 = vmatpush3.bf16.xpose.msra.mxu1 %v3871_v57  ;;  %v3907_v56 = vld [vmem:[%s4216_s28 + $0x2e8] sm:$0xff]   ;;  %v3908_v57 = vld [vmem:[%s4216_s28 + $0x2b0] sm:$0xff]  }
 0x113   : > { %3627 = vmatprep.subr.bf16.mxu0 %v4093_v0  ;;  %3647 = vmatprep.subr.bf16.mxu1 %v4093_v0 }
 0x11a   : > { %3628 = vmatpush3.bf16.xpose.msra.mxu0 %v3872_v58  ;;  %3648 = vmatpush3.bf16.xpose.msra.mxu1 %v3873_v59  ;;  %v3909_v58 = vld [vmem:[%s4216_s28 + $0x2f0] sm:$0xff]   ;;  %v3910_v59 = vld [vmem:[%s4216_s28 + $0x2b8] sm:$0xff]  }
 0x11b   : > { %3629 = vmatprep.subr.bf16.mxu0 %v4093_v0  ;;  %3649 = vmatprep.subr.bf16.mxu1 %v4093_v0 }
 0x122   : > { %3630 = vmatpush3.bf16.xpose.msra.mxu0 %v3874_v60  ;;  %3650 = vmatpush3.bf16.xpose.msra.mxu1 %v3875_v61  ;;  %v3911_v60 = vld [vmem:[%s4216_s28 + $0x2f8] sm:$0xff]   ;;  %s205_s28 = scalar_lea.vmem %s5810_s2, %s3390_s23 }
 0x123   : > { %3631 = vmatprep.subr.bf16.mxu0 %v4093_v0  ;;  %3651 = vmatprep.subr.bf16.mxu1 %v4093_v0 }
 0x12a   : > { %3632 = vmatpush3.bf16.xpose.msra.mxu0 %v3876_v62  ;;  %3652 = vmatpush3.bf16.xpose.msra.mxu1 %v3877_v63 }
 0x12b   : > { %3633 = vmatprep.subr.bf16.mxu0 %v4093_v0  ;;  %3653 = vmatprep.subr.bf16.mxu1 %v4093_v0 }
 0x132   : > { %3634 = vmatpush3.bf16.xpose.msra.mxu0 %v3878_v1  ;;  %3654 = vmatpush3.bf16.xpose.msra.mxu1 %v3879_v2 }
 0x133   : > { %3659 = vmatprep.subr.bf16.mxu0 %v4093_v0  ;;  %3679 = vmatprep.subr.bf16.mxu1 %v4093_v0 }
 0x139   : > { %3636 = vmatmul.mubr.bf16.vlgmr.msra.gmra.mrb[12].mxu0 %v4267_v17  ;;  %3656 = vmatmul.mubr.bf16.vlgmr.msra.gmra.mrb[12].mxu1 %v4267_v17 }
 0x13a   : > { %3660 = vmatpush3.bf16.xpose.msra.mxu0 %v3880_v3  ;;  %3680 = vmatpush3.bf16.xpose.msra.mxu1 %v3881_v4 }
 0x13b   : > { %3661 = vmatprep.subr.bf16.mxu0 %v4093_v0  ;;  %3681 = vmatprep.subr.bf16.mxu1 %v4093_v0 }
 0x13c   : > { %3675 = vmatprep.mubr.msk.bf16.mxu0 %vm4094_vm0, %v4093_v0  ;;  %3695 = vmatprep.mubr.msk.bf16.mxu1 %vm4094_vm0, %v4093_v0 }
 0x142   : > { %3662 = vmatpush3.bf16.xpose.msra.mxu0 %v3882_v5  ;;  %3682 = vmatpush3.bf16.xpose.msra.mxu1 %v3883_v6 }
 0x143   : > { %3663 = vmatprep.subr.bf16.mxu0 %v4093_v0  ;;  %3683 = vmatprep.subr.bf16.mxu1 %v4093_v0 }
 0x14a   : > { %3664 = vmatpush3.bf16.xpose.msra.mxu0 %v3884_v7  ;;  %3684 = vmatpush3.bf16.xpose.msra.mxu1 %v3885_v8 }
 0x14b   : > { %3665 = vmatprep.subr.bf16.mxu0 %v4093_v0  ;;  %3685 = vmatprep.subr.bf16.mxu1 %v4093_v0 }
 0x14c   : > { %v4401_v9 = vpop.f32.mrb[0].mxu0  ;;  %v4404_v10 = vpop.f32.mrb[0].mxu1 }
 0x14d   : > { %v3517_v11 = vpop.f32.mrb[1].mxu0  ;;  %v1469_v12 = vrot.slane %v4404_v10, 7  ;;  %v3537_v13 = vpop.f32.mrb[1].mxu1 }
 0x14e   : > { %v486_v14 = vpop.f32.mrb[2].mxu0  ;;  %v574_v16 = vpop.f32.mrb[2].mxu1 }
 0x14f   : > { %v3518_v18 = vpop.f32.mrb[3].mxu0  ;;  %v4411_v20 = vsel %vm1470_vm1, %v1469_v12, %v4401_v9  ;;  %v4415_v21 = vsel %vm1473_vm2, %v1469_v12, %v4401_v9  ;;  %v3538_v22 = vpop.f32.mrb[3].mxu1 }
 0x152   : > { %3666 = vmatpush3.bf16.xpose.msra.mxu0 %v3886_v15  ;;  %3686 = vmatpush3.bf16.xpose.msra.mxu1 %v3887_v19 }
 0x153   : > { %3667 = vmatprep.subr.bf16.mxu0 %v4093_v0  ;;  %3687 = vmatprep.subr.bf16.mxu1 %v4093_v0 }
 0x15a   : > { %3668 = vmatpush3.bf16.xpose.msra.mxu0 %v3888_v23  ;;  %3688 = vmatpush3.bf16.xpose.msra.mxu1 %v3889_v24 }
 0x15b   : > { %3669 = vmatprep.subr.bf16.mxu0 %v4093_v0  ;;  %3689 = vmatprep.subr.bf16.mxu1 %v4093_v0 }
 0x162   : > { %3670 = vmatpush3.bf16.xpose.msra.mxu0 %v3890_v25  ;;  %3690 = vmatpush3.bf16.xpose.msra.mxu1 %v3891_v26 }
 0x163   : > { %3671 = vmatprep.subr.bf16.mxu0 %v4093_v0  ;;  %3691 = vmatprep.subr.bf16.mxu1 %v4093_v0 }
 0x16a   : > { %3672 = vmatpush3.bf16.xpose.msra.mxu0 %v3892_v27  ;;  %3692 = vmatpush3.bf16.xpose.msra.mxu1 %v3893_v28 }
 0x16b   : > { %3673 = vmatprep.subr.bf16.mxu0 %v4093_v0  ;;  %3693 = vmatprep.subr.bf16.mxu1 %v4093_v0 }
 0x172   : > { %3674 = vmatpush3.bf16.xpose.msra.mxu0 %v3894_v29  ;;  %3694 = vmatpush3.bf16.xpose.msra.mxu1 %v3895_v30 }
 0x173   : > { %3699 = vmatprep.subr.bf16.mxu0 %v4093_v0  ;;  %3719 = vmatprep.subr.bf16.mxu1 %v4093_v0 }
 0x179   : > { %3676 = vmatmul.mubr.bf16.vlgmr.msra.gmra.mrb[16].mxu0 %v4267_v17  ;;  %3696 = vmatmul.mubr.bf16.vlgmr.msra.gmra.mrb[16].mxu1 %v4267_v17 }
 0x17a   : > { %3700 = vmatpush3.bf16.xpose.msra.mxu0 %v3896_v31  ;;  %3720 = vmatpush3.bf16.xpose.msra.mxu1 %v3897_v32 }
 0x17b   : > { %3701 = vmatprep.subr.bf16.mxu0 %v4093_v0  ;;  %3721 = vmatprep.subr.bf16.mxu1 %v4093_v0 }
 0x17c   : > { %3715 = vmatprep.mubr.msk.bf16.mxu0 %vm4094_vm0, %v4093_v0  ;;  %3735 = vmatprep.mubr.msk.bf16.mxu1 %vm4094_vm0, %v4093_v0 }
 0x182   : > { %3702 = vmatpush3.bf16.xpose.msra.mxu0 %v3898_v33  ;;  %3722 = vmatpush3.bf16.xpose.msra.mxu1 %v3899_v34 }
 0x183   : > { %3703 = vmatprep.subr.bf16.mxu0 %v4093_v0  ;;  %3723 = vmatprep.subr.bf16.mxu1 %v4093_v0 }
 0x18a   : > { %3704 = vmatpush3.bf16.xpose.msra.mxu0 %v3900_v35  ;;  %3724 = vmatpush3.bf16.xpose.msra.mxu1 %v3901_v36 }
 0x18b   : > { %3705 = vmatprep.subr.bf16.mxu0 %v4093_v0  ;;  %3725 = vmatprep.subr.bf16.mxu1 %v4093_v0 }
 0x18c   : > { %v4452_v37 = vpop.f32.mrb[4].mxu0  ;;  %v4456_v39 = vpop.f32.mrb[4].mxu1 }
 0x18d   : > { %v1472_v38 = vrot.slane %v4452_v37, 6  ;;  %v3557_v40 = vpop.f32.mrb[5].mxu0  ;;  %v1475_v41 = vrot.slane %v4456_v39, 5  ;;  %v3577_v42 = vpop.f32.mrb[5].mxu1 }
 0x18e   : > { %v662_v43 = vpop.f32.mrb[6].mxu0  ;;  %v750_v47 = vpop.f32.mrb[6].mxu1 }
 0x18f   : > { %v1474_v45 = vsel %vm1473_vm2, %v1472_v38, %v4411_v20  ;;  %v1652_v46 = vsel %vm1476_vm3, %v1472_v38, %v4415_v21  ;;  %v3558_v48 = vpop.f32.mrb[7].mxu0  ;;  %v3578_v51 = vpop.f32.mrb[7].mxu1 }
 0x190   : > { %v1477_v50 = vsel %vm1476_vm3, %v1475_v41, %v1474_v45  ;;  %v1653_v52 = vsel %vm1479_vm4, %v1475_v41, %v1652_v46 }
 0x192   : > { %3706 = vmatpush3.bf16.xpose.msra.mxu0 %v3902_v44  ;;  %3726 = vmatpush3.bf16.xpose.msra.mxu1 %v3903_v49 }
 0x193   : > { %3707 = vmatprep.subr.bf16.mxu0 %v4093_v0  ;;  %3727 = vmatprep.subr.bf16.mxu1 %v4093_v0 }
 0x19a   : > { %3708 = vmatpush3.bf16.xpose.msra.mxu0 %v3904_v53  ;;  %3728 = vmatpush3.bf16.xpose.msra.mxu1 %v3905_v54 }
 0x19b   : > { %3709 = vmatprep.subr.bf16.mxu0 %v4093_v0  ;;  %3729 = vmatprep.subr.bf16.mxu1 %v4093_v0 }
 0x1a2   : > { %3710 = vmatpush3.bf16.xpose.msra.mxu0 %v3906_v55  ;;  %3730 = vmatpush3.bf16.xpose.msra.mxu1 %v3907_v56 }
 0x1a3   : > { %3711 = vmatprep.subr.bf16.mxu0 %v4093_v0  ;;  %3731 = vmatprep.subr.bf16.mxu1 %v4093_v0 }
 0x1aa   : > { %3712 = vmatpush3.bf16.xpose.msra.mxu0 %v3908_v57  ;;  %3732 = vmatpush3.bf16.xpose.msra.mxu1 %v3909_v58 }
 0x1ab   : > { %3713 = vmatprep.subr.bf16.mxu0 %v4093_v0  ;;  %3733 = vmatprep.subr.bf16.mxu1 %v4093_v0 }
 0x1b2   : > { %3714 = vmatpush3.bf16.xpose.msra.mxu0 %v3910_v59  ;;  %3734 = vmatpush3.bf16.xpose.msra.mxu1 %v3911_v60 }
 0x1b9   : > { %3716 = vmatmul.mubr.bf16.vlgmr.msra.gmra.mrb[20].mxu0 %v4267_v17  ;;  %3736 = vmatmul.mubr.bf16.vlgmr.msra.gmra.mrb[20].mxu1 %v4267_v17 }
 0x1cc   : > { %v4485_v61 = vpop.f32.mrb[8].mxu0  ;;  %v4488_v63 = vpop.f32.mrb[8].mxu1 }
 0x1cd   : > { %v1478_v62 = vrot.slane %v4485_v61, 4  ;;  %v3597_v1 = vpop.f32.mrb[9].mxu0  ;;  %v1481_v2 = vrot.slane %v4488_v63, 3  ;;  %v3617_v0 = vpop.f32.mrb[9].mxu1 }
 0x1ce   : > { %v838_v3 = vpop.f32.mrb[10].mxu0  ;;  %v926_v4 = vpop.f32.mrb[10].mxu1 }
 0x1cf   : > { %v3598_v5 = vpop.f32.mrb[11].mxu0  ;;  %v1654_v6 = vsel %vm1482_vm5, %v1478_v62, %v1653_v52  ;;  %v1480_v7 = vsel %vm1479_vm4, %v1478_v62, %v1477_v50  ;;  %v3618_v17 = vpop.f32.mrb[11].mxu1 }
 0x1d0   : > { %v1655_v8 = vsel %vm1485_vm6, %v1481_v2, %v1654_v6  ;;  %v1483_v11 = vsel %vm1482_vm5, %v1481_v2, %v1480_v7 }
 0x20c   : > { %v4495_v12 = vpop.f32.mrb[12].mxu0  ;;  %v4498_v14 = vpop.f32.mrb[12].mxu1 }
 0x20d   : > { %v1484_v13 = vrot.slane %v4495_v12, 2  ;;  %v3637_v15 = vpop.f32.mrb[13].mxu0  ;;  %v1487_v16 = vrot.slane %v4498_v14, 1  ;;  %v3657_v18 = vpop.f32.mrb[13].mxu1 }
 0x20e   : > { %v1014_v19 = vpop.f32.mrb[14].mxu0  ;;  %v1102_v20 = vpop.f32.mrb[14].mxu1 }
 0x20f   : > { %v3638_v21 = vpop.f32.mrb[15].mxu0  ;;  %v1656_v22 = vsel %vm1488_vm7, %v1484_v13, %v1655_v8  ;;  %v1486_v23 = vsel %vm1485_vm6, %v1484_v13, %v1483_v11  ;;  %v3658_v24 = vpop.f32.mrb[15].mxu1 }
 0x210   : > { %v1664_v25 = vsel %vm1663_vm8, %v1656_v22, -inf  ;;  %v1489_v26 = vsel %vm1488_vm7, %v1487_v16, %v1486_v23 }
 0x211   : > { %1665 = vmax.xlane.f32.xlu0 %v1664_v25  ;;  %1498 = vmax.xlane.f32.xlu1 %v1489_v26 }
 0x24c   : > { %v4505_v27 = vpop.f32.mrb[16].mxu0  ;;  %v4509_v29 = vpop.f32.mrb[16].mxu1 }
 0x24d   : > { %v1657_v28 = vsel %vm1470_vm1, %v4505_v27, %v1487_v16  ;;  %v3677_v30 = vpop.f32.mrb[17].mxu0  ;;  %v1490_v31 = vrot.slane %v4509_v29, 7  ;;  %v3697_v32 = vpop.f32.mrb[17].mxu1 }
 0x24e   : > { %v1190_v33 = vpop.f32.mrb[18].mxu0  ;;  %v1278_v34 = vpop.f32.mrb[18].mxu1 }
 0x24f   : > { %v3678_v35 = vpop.f32.mrb[19].mxu0  ;;  %v3698_v36 = vpop.f32.mrb[19].mxu1  ;;  %v1658_v38 = vsel %vm1473_vm2, %v1490_v31, %v1657_v28  ;;  %v1491_v40 = vsel %vm1470_vm1, %v1490_v31, %v4505_v27 }
 0x28c   : > { %v4515_v41 = vpop.f32.mrb[20].mxu0  ;;  %v4518_v43 = vpop.f32.mrb[20].mxu1 }
 0x28d   : > { %v1492_v42 = vrot.slane %v4515_v41, 6  ;;  %v3717_v44 = vpop.f32.mrb[21].mxu0  ;;  %v1494_v45 = vrot.slane %v4518_v43, 5  ;;  %v3737_v46 = vpop.f32.mrb[21].mxu1 }
 0x28e   : > { %v1366_v47 = vpop.f32.mrb[22].mxu0  ;;  %v1454_v48 = vpop.f32.mrb[22].mxu1 }
 0x28f   : > { %v3718_v49 = vpop.f32.mrb[23].mxu0  ;;  %v1659_v50 = vsel %vm1476_vm3, %v1492_v42, %v1658_v38  ;;  %v1493_v51 = vsel %vm1473_vm2, %v1492_v42, %v1491_v40  ;;  %v3738_v52 = vpop.f32.mrb[23].mxu1 }
 0x290   : > { %v1660_v53 = vsel %vm1479_vm4, %v1494_v45, %v1659_v50  ;;  %v1495_v54 = vsel %vm1476_vm3, %v1494_v45, %v1493_v51 }
 0x291   : > { %v1668_v55 = vsel %vm1667_vm9, %v1660_v53, -inf  ;;  %v1501_v56 = vsel %vm5852_vm10, %v1495_v54, -inf }
 0x292   : > { %1669 = vmax.xlane.f32.xlu0 %v1668_v55  ;;  %1502 = vmax.xlane.f32.xlu1 %v1501_v56 }
 0x29e   : > { %v1666_v57 = vpop.xlane.xlu0 %1665  ;;  %v1499_v58 = vpop.xlane.xlu1 %1498 }
 0x29f   : > { %v1673_v59 = vrot.slane %v1666_v57, 1  ;;  %v1674_v60 = vrot.slane %v1666_v57, 2  ;;  %v1675_v62 = vrot.slane %v1666_v57, 3  ;;  %v1676_v1 = vrot.slane %v1666_v57, 4 }
 0x2a0   : > { %v1677_v2 = vrot.slane %v1666_v57, 5  ;;  %v1678_v0 = vrot.slane %v1666_v57, 6  ;;  %v1695_v3 = vsub.f32 %v4401_v9, %v1666_v57  ;;  %v1506_v4 = vrot.slane %v1499_v58, 1 }
 0x2a1   : > { %v1696_v5 = vsub.f32 %v4404_v10, %v1673_v59  ;;  %v1697_v6 = vsub.f32 %v4452_v37, %v1674_v60  ;;  %v1698_v7 = vsub.f32 %v4456_v39, %v1675_v62  ;;  %v1699_v17 = vsub.f32 %v4485_v61, %v1676_v1 }
 0x2a2   : > { %v1700_v8 = vsub.f32 %v4488_v63, %v1677_v2  ;;  %v1701_v11 = vsub.f32 %v4495_v12, %v1678_v0  ;;  %v1707_v13 = vmul.f32 1.442695, %v1695_v3  ;;  %v1507_v15 = vrot.slane %v1499_v58, 2 }
 0x2a3   : > { %v1709_v16 = vmul.f32 1.442695, %v1696_v5  ;;  %v1711_v18 = vmul.f32 1.442695, %v1697_v6  ;;  %v1713_v19 = vmul.f32 1.442695, %v1698_v7  ;;  %v1528_v20 = vsub.f32 %v4401_v9, %v1499_v58 }
 0x2a4   : > { %3912 = vpow2.f32 %v1707_v13  ;;  %v1715_v21 = vmul.f32 1.442695, %v1699_v17  ;;  %v1717_v22 = vmul.f32 1.442695, %v1700_v8  ;;  %v1508_v23 = vrot.slane %v1499_v58, 3 }
 0x2a5   : > { %3914 = vpow2.f32 %v1709_v16  ;;  %v1509_v24 = vrot.slane %v1499_v58, 4  ;;  %v1510_v25 = vrot.slane %v1499_v58, 5  ;;  %v1511_v26 = vrot.slane %v1499_v58, 6 }
 0x2a6   : > { %3916 = vpow2.f32 %v1711_v18  ;;  %v1529_v28 = vsub.f32 %v4404_v10, %v1506_v4  ;;  %v1530_v30 = vsub.f32 %v4452_v37, %v1507_v15  ;;  %v1531_v31 = vsub.f32 %v4456_v39, %v1508_v23 }
 0x2a7   : > { %3918 = vpow2.f32 %v1713_v19  ;;  %v1532_v32 = vsub.f32 %v4485_v61, %v1509_v24  ;;  %v1540_v33 = vmul.f32 1.442695, %v1528_v20  ;;  %v1512_v36 = vrot.slane %v1499_v58, 7 }
 0x2a8   : > { %3920 = vpow2.f32 %v1715_v21  ;;  %v1542_v9 = vmul.f32 1.442695, %v1529_v28  ;;  %v1544_v34 = vmul.f32 1.442695, %v1530_v30  ;;  %v1546_v35 = vmul.f32 1.442695, %v1531_v31 }
 0x2a9   : > { %3922 = vpow2.f32 %v1717_v22  ;;  %v1533_v38 = vsub.f32 %v4488_v63, %v1510_v25  ;;  %v1719_v40 = vmul.f32 1.442695, %v1701_v11  ;;  %v1534_v10 = vsub.f32 %v4495_v12, %v1511_v26 }
 0x2aa   : > { %3924 = vpow2.f32 %v1540_v33  ;;  %v1548_v37 = vmul.f32 1.442695, %v1532_v32  ;;  %v1535_v39 = vsub.f32 %v4498_v14, %v1512_v36 }
 0x2ab   : > { %3926 = vpow2.f32 %v1542_v9  ;;  %v1550_v42 = vmul.f32 1.442695, %v1533_v38  ;;  %v1552_v61 = vmul.f32 1.442695, %v1534_v10 }
 0x2ac   : > { %3928 = vpow2.f32 %v1544_v34  ;;  %v1554_v45 = vmul.f32 1.442695, %v1535_v39 }
 0x2ad   : > { %3930 = vpow2.f32 %v1546_v35 }
 0x2ae   : > { %v4542_v44 = vpop.eup %3912  ;;  %3932 = vpow2.f32 %v1719_v40 }
 0x2af   : > { %v4544_v46 = vpop.eup %3914  ;;  %3934 = vpow2.f32 %v1548_v37 }
 0x2b0   : > { %v4546_v63 = vpop.eup %3916  ;;  %v1743_v47 = vrot.slane %v4544_v46, 7  ;;  %3936 = vpow2.f32 %v1550_v42 }
 0x2b1   : > { %v4549_v12 = vpop.eup %3918  ;;  %v1745_v48 = vrot.slane %v4546_v63, 6  ;;  %3938 = vpow2.f32 %v1552_v61 }
 0x2b2   : > { %v4552_v49 = vpop.eup %3920  ;;  %v1744_v50 = vsel %vm1473_vm2, %v1743_v47, %v4542_v44  ;;  %v1747_v51 = vrot.slane %v4549_v12, 5  ;;  %3940 = vpow2.f32 %v1554_v45 }
 0x2b3   : > { %v4557_v52 = vpop.eup %3922  ;;  %v1746_v53 = vsel %vm1476_vm3, %v1745_v48, %v1744_v50  ;;  %v1749_v54 = vrot.slane %v4552_v49, 4 }
 0x2b4   : > { %v4561_v55 = vpop.eup %3924  ;;  %v1748_v56 = vsel %vm1479_vm4, %v1747_v51, %v1746_v53  ;;  %v1751_v60 = vrot.slane %v4557_v52, 3 }
 0x2b5   : > { %v4564_v57 = vpop.eup %3926  ;;  %v1750_v58 = vsel %vm1482_vm5, %v1749_v54, %v1748_v56 }
 0x2b6   : > { %v4567_v59 = vpop.eup %3928  ;;  %v1576_v62 = vrot.slane %v4564_v57, 7  ;;  %v1752_v3 = vsel %vm1485_vm6, %v1751_v60, %v1750_v58 }
 0x2b7   : > { %v4571_v1 = vpop.eup %3930  ;;  %v1578_v2 = vrot.slane %v4567_v59, 6 }
 0x2b8   : > { %v4574_v0 = vpop.eup %3932  ;;  %v1577_v4 = vsel %vm1470_vm1, %v1576_v62, %v4561_v55  ;;  %v1580_v5 = vrot.slane %v4571_v1, 5 }
 0x2b9   : > { %v4580_v6 = vpop.eup %3934  ;;  %v1753_v7 = vrot.slane %v4574_v0, 2  ;;  %v1579_v17 = vsel %vm1473_vm2, %v1578_v2, %v1577_v4 }
 0x2ba   : > { %v4584_v8 = vpop.eup %3936  ;;  %v1581_v11 = vsel %vm1476_vm3, %v1580_v5, %v1579_v17  ;;  %v1582_v13 = vrot.slane %v4580_v6, 4 }
 0x2bb   : > { %v4588_v15 = vpop.eup %3938  ;;  %v1754_v16 = vsel %vm1488_vm7, %v1753_v7, %v1752_v3  ;;  %v1584_v18 = vrot.slane %v4584_v8, 3 }
 0x2bc   : > { %v4592_v19 = vpop.eup %3940  ;;  %v1765_v20 = vsel %vm1663_vm8, %v1754_v16, 0.0  ;;  %v1583_v21 = vsel %vm1479_vm4, %v1582_v13, %v1581_v11  ;;  %v1586_v22 = vrot.slane %v4588_v15, 2 }
 0x2bd   : > { %1766 = vadd.xlane.f32.xlu0 %v1765_v20  ;;  %v1585_v23 = vsel %vm1482_vm5, %v1584_v18, %v1583_v21  ;;  %v1588_v25 = vrot.slane %v4592_v19, 1 }
 0x2be   : > { %v1587_v24 = vsel %vm1485_vm6, %v1586_v22, %v1585_v23 }
 0x2bf   : > { %v1589_v26 = vsel %vm1488_vm7, %v1588_v25, %v1587_v24 }
 0x2c1   : > { %1598 = vadd.xlane.f32.xlu0 %v1589_v26 }
 0x31f   : > { %v1670_v28 = vpop.xlane.xlu0 %1669  ;;  %v1503_v30 = vpop.xlane.xlu1 %1502 }
 0x320   : > { %v1679_v31 = vrot.slane %v1670_v28, 7  ;;  %v1680_v32 = vrot.slane %v1670_v28, 1  ;;  %v1681_v33 = vrot.slane %v1670_v28, 2  ;;  %v1682_v9 = vrot.slane %v1670_v28, 3 }
 0x321   : > { %v1703_v34 = vsub.f32 %v4505_v27, %v1670_v28  ;;  %v1513_v35 = vrot.slane %v1503_v30, 1  ;;  %v1514_v36 = vrot.slane %v1503_v30, 2  ;;  %v1515_v38 = vrot.slane %v1503_v30, 3 }
 0x322   : > { %v1702_v40 = vsub.f32 %v4498_v14, %v1679_v31  ;;  %v1704_v10 = vsub.f32 %v4509_v29, %v1680_v32  ;;  %v1705_v37 = vsub.f32 %v4515_v41, %v1681_v33  ;;  %v1706_v39 = vsub.f32 %v4518_v43, %v1682_v9 }
 0x323   : > { %v1723_v42 = vmul.f32 1.442695, %v1703_v34  ;;  %v1536_v61 = vsub.f32 %v4505_v27, %v1503_v30  ;;  %v1537_v45 = vsub.f32 %v4509_v29, %v1513_v35  ;;  %v1538_v51 = vsub.f32 %v4515_v41, %v1514_v36 }
 0x324   : > { %v1721_v47 = vmul.f32 1.442695, %v1702_v40  ;;  %v1725_v48 = vmul.f32 1.442695, %v1704_v10  ;;  %v1727_v50 = vmul.f32 1.442695, %v1705_v37  ;;  %v1539_v14 = vsub.f32 %v4518_v43, %v1515_v38 }
 0x325   : > { %3942 = vpow2.f32 %v1723_v42  ;;  %v1729_v53 = vmul.f32 1.442695, %v1706_v39  ;;  %v1556_v54 = vmul.f32 1.442695, %v1536_v61  ;;  %v1558_v56 = vmul.f32 1.442695, %v1537_v45 }
 0x326   : > { %3944 = vpow2.f32 %v1721_v47  ;;  %v1560_v58 = vmul.f32 1.442695, %v1538_v51  ;;  %v1562_v60 = vmul.f32 1.442695, %v1539_v14 }
 0x327   : > { %3946 = vpow2.f32 %v1725_v48 }
 0x328   : > { %3948 = vpow2.f32 %v1727_v50 }
 0x329   : > { %3950 = vpow2.f32 %v1729_v53 }
 0x32a   : > { %3952 = vpow2.f32 %v1556_v54 }
 0x32b   : > { %3954 = vpow2.f32 %v1558_v56 }
 0x32c   : > { %3956 = vpow2.f32 %v1560_v58 }
 0x32d   : > { %3958 = vpow2.f32 %v1562_v60 }
 0x32f   : > { %v4610_v27 = vpop.eup %3942 }
 0x330   : > { %v4612_v29 = vpop.eup %3944 }
 0x331   : > { %v4614_v41 = vpop.eup %3946  ;;  %v1755_v43 = vrot.slane %v4612_v29, 1 }
 0x332   : > { %v4617_v62 = vpop.eup %3948  ;;  %v1757_v2 = vrot.slane %v4614_v41, 7 }
 0x333   : > { %v4620_v3 = vpop.eup %3950  ;;  %v1756_v4 = vsel %vm1470_vm1, %v4610_v27, %v1755_v43  ;;  %v1759_v5 = vrot.slane %v4617_v62, 6 }
 0x334   : > { %v4625_v7 = vpop.eup %3952  ;;  %v1758_v17 = vsel %vm1473_vm2, %v1757_v2, %v1756_v4  ;;  %v1761_v11 = vrot.slane %v4620_v3, 5 }
 0x335   : > { %v4629_v13 = vpop.eup %3954  ;;  %v1760_v16 = vsel %vm1476_vm3, %v1759_v5, %v1758_v17 }
 0x336   : > { %v4632_v18 = vpop.eup %3956  ;;  %v1762_v20 = vsel %vm1479_vm4, %v1761_v11, %v1760_v16  ;;  %v1590_v21 = vrot.slane %v4629_v13, 7 }
 0x337   : > { %v4636_v22 = vpop.eup %3958  ;;  %v1768_v23 = vsel %vm1667_vm9, %v1762_v20, 0.0  ;;  %v1592_v24 = vrot.slane %v4632_v18, 6 }
 0x338   : > { %1769 = vadd.xlane.f32.xlu1 %v1768_v23  ;;  %v1591_v25 = vsel %vm1470_vm1, %v1590_v21, %v4625_v7  ;;  %v1594_v26 = vrot.slane %v4636_v22, 5 }
 0x339   : > { %v1593_v28 = vsel %vm1473_vm2, %v1592_v24, %v1591_v25 }
 0x33a   : > { %v1595_v30 = vsel %vm1476_vm3, %v1594_v26, %v1593_v28 }
 0x33b   : > { %v1600_v31 = vsel %vm5852_vm10, %v1595_v30, 0.0 }
 0x33c   : > { %1601 = vadd.xlane.f32.xlu1 %v1600_v31 }
 0x34a   : > { %v1767_v32 = vpop.xlane.xlu0 %1766 }
 0x34b   : > { %v1773_v33 = vrot.slane %v1767_v32, 1  ;;  %v1774_v9 = vrot.slane %v1767_v32, 2  ;;  %v1775_v34 = vrot.slane %v1767_v32, 3  ;;  %v1776_v35 = vrot.slane %v1767_v32, 4 }
 0x34c   : > { %3960 = vrcp.f32 %v1767_v32  ;;  %v1777_v36 = vrot.slane %v1767_v32, 5  ;;  %v1778_v38 = vrot.slane %v1767_v32, 6 }
 0x34d   : > { %3962 = vrcp.f32 %v1773_v33 }
 0x34e   : > { %3964 = vrcp.f32 %v1774_v9  ;;  %v4646_v40 = vpop.xlane.xlu0 %1598 }
 0x34f   : > { %3966 = vrcp.f32 %v1775_v34  ;;  %v1605_v10 = vrot.slane %v4646_v40, 1  ;;  %v1606_v37 = vrot.slane %v4646_v40, 2  ;;  %v1607_v39 = vrot.slane %v4646_v40, 3 }
 0x350   : > { %3968 = vrcp.f32 %v1776_v35  ;;  %v1608_v42 = vrot.slane %v4646_v40, 4  ;;  %v1609_v61 = vrot.slane %v4646_v40, 5  ;;  %v1610_v45 = vrot.slane %v4646_v40, 6 }
 0x351   : > { %3970 = vrcp.f32 %v1777_v36 }
 0x352   : > { %3972 = vrcp.f32 %v1778_v38 }
 0x353   : > { %3974 = vrcp.f32 %v4646_v40 }
 0x354   : > { %3976 = vrcp.f32 %v1605_v10 }
 0x355   : > { %3978 = vrcp.f32 %v1606_v37 }
 0x356   : > { %v3961_v47 = vpop.eup %3960  ;;  %3980 = vrcp.f32 %v1607_v39 }
 0x357   : > { %v3963_v48 = vpop.eup %3962  ;;  %3982 = vrcp.f32 %v1608_v42  ;;  %v1796_v43 = vmul.f32 %v3961_v47, %v4542_v44 }
 0x358   : > { %v3965_v50 = vpop.eup %3964  ;;  %3984 = vrcp.f32 %v1609_v61  ;;  %v1798_v54 = vmul.f32 %v3963_v48, %v4544_v46  ;;  %v1611_v48 = vrot.slane %v4646_v40, 7 }
 0x359   : > { %v3967_v51 = vpop.eup %3966  ;;  %3986 = vrcp.f32 %v1610_v45  ;;  %v1800_v58 = vmul.f32 %v3965_v50, %v4546_v63  ;;  %v1834_v23 = vrot.slane %v1796_v43, 1 }
 0x35a   : > { %v3969_v53 = vpop.eup %3968  ;;  %v4659_v2 = vmul.f32 %v3967_v51, %v4549_v12  ;;  %v1835_v16 = vrot.slane %v1798_v54, 1  ;;  %3988 = vrcp.f32 %v1611_v48 }
 0x35b   : > { %v3971_v14 = vpop.eup %3970  ;;  %v4662_v5 = vmul.f32 %v3969_v53, %v4552_v49  ;;  %v1836_v12 = vrot.slane %v1800_v58, 1  ;;  %v1911_v51 = vrot.slane %v1800_v58, 7 }
 0x35c   : > { %v3973_v56 = vpop.eup %3972  ;;  %v4665_v17 = vmul.f32 %v3971_v14, %v4557_v52  ;;  %v1837_v52 = vrot.slane %v4659_v2, 1 }
 0x35d   : > { %v3975_v60 = vpop.eup %3974  ;;  %v4674_v44 = vmul.f32 %v3973_v56, %v4574_v0 }
 0x35e   : > { %v3977_v4 = vpop.eup %3976  ;;  %v4668_v46 = vmul.f32 %v3975_v60, %v4561_v55  ;;  %v1839_v26 = vrot.slane %v4665_v17, 1  ;;  %v1910_v60 = vsel %vm1470_vm1, %v1798_v54, %v1834_v23  ;;  %v1915_v54 = vrot.slane %v4662_v5, 5 }
 0x35f   : > { %v3979_v11 = vpop.eup %3978  ;;  %v4671_v63 = vmul.f32 %v3977_v4, %v4564_v57  ;;  %v1838_v57 = vrot.slane %v4662_v5, 1  ;;  %v1840_v9 = vrot.slane %v4674_v44, 1  ;;  %v1913_v4 = vrot.slane %v4659_v2, 6 }
 0x360   : > { %v3981_v20 = vpop.eup %3980  ;;  %v4677_v21 = vmul.f32 %v3979_v11, %v4567_v59  ;;  %v1858_v31 = vmul.f32 %v1834_v23, %v4668_v46 }
 0x361   : > { %v3983_v49 = vpop.eup %3982  ;;  %v4681_v24 = vmul.f32 %v3981_v20, %v4571_v1  ;;  %v1859_v55 = vmul.f32 %v1835_v16, %v4671_v63  ;;  %v1912_v16 = vsel %vm1473_vm2, %v1911_v51, %v1910_v60 }
 0x362   : > { %5858 = vst [vmem:[#allocation5_spill] sm:$0xff] %v4677_v21  ;;  %v3985_v25 = vpop.eup %3984  ;;  %v4687_v0 = vmul.f32 %v3983_v49, %v4580_v6  ;;  %v1860_v59 = vmul.f32 %v1836_v12, %v4677_v21  ;;  %v1914_v58 = vsel %vm1476_vm3, %v1913_v4, %v1912_v16 }
 0x363   : > { %5859 = vst [vmem:[#allocation6_spill] sm:$0xff] %v4681_v24  ;;  %v3987_v28 = vpop.eup %3986  ;;  %v4691_v30 = vmul.f32 %v3985_v25, %v4584_v8  ;;  %v1861_v1 = vmul.f32 %v1837_v52, %v4681_v24  ;;  %v1882_v32 = vrot.slane %v1859_v55, 7  ;;  %v1916_v2 = vsel %vm1479_vm4, %v1915_v54, %v1914_v58 }
 0x364   : > { %5860 = vst [vmem:[#allocation7_spill] sm:$0xff] %v4687_v0  ;;  %v4696_v33 = vmul.f32 %v3987_v28, %v4588_v15  ;;  %v1862_v34 = vmul.f32 %v1838_v57, %v4687_v0  ;;  %v1884_v6 = vrot.slane %v1860_v59, 6  ;;  %v3989_v49 = vpop.eup %3988  ;;  %v1917_v52 = vrot.slane %v4665_v17, 4 }
 0x365   : > { %5861 = vst [vmem:[#allocation8_spill] sm:$0xff] %v4691_v30  ;;  %v1863_v35 = vmul.f32 %v1839_v26, %v4691_v30  ;;  %v1883_v36 = vsel %vm1470_vm1, %v1882_v32, %v1858_v31  ;;  %v1886_v38 = vrot.slane %v1861_v1, 5  ;;  %v1919_v31 = vrot.slane %v4674_v44, 3 }
 0x366   : > { %v1864_v8 = vmul.f32 %v1840_v9, %v4696_v33  ;;  %v1885_v10 = vsel %vm1473_vm2, %v1884_v6, %v1883_v36  ;;  %v1888_v37 = vrot.slane %v1862_v34, 4  ;;  %v1918_v26 = vsel %vm1482_vm5, %v1917_v52, %v1916_v2 }
 0x367   : > { %v1887_v39 = vsel %vm1476_vm3, %v1886_v38, %v1885_v10  ;;  %v1890_v42 = vrot.slane %v1863_v35, 3  ;;  %v4725_v35 = vmul.f32 %v3989_v49, %v4592_v19 }
 0x368   : > { %v1889_v15 = vsel %vm1479_vm4, %v1888_v37, %v1887_v39  ;;  %v1892_v61 = vrot.slane %v1864_v8, 2 }
 0x369   : > { %v1891_v45 = vsel %vm1482_vm5, %v1890_v42, %v1889_v15 }
 0x36a   : > { %v4708_v47 = vsel %vm1485_vm6, %v1892_v61, %v1891_v45 }
 0x3c5   : > { %v1770_v50 = vpop.xlane.xlu1 %1769 }
 0x3c6   : > { %v1779_v53 = vrot.slane %v1770_v50, 7  ;;  %v1780_v14 = vrot.slane %v1770_v50, 1  ;;  %v1781_v56 = vrot.slane %v1770_v50, 2  ;;  %v1782_v43 = vrot.slane %v1770_v50, 3 }
 0x3c7   : > { %3990 = vrcp.f32 %v1770_v50 }
 0x3c8   : > { %3992 = vrcp.f32 %v1779_v53 }
 0x3c9   : > { %3994 = vrcp.f32 %v1780_v14  ;;  %v1602_v11 = vpop.xlane.xlu1 %1601 }
 0x3ca   : > { %3996 = vrcp.f32 %v1781_v56  ;;  %v1612_v20 = vrot.slane %v1602_v11, 1  ;;  %v1613_v40 = vrot.slane %v1602_v11, 2  ;;  %v1614_v12 = vrot.slane %v1602_v11, 3 }
 0x3cb   : > { %3998 = vrcp.f32 %v1782_v43 }
 0x3cc   : > { %4000 = vrcp.f32 %v1602_v11 }
 0x3cd   : > { %4002 = vrcp.f32 %v1612_v20 }
 0x3ce   : > { %4004 = vrcp.f32 %v1613_v40 }
 0x3cf   : > { %4006 = vrcp.f32 %v1614_v12 }
 0x3d1   : > { %v3991_v23 = vpop.eup %3990 }
 0x3d2   : > { %v3993_v55 = vpop.eup %3992  ;;  %v1812_v25 = vmul.f32 %v3991_v23, %v4610_v27  ;;  %v1920_v27 = vsel %vm1485_vm6, %v1919_v31, %v1918_v26 }
 0x3d3   : > { %v3995_v57 = vpop.eup %3994  ;;  %v1810_v59 = vmul.f32 %v3993_v55, %v4612_v29 }
 0x3d4   : > { %v3997_v28 = vpop.eup %3996  ;;  %v1814_v5 = vmul.f32 %v3995_v57, %v4614_v41  ;;  %v1842_v1 = vrot.slane %v1812_v25, 1 }
 0x3d5   : > { %v3999_v32 = vpop.eup %3998  ;;  %v1816_v9 = vmul.f32 %v3997_v28, %v4617_v62  ;;  %v1841_v34 = vrot.slane %v1810_v59, 1  ;;  %v1921_v6 = vrot.slane %v1810_v59, 2 }
 0x3d6   : > { %v4001_v17 = vpop.eup %4000  ;;  %v1818_v36 = vmul.f32 %v3999_v32, %v4620_v3  ;;  %v1923_v29 = vsel %vm1470_vm1, %v1814_v5, %v1842_v1  ;;  %v1843_v44 = vrot.slane %v1814_v5, 1 }
 0x3d7   : > { %v4003_v38 = vpop.eup %4002  ;;  %v4731_v41 = vsel %vm1488_vm7, %v1921_v6, %v1920_v27  ;;  %v1924_v8 = vrot.slane %v1816_v9, 7  ;;  %v4734_v37 = vmul.f32 %v4001_v17, %v4625_v7  ;;  %v1865_v3 = vmul.f32 %v1841_v34, %v4725_v35 }
 0x3d8   : > { %v4005_v10 = vpop.eup %4004  ;;  %v1926_v62 = vrot.slane %v1818_v36, 6  ;;  %v4737_v19 = vmul.f32 %v4003_v38, %v4629_v13  ;;  %2013 = vrot.lane.b32.xlu1 %v4731_v41, %s4095_s29  ;;  %1930 = vrot.lane.b32.xlu0 %v4731_v41, %s4096_s30  ;;  %v1844_v42 = vrot.slane %v1816_v9, 1  ;;  %v1845_v7 = vrot.slane %v1818_v36, 1 }
 0x3d9   : > { %v4007_v39 = vpop.eup %4006  ;;  %v1925_v15 = vsel %vm1473_vm2, %v1924_v8, %v1923_v29  ;;  %v4744_v61 = vmul.f32 %v4005_v10, %v4632_v18  ;;  %v1894_v48 = vrot.slane %v1865_v3, 1  ;;  %v1866_v53 = vmul.f32 %v1842_v1, %v4734_v37 }
 0x3da   : > { %v4747_v45 = vmul.f32 %v4007_v39, %v4636_v22  ;;  %v1867_v13 = vmul.f32 %v1843_v44, %v4737_v19  ;;  %v1927_v50 = vsel %vm1476_vm3, %v1926_v62, %v1925_v15 }
 0x3db   : > { %v1868_v51 = vmul.f32 %v1844_v42, %v4744_v61  ;;  %v1895_v14 = vsel %vm1488_vm7, %v1894_v48, %v4708_v47  ;;  %v1819_v47 = vlaneseq }
 0x3dc   : > { %1932 = vrot.lane.b32.xlu1 %v1927_v50, %s4096_s30  ;;  %2096 = vrot.lane.b32.xlu0 %v4731_v41, %s4097_s3  ;;  %v1869_v18 = vmul.f32 %v1845_v7, %v4747_v45  ;;  %v1896_v22 = vrot.slane %v1867_v13, 7  ;;  %vm1906_vm11 = vcmp.gt.f32.partialorder %v1895_v14, -1.0 }
 0x3dd   : > { %v1898_v56 = vrot.slane %v1868_v51, 6  ;;  %v4780_v2 = vsel %vm1906_vm11, %v1895_v14, -1.0  ;;  %v4785_v25 = vand.u32 127, %v1819_v47 }
 0x3de   : > { %v1897_v60 = vsel %vm1470_vm1, %v1896_v22, %v1866_v53  ;;  %v1900_v43 = vrot.slane %v1869_v18, 5 }
 0x3df   : > { %v1899_v4 = vsel %vm1473_vm2, %v1898_v56, %v1897_v60  ;;  %vm1934_vm13 = vcmp.lt.s32.totalorder %v4785_v25, 127  ;;  %vm2017_vm14 = vcmp.lt.s32.totalorder %v4785_v25, 126  ;;  %vm2100_vm0 = vcmp.lt.s32.totalorder %v4785_v25, 125 }
 0x3e0   : > { %2015 = vrot.lane.b32.xlu1 %v1927_v50, %s4095_s29  ;;  %2179 = vrot.lane.b32.xlu0 %v4731_v41, %s4098_s4  ;;  %v1901_v11 = vsel %vm1476_vm3, %v1900_v43, %v1899_v4  ;;  %vm2183_vm11 = vcmp.lt.s32.totalorder %v4785_v25, 124  ;;  %vm2847_vm10 = vcmp.lt.s32.totalorder %v4785_v25, 116 }
 0x3e1   : > { %vm1907_vm12 = vcmp.gt.f32.partialorder %v1901_v11, -1.0 }
 0x3e2   : > { %v4792_v1 = vsel %vm1907_vm12, %v1901_v11, -1.0  ;;  %vm2266_vm12 = vcmp.lt.s32.totalorder %v4785_v25, 123 }
 0x3e4   : > { %2098 = vrot.lane.b32.xlu1 %v1927_v50, %s4097_s3  ;;  %2262 = vrot.lane.b32.xlu0 %v4731_v41, %s4099_s5 }
 0x3e8   : > { %2181 = vrot.lane.b32.xlu1 %v1927_v50, %s4098_s4  ;;  %2345 = vrot.lane.b32.xlu0 %v4731_v41, %s4100_s6 }
 0x3ec   : > { %2264 = vrot.lane.b32.xlu1 %v1927_v50, %s4099_s5  ;;  %2428 = vrot.lane.b32.xlu0 %v4731_v41, %s4101_s7 }
 0x3f0   : > { %2347 = vrot.lane.b32.xlu1 %v1927_v50, %s4100_s6  ;;  %2511 = vrot.lane.b32.xlu0 %v4731_v41, %s4102_s8 }
 0x3f4   : > { %2430 = vrot.lane.b32.xlu1 %v1927_v50, %s4101_s7  ;;  %2594 = vrot.lane.b32.xlu0 %v4731_v41, %s4103_s9 }
 0x3f8   : > { %2513 = vrot.lane.b32.xlu1 %v1927_v50, %s4102_s8  ;;  %2677 = vrot.lane.b32.xlu0 %v4731_v41, %s4104_s15 }
 0x3fc   : > { %2596 = vrot.lane.b32.xlu1 %v1927_v50, %s4103_s9  ;;  %2760 = vrot.lane.b32.xlu0 %v4731_v41, %s4105_s17 }
 0x400   : > { %2679 = vrot.lane.b32.xlu1 %v1927_v50, %s4104_s15  ;;  %2843 = vrot.lane.b32.xlu0 %v4731_v41, %s4106_s18 }
 0x404   : > { %2762 = vrot.lane.b32.xlu1 %v1927_v50, %s4105_s17  ;;  %2926 = vrot.lane.b32.xlu0 %v4731_v41, %s4107_s21 }
 0x408   : > { %2845 = vrot.lane.b32.xlu1 %v1927_v50, %s4106_s18  ;;  %3009 = vrot.lane.b32.xlu0 %v4731_v41, %s4108_s22 }
 0x40c   : > { %2928 = vrot.lane.b32.xlu1 %v1927_v50, %s4107_s21 }
 0x410   : > { %3011 = vrot.lane.b32.xlu1 %v1927_v50, %s4108_s22 }
 0x44a   : > { %v4771_v16 = vpop.permute.xlu0 %1930  ;;  %v4777_v54 = vpop.permute.xlu1 %2013 }
 0x44b   : > { %v1937_v20 = vrot.slane %v4771_v16, 1  ;;  %v1938_v40 = vrot.slane %v4771_v16, 2  ;;  %v1939_v12 = vrot.slane %v4771_v16, 3  ;;  %v1940_v58 = vrot.slane %v4771_v16, 4 }
 0x44c   : > { %v1941_v49 = vrot.slane %v4771_v16, 5  ;;  %v1942_v23 = vrot.slane %v4771_v16, 6  ;;  %v2020_v26 = vrot.slane %v4777_v54, 1  ;;  %v2021_v59 = vrot.slane %v4777_v54, 2 }
 0x44d   : > { %v1960_v52 = vmul.f32 %v1937_v20, %v4671_v63  ;;  %v1961_v55 = vmul.f32 %v1938_v40, %v4677_v21  ;;  %v1962_v57 = vmul.f32 %v1939_v12, %v4681_v24  ;;  %v1963_v28 = vmul.f32 %v1940_v58, %v4687_v0 }
 0x44e   : > { %v1964_v31 = vmul.f32 %v1941_v49, %v4691_v30  ;;  %v1943_v32 = vrot.slane %v4771_v16, 7  ;;  %v1959_v9 = vmul.f32 %v4771_v16, %v4668_v46  ;;  %v2022_v34 = vrot.slane %v4777_v54, 3  ;;  %v4802_v38 = vpop.permute.xlu0 %2096 }
 0x44f   : > { %v1983_v5 = vrot.slane %v1960_v52, 7  ;;  %v2023_v6 = vrot.slane %v4777_v54, 4  ;;  %v1965_v17 = vmul.f32 %v1942_v23, %v4696_v33  ;;  %v1985_v27 = vrot.slane %v1961_v55, 6  ;;  %v1933_v55 = vpop.permute.xlu1 %1932 }
 0x450   : > { %v2024_v36 = vrot.slane %v4777_v54, 5  ;;  %v2025_v29 = vrot.slane %v4777_v54, 6  ;;  %v1987_v41 = vrot.slane %v1962_v57, 5  ;;  %v2043_v8 = vmul.f32 %v2020_v26, %v4671_v63 }
 0x451   : > { %v1984_v44 = vsel %vm1470_vm1, %v1983_v5, %v1959_v9  ;;  %v2044_v10 = vmul.f32 %v2021_v59, %v4677_v21  ;;  %v1989_v62 = vrot.slane %v1963_v28, 4  ;;  %v1991_v3 = vrot.slane %v1964_v31, 3 }
 0x452   : > { %v4808_v39 = vmul.f32 %v2022_v34, %v4681_v24  ;;  %v4811_v42 = vmul.f32 %v2023_v6, %v4687_v0  ;;  %v4814_v15 = vmul.f32 %v2024_v36, %v4691_v30  ;;  %v2066_v7 = vrot.slane %v2043_v8, 7  ;;  %v4856_v6 = vpop.permute.xlu0 %2179 }
 0x453   : > { %v2103_v13 = vrot.slane %v4802_v38, 1  ;;  %v2104_v48 = vrot.slane %v4802_v38, 2  ;;  %v1986_v50 = vsel %vm1473_vm2, %v1985_v27, %v1984_v44  ;;  %v1993_v51 = vrot.slane %v1965_v17, 2 }
 0x454   : > { %v2042_v53 = vmul.f32 %v4777_v54, %v4668_v46  ;;  %v4822_v18 = vmul.f32 %v2025_v29, %v4696_v33  ;;  %v2068_v14 = vrot.slane %v2044_v10, 6  ;;  %v2105_v22 = vrot.slane %v4802_v38, 3 }
 0x455   : > { %v2106_v56 = vrot.slane %v4802_v38, 4  ;;  %v2107_v60 = vrot.slane %v4802_v38, 5  ;;  %v2026_v43 = vrot.slane %v4777_v54, 7  ;;  %v2070_v11 = vrot.slane %v4808_v39, 5 }
 0x456   : > { %v2067_v4 = vsel %vm1470_vm1, %v2066_v7, %v2042_v53  ;;  %v2108_v47 = vrot.slane %v4802_v38, 6  ;;  %v2072_v16 = vrot.slane %v4811_v42, 4  ;;  %v2074_v20 = vrot.slane %v4814_v15, 3 }
 0x457   : > { %v2126_v40 = vmul.f32 %v2103_v13, %v4671_v63  ;;  %v2127_v12 = vmul.f32 %v2104_v48, %v4677_v21  ;;  %v4836_v58 = vmul.f32 %v2105_v22, %v4681_v24  ;;  %v4839_v49 = vmul.f32 %v2106_v56, %v4687_v0 }
 0x458   : > { %v4842_v23 = vmul.f32 %v2107_v60, %v4691_v30  ;;  %v1988_v52 = vsel %vm1476_vm3, %v1987_v41, %v1986_v50  ;;  %v2069_v57 = vsel %vm1473_vm2, %v2068_v14, %v2067_v4  ;;  %v2076_v26 = vrot.slane %v4822_v18, 2 }
 0x459   : > { %v2109_v59 = vrot.slane %v4802_v38, 7  ;;  %v2125_v28 = vmul.f32 %v4802_v38, %v4668_v46  ;;  %v4852_v31 = vmul.f32 %v2108_v47, %v4696_v33  ;;  %v2149_v5 = vrot.slane %v2126_v40, 7 }
 0x45a   : > { %v1966_v9 = vmul.f32 %v1943_v32, %v4725_v35  ;;  %v1990_v34 = vsel %vm1479_vm4, %v1989_v62, %v1988_v52  ;;  %v2151_v17 = vrot.slane %v2127_v12, 6  ;;  %v1944_v36 = vrot.slane %v1933_v55, 1 }
 0x45b   : > { %v1992_v27 = vsel %vm1482_vm5, %v1991_v3, %v1990_v34  ;;  %v1945_v29 = vrot.slane %v1933_v55, 2  ;;  %v2153_v44 = vrot.slane %v4836_v58, 5  ;;  %v2155_v41 = vrot.slane %v4839_v49, 4 }
 0x45c   : > { %v2157_v8 = vrot.slane %v4842_v23, 3  ;;  %v1946_v10 = vrot.slane %v1933_v55, 3  ;;  %v1994_v7 = vsel %vm1485_vm6, %v1993_v51, %v1992_v27  ;;  %v1968_v32 = vmul.f32 %v1944_v36, %v4737_v19 }
 0x45d   : > { %v1969_v62 = vmul.f32 %v1945_v29, %v4744_v61  ;;  %v2186_v13 = vrot.slane %v4856_v6, 1  ;;  %v1995_v48 = vrot.slane %v1966_v9, 1  ;;  %v2187_v50 = vrot.slane %v4856_v6, 2 }
 0x45e   : > { %v1970_v3 = vmul.f32 %v1946_v10, %v4747_v45  ;;  %v2188_v53 = vrot.slane %v4856_v6, 3  ;;  %v1967_v14 = vmul.f32 %v1933_v55, %v4734_v37  ;;  %v1997_v22 = vrot.slane %v1968_v32, 7 }
 0x45f   : > { %v1999_v56 = vrot.slane %v1969_v62, 6  ;;  %v2189_v60 = vrot.slane %v4856_v6, 4  ;;  %v2150_v51 = vsel %vm1470_vm1, %v2149_v5, %v2125_v28  ;;  %v1996_v4 = vsel %vm1488_vm7, %v1995_v48, %v1994_v7 }
 0x460   : > { %v2190_v47 = vrot.slane %v4856_v6, 5  ;;  %v2191_v40 = vrot.slane %v4856_v6, 6  ;;  %v1998_v12 = vsel %vm1470_vm1, %v1997_v22, %v1967_v14  ;;  %v2001_v52 = vrot.slane %v1970_v3, 5  ;;  %v4908_v22 = vpop.permute.xlu0 %2262 }
 0x461   : > { %v2209_v9 = vmul.f32 %v2186_v13, %v4671_v63  ;;  %v2210_v34 = vmul.f32 %v2187_v50, %v4677_v21  ;;  %v2000_v55 = vsel %vm1473_vm2, %v1999_v56, %v1998_v12  ;;  %v4880_v27 = vmul.f32 %v2188_v53, %v4681_v24 }
 0x462   : > { %v4883_v28 = vmul.f32 %v2189_v60, %v4687_v0  ;;  %v4886_v5 = vmul.f32 %v2190_v47, %v4691_v30  ;;  %v4889_v36 = vsel %vm1473_vm2, %v2151_v17, %v2150_v51  ;;  %v2159_v29 = vrot.slane %v4852_v31, 2  ;;  %v2016_v17 = vpop.permute.xlu1 %2015 }
 0x463   : > { %v2002_v10 = vsel %vm1476_vm3, %v2001_v52, %v2000_v55  ;;  %v2232_v7 = vrot.slane %v2209_v9, 7  ;;  %v4895_v32 = vsel %vm1934_vm13, %v1996_v4, -1.0  ;;  %v4901_v48 = vmul.f32 %v2191_v40, %v4696_v33 }
 0x464   : > { %v2006_v62 = vsel %vm1934_vm13, %v2002_v10, -1.0  ;;  %v2208_v3 = vmul.f32 %v4856_v6, %v4668_v46  ;;  %v2234_v50 = vrot.slane %v2210_v34, 6  ;;  %v2049_v60 = vmul.f32 %v2026_v43, %v4725_v35 }
 0x465   : > { %vm2008_vm15 = vcmp.gt.f32.partialorder %v2006_v62, %v4792_v1  ;;  %v2071_v51 = vsel %vm1476_vm3, %v2070_v11, %v2069_v57  ;;  %v2027_v40 = vrot.slane %v2016_v17, 1  ;;  %v2028_v12 = vrot.slane %v2016_v17, 2 }
 0x466   : > { %v2233_v4 = vsel %vm1470_vm1, %v2232_v7, %v2208_v3  ;;  %v2073_v47 = vsel %vm1479_vm4, %v2072_v16, %v2071_v51  ;;  %v2029_v54 = vrot.slane %v2016_v17, 3  ;;  %v2269_v43 = vrot.slane %v4908_v22, 1 }
 0x467   : > { %v2075_v9 = vsel %vm1482_vm5, %v2074_v20, %v2073_v47  ;;  %v2051_v11 = vmul.f32 %v2027_v40, %v4737_v19  ;;  %v2052_v42 = vmul.f32 %v2028_v12, %v4744_v61  ;;  %v2270_v16 = vrot.slane %v4908_v22, 2 }
 0x468   : > { %v2077_v39 = vsel %vm1485_vm6, %v2076_v26, %v2075_v9  ;;  %v2078_v57 = vrot.slane %v2049_v60, 1  ;;  %v2053_v34 = vmul.f32 %v2029_v54, %v4747_v45  ;;  %v2271_v15 = vrot.slane %v4908_v22, 3 }
 0x469   : > { %v2272_v20 = vrot.slane %v4908_v22, 4  ;;  %v2050_v55 = vmul.f32 %v2016_v17, %v4734_v37  ;;  %v2080_v10 = vrot.slane %v2051_v11, 7  ;;  %v2082_v7 = vrot.slane %v2052_v42, 6 }
 0x46a   : > { %v2273_v18 = vrot.slane %v4908_v22, 5  ;;  %v5811_v26 = vmov 0   ;;  %v4942_v51 = vsel %vm1473_vm2, %v2234_v50, %v2233_v4  ;;  %v2079_v60 = vsel %vm1488_vm7, %v2078_v57, %v2077_v39  ;;  %v2099_v39 = vpop.permute.xlu1 %2098 }
 0x46b   : > { %v2012_v3 = vsel %vm2008_vm15, 1, %v5811_v26  ;;  %v2274_v47 = vrot.slane %v4908_v22, 6  ;;  %v2081_v40 = vsel %vm1470_vm1, %v2080_v10, %v2050_v55  ;;  %v2084_v12 = vrot.slane %v2053_v34, 5 }
 0x46c   : > { %v2292_v17 = vmul.f32 %v2269_v43, %v4671_v63  ;;  %v2293_v9 = vmul.f32 %v2270_v16, %v4677_v21  ;;  %v2010_v54 = vsel %vm2008_vm15, %v2006_v62, %v4792_v1  ;;  %v2083_v11 = vsel %vm1473_vm2, %v2082_v7, %v2081_v40  ;;  %v4983_v7 = vpop.permute.xlu0 %2345 }
 0x46d   : > { %v4954_v50 = vmul.f32 %v2271_v15, %v4681_v24  ;;  %v4957_v4 = vmul.f32 %v2272_v20, %v4687_v0  ;;  %v4961_v42 = vsel %vm2017_vm14, %v2079_v60, -1.0  ;;  %v2085_v43 = vsel %vm1476_vm3, %v2084_v12, %v2083_v11 }
 0x46e   : > { %v4966_v57 = vmul.f32 %v2273_v18, %v4691_v30  ;;  %v2089_v1 = vsel %vm2017_vm14, %v2085_v43, -1.0  ;;  %v2291_v62 = vmul.f32 %v4908_v22, %v4668_v46  ;;  %v4974_v34 = vmul.f32 %v2274_v47, %v4696_v33  ;;  %v2182_v49 = vpop.permute.xlu1 %2181 }
 0x46f   : > { %v2315_v15 = vrot.slane %v2292_v17, 7  ;;  %vm2091_vm8 = vcmp.gt.f32.partialorder %v2089_v1, %v2010_v54  ;;  %v2317_v20 = vrot.slane %v2293_v9, 6  ;;  %v2132_v55 = vmul.f32 %v2109_v59, %v4725_v35 }
 0x470   : > { %v2154_v10 = vsel %vm1476_vm3, %v2153_v44, %v4889_v36  ;;  %v4986_v18 = vsel %vm2091_vm8, 2, %v2012_v3  ;;  %v2110_v59 = vrot.slane %v2099_v39, 1  ;;  %v2111_v44 = vrot.slane %v2099_v39, 2 }
 0x471   : > { %5862 = vst [vmem:[#allocation9_spill] sm:$0xff] %v4986_v18  ;;  %v2156_v40 = vsel %vm1479_vm4, %v2155_v41, %v2154_v10  ;;  %v2316_v36 = vsel %vm1470_vm1, %v2315_v15, %v2291_v62  ;;  %v2112_v12 = vrot.slane %v2099_v39, 3  ;;  %v2352_v17 = vrot.slane %v4983_v7, 1 }
 0x472   : > { %v2158_v58 = vsel %vm1482_vm5, %v2157_v8, %v2156_v40  ;;  %v2161_v9 = vrot.slane %v2132_v55, 1  ;;  %v2134_v41 = vmul.f32 %v2110_v59, %v4737_v19  ;;  %v2135_v11 = vmul.f32 %v2111_v44, %v4744_v61 }
 0x473   : > { %v2160_v3 = vsel %vm1485_vm6, %v2159_v29, %v2158_v58  ;;  %v2353_v23 = vrot.slane %v4983_v7, 2  ;;  %v2133_v8 = vmul.f32 %v2099_v39, %v4734_v37  ;;  %v2136_v43 = vmul.f32 %v2112_v12, %v4747_v45 }
 0x474   : > { %v2354_v62 = vrot.slane %v4983_v7, 3  ;;  %v2355_v31 = vrot.slane %v4983_v7, 4  ;;  %v2162_v29 = vsel %vm1488_vm7, %v2161_v9, %v2160_v3  ;;  %v2163_v15 = vrot.slane %v2134_v41, 7  ;;  %v2265_v41 = vpop.permute.xlu1 %2264 }
 0x475   : > { %v2165_v10 = vrot.slane %v2135_v11, 6  ;;  %v2356_v55 = vrot.slane %v4983_v7, 5  ;;  %v5012_v40 = vsel %vm1473_vm2, %v2317_v20, %v2316_v36  ;;  %v2357_v59 = vrot.slane %v4983_v7, 6 }
 0x476   : > { %v2375_v39 = vmul.f32 %v2352_v17, %v4671_v63  ;;  %v2164_v44 = vsel %vm1470_vm1, %v2163_v15, %v2133_v8  ;;  %v2167_v12 = vrot.slane %v2136_v43, 5  ;;  %v5019_v38 = vmul.f32 %v2353_v23, %v4677_v21 }
 0x477   : > { %v5022_v3 = vmul.f32 %v2354_v62, %v4681_v24  ;;  %v5025_v9 = vsel %vm2091_vm8, %v2089_v1, %v2010_v54  ;;  %v5029_v20 = vsel %vm2100_vm0, %v2162_v29, -1.0  ;;  %v2166_v36 = vsel %vm1473_vm2, %v2165_v10, %v2164_v44  ;;  %v5042_v1 = vpop.permute.xlu0 %2428 }
 0x478   : > { %5863 = vst [vmem:[#allocation10_spill] sm:$0xff] %v5025_v9  ;;  %v5033_v17 = vmul.f32 %v2355_v31, %v4687_v0  ;;  %v2168_v11 = vsel %vm1476_vm3, %v2167_v12, %v2166_v36  ;;  %v2374_v8 = vmul.f32 %v4983_v7, %v4668_v46  ;;  %v5040_v54 = vmul.f32 %v2356_v55, %v4691_v30  ;;  %v5066_v47 = vpop.permute.xlu1 %2347 }
 0x479   : > { %v5046_v43 = vsel %vm2100_vm0, %v2168_v11, -1.0  ;;  %v5049_v62 = vmul.f32 %v2357_v59, %v4696_v33  ;;  %v2398_v31 = vrot.slane %v2375_v39, 7  ;;  %v2193_v29 = vrot.slane %v2182_v49, 1 }
 0x47a   : > { %5864 = vst [vmem:[#allocation11_spill] sm:$0xff] %v5046_v43  ;;  %v2194_v44 = vrot.slane %v2182_v49, 2  ;;  %v2195_v12 = vrot.slane %v2182_v49, 3  ;;  %v2435_v58 = vrot.slane %v5042_v1, 1  ;;  %v2436_v11 = vrot.slane %v5042_v1, 2 }
 0x47b   : > { %v2217_v36 = vmul.f32 %v2193_v29, %v4737_v19  ;;  %vm2174_vm9 = vcmp.gt.f32.partialorder %v5046_v43, %v5025_v9  ;;  %v2437_v15 = vrot.slane %v5042_v1, 3  ;;  %v2216_v10 = vmul.f32 %v2182_v49, %v4734_v37 }
 0x47c   : > { %v2218_v59 = vmul.f32 %v2194_v44, %v4744_v61  ;;  %v2219_v39 = vmul.f32 %v2195_v12, %v4747_v45  ;;  %v2438_v29 = vrot.slane %v5042_v1, 4  ;;  %v2439_v23 = vrot.slane %v5042_v1, 5 }
 0x47d   : > { %v2246_v55 = vrot.slane %v2217_v36, 7  ;;  %v5069_v52 = vsel %vm1470_vm1, %v2398_v31, %v2374_v8  ;;  %v2458_v12 = vmul.f32 %v2435_v58, %v4671_v63  ;;  %v5078_v49 = vsel %vm2174_vm9, %v5046_v43, %v5025_v9 }
 0x47e   : > { %v2248_v60 = vrot.slane %v2218_v59, 6  ;;  %5865 = vst [vmem:[#allocation12_spill] sm:$0xff] %v5078_v49  ;;  %v5082_v56 = vmul.f32 %v2436_v11, %v4677_v21  ;;  %v5085_v8 = vmul.f32 %v2437_v15, %v4681_v24  ;;  %v2250_v59 = vrot.slane %v2219_v39, 5 }
 0x47f   : > { %v2247_v36 = vsel %vm1470_vm1, %v2246_v55, %v2216_v10  ;;  %v2276_v44 = vrot.slane %v2265_v41, 1  ;;  %v2457_v14 = vmul.f32 %v5042_v1, %v4668_v46  ;;  %v5093_v53 = vmul.f32 %v2438_v29, %v4687_v0  ;;  %v5098_v55 = vpop.permute.xlu0 %2511  ;;  %v5105_v29 = vpop.permute.xlu1 %2430 }
 0x480   : > { %5866 = vst [vmem:[#allocation13_spill] sm:$0xff] %v5085_v8  ;;  %v2249_v31 = vsel %vm1473_vm2, %v2248_v60, %v2247_v36  ;;  %v5096_v10 = vmul.f32 %v2439_v23, %v4691_v30  ;;  %5867 = vst [vmem:[#allocation14_spill] sm:$0xff] %v5098_v55  ;;  %v2481_v60 = vrot.slane %v2458_v12, 7  ;;  %v2277_v39 = vrot.slane %v2265_v41, 2 }
 0x481   : > { %v2251_v15 = vsel %vm1476_vm3, %v2250_v59, %v2249_v31  ;;  %v2278_v16 = vrot.slane %v2265_v41, 3  ;;  %v2299_v58 = vmul.f32 %v2265_v41, %v4734_v37  ;;  %v2300_v13 = vmul.f32 %v2276_v44, %v4737_v19 }
 0x482   : > { %v2301_v23 = vmul.f32 %v2277_v39, %v4744_v61  ;;  %v2518_v26 = vrot.slane %v5098_v55, 1  ;;  %v2519_v12 = vrot.slane %v5098_v55, 2  ;;  %v2520_v31 = vrot.slane %v5098_v55, 3 }
 0x483   : > { %v2302_v59 = vmul.f32 %v2278_v16, %v4747_v45  ;;  %v2329_v36 = vrot.slane %v2300_v13, 7  ;;  %v2521_v11 = vrot.slane %v5098_v55, 4  ;;  %v2522_v41 = vrot.slane %v5098_v55, 5  ;;  %v5134_v9 = vpop.permute.xlu0 %2594 }
 0x484   : > { %v5117_v44 = vsel %vm2183_vm11, %v2251_v15, -1.0  ;;  %v2331_v39 = vrot.slane %v2301_v23, 6  ;;  %v2541_v43 = vmul.f32 %v2518_v26, %v4671_v63  ;;  %v5122_v18 = vsel %vm1470_vm1, %v2481_v60, %v2457_v14  ;;  %5871 = vst [vmem:[#allocation18_spill] sm:$0xff] %v5134_v9 }
 0x485   : > { %5868 = vst [vmem:[#allocation15_spill] sm:$0xff] %v5117_v44  ;;  %v2330_v49 = vsel %vm1470_vm1, %v2329_v36, %v2299_v58  ;;  %v5126_v13 = vmul.f32 %v2519_v12, %v4677_v21  ;;  %v5129_v16 = vmul.f32 %v2520_v31, %v4681_v24  ;;  %v2333_v44 = vrot.slane %v2302_v59, 5  ;;  %v5145_v36 = vpop.permute.xlu1 %2513 }
 0x486   : > { %v2332_v15 = vsel %vm1473_vm2, %v2331_v39, %v2330_v49  ;;  %v2540_v14 = vmul.f32 %v5098_v55, %v4668_v46  ;;  %v5139_v26 = vmul.f32 %v2521_v11, %v4687_v0  ;;  %v5142_v58 = vmul.f32 %v2522_v41, %v4691_v30 }
 0x487   : > { %5869 = vst [vmem:[#allocation16_spill] sm:$0xff] %v5126_v13  ;;  %5870 = vst [vmem:[#allocation17_spill] sm:$0xff] %v5129_v16  ;;  %v2359_v60 = vrot.slane %v5066_v47, 1  ;;  %v2334_v49 = vsel %vm1476_vm3, %v2333_v44, %v2332_v15  ;;  %v2564_v12 = vrot.slane %v2541_v43, 7  ;;  %v2360_v59 = vrot.slane %v5066_v47, 2 }
 0x488   : > { %5872 = vst [vmem:[#allocation19_spill] sm:$0xff] %v5139_v26  ;;  %5873 = vst [vmem:[#allocation20_spill] sm:$0xff] %v5142_v58  ;;  %v2361_v23 = vrot.slane %v5066_v47, 3  ;;  %v2601_v41 = vrot.slane %v5134_v9, 1  ;;  %vm2349_vm13 = vcmp.lt.s32.totalorder %v4785_v25, 122  ;;  %v2602_v30 = vrot.slane %v5134_v9, 2 }
 0x489   : > { %v2383_v11 = vmul.f32 %v2359_v60, %v4737_v19  ;;  %v2384_v8 = vmul.f32 %v2360_v59, %v4744_v61  ;;  %v2603_v43 = vrot.slane %v5134_v9, 3  ;;  %v2604_v44 = vrot.slane %v5134_v9, 4 }
 0x48a   : > { %v5161_v15 = vsel %vm2266_vm12, %v2334_v49, -1.0  ;;  %v2382_v39 = vmul.f32 %v5066_v47, %v4734_v37  ;;  %v2385_v60 = vmul.f32 %v2361_v23, %v4747_v45  ;;  %v5167_v58 = vsel %vm1470_vm1, %v2564_v12, %v2540_v14  ;;  %v5179_v23 = vpop.permute.xlu1 %2596 }
 0x48b   : > { %5874 = vst [vmem:[#allocation21_spill] sm:$0xff] %v5161_v15  ;;  %v2412_v31 = vrot.slane %v2383_v11, 7  ;;  %5875 = vst [vmem:[#allocation22_spill] sm:$0xff] %v5167_v58  ;;  %v2414_v59 = vrot.slane %v2384_v8, 6  ;;  %v2624_v16 = vmul.f32 %v2601_v41, %v4671_v63  ;;  %v5171_v13 = vmul.f32 %v2602_v30, %v4677_v21  ;;  %v5186_v11 = vpop.permute.xlu0 %2677 }
 0x48c   : > { %v5177_v47 = vmul.f32 %v2603_v43, %v4681_v24  ;;  %v2416_v12 = vrot.slane %v2385_v60, 5  ;;  %v5183_v8 = vmul.f32 %v2604_v44, %v4687_v0  ;;  %v2442_v30 = vrot.slane %v5105_v29, 1  ;;  %5879 = vst [vmem:[#allocation26_spill] sm:$0xff] %v5186_v11 }
 0x48d   : > { %5876 = vst [vmem:[#allocation23_spill] sm:$0xff] %v5171_v13  ;;  %v2413_v49 = vsel %vm1470_vm1, %v2412_v31, %v2382_v39  ;;  %v2623_v31 = vmul.f32 %v5134_v9, %v4668_v46  ;;  %v2647_v39 = vrot.slane %v2624_v16, 7  ;;  %v2443_v43 = vrot.slane %v5105_v29, 2 }
 0x48e   : > { %5877 = vst [vmem:[#allocation24_spill] sm:$0xff] %v5177_v47  ;;  %v2415_v14 = vsel %vm1473_vm2, %v2414_v59, %v2413_v49  ;;  %5878 = vst [vmem:[#allocation25_spill] sm:$0xff] %v5183_v8  ;;  %v2444_v44 = vrot.slane %v5105_v29, 3  ;;  %v2466_v49 = vmul.f32 %v2442_v30, %v4737_v19  ;;  %v2684_v41 = vrot.slane %v5186_v11, 1  ;;  %v5210_v47 = vpop.permute.xlu1 %2679 }
 0x48f   : > { %v2417_v15 = vsel %vm1476_vm3, %v2416_v12, %v2415_v14  ;;  %v2467_v55 = vmul.f32 %v2443_v43, %v4744_v61  ;;  %v2685_v26 = vrot.slane %v5186_v11, 2  ;;  %v2686_v14 = vrot.slane %v5186_v11, 3  ;;  %v5220_v58 = vpop.permute.xlu0 %2760 }
 0x490   : > { %v2468_v9 = vmul.f32 %v2444_v44, %v4747_v45  ;;  %v2687_v12 = vrot.slane %v5186_v11, 4  ;;  %v5206_v60 = vsel %vm2349_vm13, %v2417_v15, -1.0  ;;  %v2465_v30 = vmul.f32 %v5105_v29, %v4734_v37  ;;  %5882 = vst [vmem:[#allocation29_spill] sm:$0xff] %v5220_v58 }
 0x491   : > { %5880 = vst [vmem:[#allocation27_spill] sm:$0xff] %v5206_v60  ;;  %v2495_v43 = vrot.slane %v2466_v49, 7  ;;  %v2497_v59 = vrot.slane %v2467_v55, 6  ;;  %v5213_v13 = vsel %vm1470_vm1, %v2647_v39, %v2623_v31  ;;  %v5218_v8 = vmul.f32 %v2684_v41, %v4671_v63 }
 0x492   : > { %v5224_v29 = vmul.f32 %v2685_v26, %v4677_v21  ;;  %v2525_v55 = vrot.slane %v5145_v36, 1  ;;  %v2526_v49 = vrot.slane %v5145_v36, 2  ;;  %v2499_v31 = vrot.slane %v2468_v9, 5  ;;  %v5250_v26 = vpop.permute.xlu1 %2762 }
 0x493   : > { %5881 = vst [vmem:[#allocation28_spill] sm:$0xff] %v5218_v8  ;;  %v2496_v15 = vsel %vm1470_vm1, %v2495_v43, %v2465_v30  ;;  %v5230_v39 = vmul.f32 %v5186_v11, %v4668_v46  ;;  %v5233_v16 = vmul.f32 %v2686_v14, %v4681_v24  ;;  %v5236_v41 = vmul.f32 %v2687_v12, %v4687_v0  ;;  %v5259_v8 = vpop.permute.xlu0 %2843 }
 0x494   : > { %v2498_v30 = vsel %vm1473_vm2, %v2497_v59, %v2496_v15  ;;  %v2527_v43 = vrot.slane %v5145_v36, 3  ;;  %v2549_v44 = vmul.f32 %v2525_v55, %v4737_v19  ;;  %v2550_v9 = vmul.f32 %v2526_v49, %v4744_v61  ;;  %5887 = vst [vmem:[#allocation34_spill] sm:$0xff] %v5259_v8 }
 0x495   : > { %5883 = vst [vmem:[#allocation30_spill] sm:$0xff] %v5230_v39  ;;  %5884 = vst [vmem:[#allocation31_spill] sm:$0xff] %v5236_v41  ;;  %v2767_v60 = vrot.slane %v5220_v58, 1  ;;  %v2768_v39 = vrot.slane %v5220_v58, 2  ;;  %v2769_v14 = vrot.slane %v5220_v58, 3  ;;  %v2548_v12 = vmul.f32 %v5145_v36, %v4734_v37 }
 0x496   : > { %v2551_v59 = vmul.f32 %v2527_v43, %v4747_v45  ;;  %v2578_v15 = vrot.slane %v2549_v44, 7  ;;  %v5253_v55 = vsel %vm1476_vm3, %v2499_v31, %v2498_v30  ;;  %v2580_v0 = vrot.slane %v2550_v9, 6 }
 0x497   : > { %5885 = vst [vmem:[#allocation32_spill] sm:$0xff] %v5253_v55  ;;  %v5257_v41 = vmul.f32 %v2767_v60, %v4671_v63  ;;  %v5264_v43 = vmul.f32 %v2768_v39, %v4677_v21  ;;  %v2608_v44 = vrot.slane %v5179_v23, 1  ;;  %v5270_v9 = vmul.f32 %v2769_v14, %v4681_v24 }
 0x498   : > { %v2579_v11 = vsel %vm1470_vm1, %v2578_v15, %v2548_v12  ;;  %v2609_v60 = vrot.slane %v5179_v23, 2  ;;  %v2582_v49 = vrot.slane %v2551_v59, 5  ;;  %v5275_v12 = vmul.f32 %v5220_v58, %v4668_v46 }
 0x499   : > { %5886 = vst [vmem:[#allocation33_spill] sm:$0xff] %v5257_v41  ;;  %5888 = vst [vmem:[#allocation35_spill] sm:$0xff] %v5264_v43  ;;  %v2581_v31 = vsel %vm1473_vm2, %v2580_v0, %v2579_v11  ;;  %v2610_v39 = vrot.slane %v5179_v23, 3  ;;  %v2632_v36 = vmul.f32 %v2608_v44, %v4737_v19  ;;  %v2850_v11 = vrot.slane %v5259_v8, 1  ;;  %v5291_v41 = vpop.permute.xlu1 %2845 }
 0x49a   : > { %5889 = vst [vmem:[#allocation36_spill] sm:$0xff] %v5270_v9  ;;  %5890 = vst [vmem:[#allocation37_spill] sm:$0xff] %v5275_v12  ;;  %v2633_v0 = vmul.f32 %v2609_v60, %v4744_v61  ;;  %v2851_v14 = vrot.slane %v5259_v8, 2  ;;  %v5284_v30 = vsel %vm1476_vm3, %v2582_v49, %v2581_v31  ;;  %v2852_v15 = vrot.slane %v5259_v8, 3  ;;  %v5299_v49 = vpop.permute.xlu0 %2926 }
 0x49b   : > { %5891 = vst [vmem:[#allocation38_spill] sm:$0xff] %v5284_v30  ;;  %v5288_v55 = vmul.f32 %v2610_v39, %v4747_v45  ;;  %v2631_v60 = vmul.f32 %v5179_v23, %v4734_v37  ;;  %v2661_v12 = vrot.slane %v2632_v36, 7  ;;  %v5297_v58 = vmul.f32 %v2850_v11, %v4671_v63 }
 0x49c   : > { %v5304_v39 = vmul.f32 %v5259_v8, %v4668_v46  ;;  %v2691_v59 = vrot.slane %v5210_v47, 1  ;;  %v2692_v30 = vrot.slane %v5210_v47, 2  ;;  %v2663_v44 = vrot.slane %v2633_v0, 6 }
 0x49d   : > { %5892 = vst [vmem:[#allocation39_spill] sm:$0xff] %v5288_v55  ;;  %v5310_v23 = vmul.f32 %v2851_v14, %v4677_v21  ;;  %v2693_v36 = vrot.slane %v5210_v47, 3  ;;  %v2662_v11 = vsel %vm1470_vm1, %v2661_v12, %v2631_v60  ;;  %v5315_v31 = vmul.f32 %v2852_v15, %v4681_v24  ;;  %v2929_v24 = vpop.permute.xlu1 %2928 }
 0x49e   : > { %5893 = vst [vmem:[#allocation40_spill] sm:$0xff] %v5304_v39  ;;  %v2715_v8 = vmul.f32 %v2691_v59, %v4737_v19  ;;  %v2716_v39 = vmul.f32 %v2692_v30, %v4744_v61  ;;  %v2933_v9 = vrot.slane %v5299_v49, 1  ;;  %v2934_v14 = vrot.slane %v5299_v49, 2 }
 0x49f   : > { %5894 = vst [vmem:[#allocation41_spill] sm:$0xff] %v5310_v23  ;;  %5895 = vst [vmem:[#allocation42_spill] sm:$0xff] %v5315_v31  ;;  %v5321_v0 = vmul.f32 %v2693_v36, %v4747_v45  ;;  %v2714_v55 = vmul.f32 %v5210_v47, %v4734_v37  ;;  %v2774_v15 = vrot.slane %v5250_v26, 1  ;;  %v5329_v59 = vsel %vm1473_vm2, %v2663_v44, %v2662_v11  ;;  %v5336_v31 = vpop.permute.xlu0 %3009 }
 0x4a0   : > { %v2744_v12 = vrot.slane %v2715_v8, 7  ;;  %v2746_v60 = vrot.slane %v2716_v39, 6  ;;  %5897 = vst [vmem:[#allocation44_spill] sm:$0xff] %v5329_v59  ;;  %v5333_v36 = vmul.f32 %v2933_v9, %v4671_v63  ;;  %v2775_v43 = vrot.slane %v5250_v26, 2  ;;  %5899 = vst [vmem:[#allocation46_spill] sm:$0xff] %v5336_v31 }
 0x4a1   : > { %5896 = vst [vmem:[#allocation43_spill] sm:$0xff] %v5321_v0  ;;  %vm2007_vm14 = vcmp.gt.f32.partialorder %v4895_v32, %v4780_v2  ;;  %v2776_v39 = vrot.slane %v5250_v26, 3  ;;  %v2798_v44 = vmul.f32 %v2774_v15, %v4737_v19  ;;  %v5347_v9 = vmul.f32 %v5299_v49, %v4668_v46 }
 0x4a2   : > { %5898 = vst [vmem:[#allocation45_spill] sm:$0xff] %v5333_v36  ;;  %v2745_v47 = vsel %vm1470_vm1, %v2744_v12, %v2714_v55  ;;  %v5350_v30 = vmul.f32 %v2934_v14, %v4677_v21  ;;  %v2799_v59 = vmul.f32 %v2775_v43, %v4744_v61  ;;  %v2797_v55 = vmul.f32 %v5250_v26, %v4734_v37 }
 0x4a3   : > { %v5354_v23 = vsel %vm1473_vm2, %v2746_v60, %v2745_v47  ;;  %v2827_v12 = vrot.slane %v2798_v44, 7  ;;  %v3016_v15 = vrot.slane %v5336_v31, 1  ;;  %v5361_v8 = vmul.f32 %v2776_v39, %v4747_v45  ;;  %v3012_v47 = vpop.permute.xlu1 %3011 }
 0x4a4   : > { %5900 = vst [vmem:[#allocation47_spill] sm:$0xff] %v5350_v30  ;;  %5901 = vst [vmem:[#allocation48_spill] sm:$0xff] %v5354_v23  ;;  %v2857_v0 = vrot.slane %v5291_v41, 1  ;;  %v2858_v14 = vrot.slane %v5291_v41, 2  ;;  %v2829_v21 = vrot.slane %v2799_v59, 6  ;;  %v5368_v60 = vmul.f32 %v5336_v31, %v4668_v46 }
 0x4a5   : > { %v2859_v26 = vrot.slane %v5291_v41, 3  ;;  %v2828_v44 = vsel %vm1470_vm1, %v2827_v12, %v2797_v55  ;;  %v2940_v23 = vrot.slane %v2929_v24, 1  ;;  %v5377_v30 = vmul.f32 %v3016_v15, %v4671_v63 }
 0x4a6   : > { %5902 = vst [vmem:[#allocation49_spill] sm:$0xff] %v5368_v60  ;;  %v2881_v11 = vmul.f32 %v2857_v0, %v4737_v19  ;;  %v5374_v39 = vmul.f32 %v2858_v14, %v4744_v61  ;;  %v2941_v43 = vrot.slane %v2929_v24, 2  ;;  %v2942_v46 = vrot.slane %v2929_v24, 3 }
 0x4a7   : > { %5903 = vst [vmem:[#allocation50_spill] sm:$0xff] %v5377_v30  ;;  %v5380_v59 = vmul.f32 %v2859_v26, %v4747_v45  ;;  %v2964_v36 = vmul.f32 %v2940_v23, %v4737_v19  ;;  %v3023_v55 = vrot.slane %v3012_v47, 1  ;;  %v5385_v0 = vsel %vm1473_vm2, %v2829_v21, %v2828_v44 }
 0x4a8   : > { %v2910_v31 = vrot.slane %v2881_v11, 7  ;;  %v2880_v12 = vmul.f32 %v5291_v41, %v4734_v37  ;;  %v5390_v63 = vmul.f32 %v2941_v43, %v4744_v61  ;;  %v3024_v15 = vrot.slane %v3012_v47, 2 }
 0x4a9   : > { %v2912_v14 = vrot.slane %v5374_v39, 6  ;;  %v2963_v26 = vmul.f32 %v2929_v24, %v4734_v37  ;;  %v2993_v30 = vrot.slane %v2964_v36, 7  ;;  %v3025_v60 = vrot.slane %v3012_v47, 3 }
 0x4aa   : > { %v5395_v11 = vsel %vm1470_vm1, %v2910_v31, %v2880_v12  ;;  %v5399_v21 = vmul.f32 %v2942_v46, %v4747_v45  ;;  %v5402_v41 = vmul.f32 %v3012_v47, %v4734_v37  ;;  %v2995_v43 = vrot.slane %v5390_v63, 6 }
 0x4ab   : > { %v5406_v44 = vmul.f32 %v3023_v55, %v4737_v19  ;;  %v2009_v24 = vsel %vm2007_vm14, %v4895_v32, %v4780_v2  ;;  %v5904_v31 = vmov 0   ;;  %v5418_v46 = vsel %vm1470_vm1, %v2993_v30, %v2963_v26 }
 0x4ac   : > { %v2011_v36 = vsel %vm2007_vm14, 1, %v5904_v31  ;;  %v5421_v37 = vmul.f32 %v3024_v15, %v4744_v61  ;;  %vm2090_vm15 = vcmp.gt.f32.partialorder %v4961_v42, %v2009_v24  ;;  %v5905_v19 = vrot.slane %v4856_v6, 7 }
 0x4ad   : > { %v5428_v55 = vmul.f32 %v3025_v60, %v4747_v45  ;;  %v2092_v12 = vsel %vm2090_vm15, %v4961_v42, %v2009_v24  ;;  %v2094_v23 = vsel %vm2090_vm15, 2, %v2011_v36  ;;  %v5906_v2 = vrot.slane %v4880_v27, 5 }
 0x4ae   : > { %v2215_v47 = vmul.f32 %v5905_v19, %v4725_v35  ;;  %vm2173_vm0 = vcmp.gt.f32.partialorder %v5029_v20, %v2092_v12  ;;  %v5907_v61 = vrot.slane %v4883_v28, 4  ;;  %v5908_v6 = vrot.slane %v4908_v22, 7 }
 0x4af   : > { %v2237_v32 = vsel %vm1476_vm3, %v5906_v2, %v4942_v51  ;;  %v2175_v60 = vsel %vm2173_vm0, %v5029_v20, %v2092_v12  ;;  %v2177_v42 = vsel %vm2173_vm0, 3, %v2094_v23  ;;  %v5909_v26 = vrot.slane %v4886_v5, 3 }
 0x4b0   : > { %v2239_v30 = vsel %vm1479_vm4, %v5907_v61, %v2237_v32  ;;  %v2244_v15 = vrot.slane %v2215_v47, 1  ;;  %v2298_v45 = vmul.f32 %v5908_v6, %v4725_v35  ;;  %v5910_v51 = vrot.slane %v4954_v50, 5 }
 0x4b1   : > { %v2241_v27 = vsel %vm1482_vm5, %v5909_v26, %v2239_v30  ;;  %v5911_v28 = vrot.slane %v4901_v48, 2  ;;  %v5912_v36 = vrot.slane %v4957_v4, 4  ;;  %v5913_v20 = vrot.slane %v4983_v7, 7 }
 0x4b2   : > { %v2320_v24 = vsel %vm1476_vm3, %v5910_v51, %v5012_v40  ;;  %v2327_v19 = vrot.slane %v2298_v45, 1  ;;  %vm2432_vm8 = vcmp.lt.s32.totalorder %v4785_v25, 121  ;;  %v5914_v50 = vrot.slane %v4966_v57, 3 }
 0x4b3   : > { %v2243_v31 = vsel %vm1485_vm6, %v5911_v28, %v2241_v27  ;;  %v2322_v22 = vsel %vm1479_vm4, %v5912_v36, %v2320_v24  ;;  %v2381_v5 = vmul.f32 %v5913_v20, %v4725_v35  ;;  %v5915_v48 = vrot.slane %v5019_v38, 6 }
 0x4b4   : > { %v2245_v23 = vsel %vm1488_vm7, %v2244_v15, %v2243_v31  ;;  %v2324_v40 = vsel %vm1482_vm5, %v5914_v50, %v2322_v22  ;;  %v2408_v47 = vrot.slane %v5049_v62, 2  ;;  %v5916_v7 = vrot.slane %v4974_v34, 2  ;;  %v5923_v31 = vld [vmem:[#allocation13_spill] sm:$0xff]  ;;  %v5927_v50 = vld [vmem:[#allocation14_spill] sm:$0xff] }
 0x4b5   : > { %v2401_v4 = vsel %vm1473_vm2, %v5915_v48, %v5069_v52  ;;  %v2254_v12 = vsel %vm2183_vm11, %v2245_v23, -1.0  ;;  %v5917_v32 = vrot.slane %v5022_v3, 5  ;;  %v2410_v61 = vrot.slane %v2381_v5, 1 }
 0x4b6   : > { %v2326_v2 = vsel %vm1485_vm6, %v5916_v7, %v2324_v40  ;;  %vm2256_vm14 = vcmp.gt.f32.partialorder %v2254_v12, %v2175_v60  ;;  %v5918_v38 = vrot.slane %v5033_v17, 4  ;;  %v5919_v62 = vrot.slane %v5042_v1, 6  ;;  %v5929_v7 = vld [vmem:[#allocation22_spill] sm:$0xff] }
 0x4b7   : > { %v2403_v57 = vsel %vm1476_vm3, %v5917_v32, %v2401_v4  ;;  %v2328_v30 = vsel %vm1488_vm7, %v2327_v19, %v2326_v2  ;;  %v2258_v6 = vsel %vm2256_vm14, %v2254_v12, %v2175_v60  ;;  %v2260_v34 = vsel %vm2256_vm14, 4, %v2177_v42  ;;  %v5930_v2 = vld [vmem:[#allocation16_spill] sm:$0xff] }
 0x4b8   : > { %v2405_v52 = vsel %vm1479_vm4, %v5918_v38, %v2403_v57  ;;  %v2463_v15 = vmul.f32 %v5919_v62, %v4696_v33  ;;  %v2337_v45 = vsel %vm2266_vm12, %v2328_v30, -1.0  ;;  %v5920_v3 = vrot.slane %v5040_v54, 3  ;;  %v5932_v30 = vld [vmem:[#allocation17_spill] sm:$0xff]  ;;  %v5934_v62 = vld [vmem:[#allocation20_spill] sm:$0xff] }
 0x4b9   : > { %vm2515_vm11 = vcmp.lt.s32.totalorder %v4785_v25, 120  ;;  %vm2339_vm15 = vcmp.gt.f32.partialorder %v2337_v45, %v2258_v6  ;;  %v5921_v27 = vrot.slane %v5042_v1, 7  ;;  %v5922_v60 = vrot.slane %v5082_v56, 6 }
 0x4ba   : > { %v2407_v26 = vsel %vm1482_vm5, %v5920_v3, %v2405_v52  ;;  %v2341_v24 = vsel %vm2339_vm15, %v2337_v45, %v2258_v6  ;;  %v2343_v28 = vsel %vm2339_vm15, 5, %v2260_v34  ;;  %v5924_v36 = vrot.slane %v5923_v31, 5  ;;  %v5935_v45 = vld [vmem:[#allocation19_spill] sm:$0xff] }
 0x4bb   : > { %v2409_v17 = vsel %vm1485_vm6, %v2408_v47, %v2407_v26  ;;  %v2464_v51 = vmul.f32 %v5921_v27, %v4725_v35  ;;  %v2484_v42 = vsel %vm1473_vm2, %v5922_v60, %v5122_v18  ;;  %v5925_v20 = vrot.slane %v5093_v53, 4  ;;  %v5937_v60 = vld [vmem:[#allocation18_spill] sm:$0xff] }
 0x4bc   : > { %v2411_v54 = vsel %vm1488_vm7, %v2410_v61, %v2409_v17  ;;  %v2486_v22 = vsel %vm1476_vm3, %v5924_v36, %v2484_v42  ;;  %v2491_v5 = vrot.slane %v2463_v15, 2  ;;  %v5926_v56 = vrot.slane %v5096_v10, 3 }
 0x4bd   : > { %v2420_v19 = vsel %vm2349_vm13, %v2411_v54, -1.0  ;;  %v2488_v1 = vsel %vm1479_vm4, %v5925_v20, %v2486_v22  ;;  %v2493_v23 = vrot.slane %v2464_v51, 1  ;;  %v2524_v40 = vrot.slane %v5927_v50, 7 }
 0x4be   : > { %vm2422_vm12 = vcmp.gt.f32.partialorder %v2420_v19, %v2341_v24  ;;  %v2490_v18 = vsel %vm1482_vm5, %v5926_v56, %v2488_v1  ;;  %v5928_v48 = vrot.slane %v5927_v50, 6  ;;  %v3076_v47 = vrot.slane %v5406_v44, 7 }
 0x4bf   : > { %v2426_v12 = vsel %vm2422_vm12, 6, %v2343_v28  ;;  %v2492_v53 = vsel %vm1485_vm6, %v2491_v5, %v2490_v18  ;;  %v5931_v32 = vrot.slane %v5930_v2, 6  ;;  %v2547_v61 = vmul.f32 %v2524_v40, %v4725_v35 }
 0x4c0   : > { %v2546_v4 = vmul.f32 %v5928_v48, %v4696_v33  ;;  %v2494_v10 = vsel %vm1488_vm7, %v2493_v23, %v2492_v53  ;;  %v5933_v38 = vrot.slane %v5932_v30, 5  ;;  %v2572_v15 = vrot.slane %v5934_v62, 3  ;;  %v5941_v23 = vld [vmem:[#allocation23_spill] sm:$0xff]  ;;  %v5943_v48 = vld [vmem:[#allocation24_spill] sm:$0xff]  ;;  %v5947_v30 = vld [vmem:[#allocation26_spill] sm:$0xff] }
 0x4c1   : > { %v2567_v57 = vsel %vm1473_vm2, %v5931_v32, %v5929_v7  ;;  %v2424_v6 = vsel %vm2422_vm12, %v2420_v19, %v2341_v24  ;;  %v2503_v34 = vsel %vm2432_vm8, %v2494_v10, -1.0  ;;  %v5936_v3 = vrot.slane %v5935_v45, 4  ;;  %v5938_v24 = vld [vmem:[#allocation8_spill] sm:$0xff]  ;;  %v5945_v7 = vld [vmem:[#allocation25_spill] sm:$0xff]  ;;  %v5950_v45 = vld [vmem:[#allocation30_spill] sm:$0xff] }
 0x4c2   : > { %v2569_v52 = vsel %vm1476_vm3, %v5933_v38, %v2567_v57  ;;  %v2574_v17 = vrot.slane %v2546_v4, 2  ;;  %vm2505_vm13 = vcmp.gt.f32.partialorder %v2503_v34, %v2424_v6  ;;  %v2576_v51 = vrot.slane %v2547_v61, 1 }
 0x4c3   : > { %v2571_v26 = vsel %vm1479_vm4, %v5936_v3, %v2569_v52  ;;  %v2607_v42 = vrot.slane %v5937_v60, 7  ;;  %v3078_v28 = vrot.slane %v5421_v37, 6  ;;  %v2509_v54 = vsel %vm2505_vm13, 7, %v2426_v12  ;;  %v5951_v3 = vld [vmem:[#allocation28_spill] sm:$0xff] }
 0x4c4   : > { %v2573_v27 = vsel %vm1482_vm5, %v2572_v15, %v2571_v26  ;;  %v5939_v36 = vrot.slane %v5937_v60, 5  ;;  %v5940_v20 = vrot.slane %v5937_v60, 6  ;;  %v5942_v56 = vrot.slane %v5941_v23, 6 }
 0x4c5   : > { %v2575_v31 = vsel %vm1485_vm6, %v2574_v17, %v2573_v27  ;;  %v2630_v5 = vmul.f32 %v2607_v42, %v4725_v35  ;;  %v2507_v50 = vsel %vm2505_vm13, %v2503_v34, %v2424_v6  ;;  %v5944_v4 = vrot.slane %v5943_v48, 5  ;;  %v5956_v48 = vld [vmem:[#allocation29_spill] sm:$0xff] }
 0x4c6   : > { %v2628_v22 = vmul.f32 %v5939_v36, %v5938_v24  ;;  %v2577_v19 = vsel %vm1488_vm7, %v2576_v51, %v2575_v31  ;;  %v2629_v1 = vmul.f32 %v5940_v20, %v4696_v33  ;;  %v2650_v18 = vsel %vm1473_vm2, %v5942_v56, %v5213_v13 }
 0x4c7   : > { %v2586_v40 = vsel %vm2515_vm11, %v2577_v19, -1.0  ;;  %v2652_v12 = vsel %vm1476_vm3, %v5944_v4, %v2650_v18  ;;  %vm2598_vm14 = vcmp.lt.s32.totalorder %v4785_v25, 119  ;;  %v5946_v2 = vrot.slane %v5945_v7, 4 }
 0x4c8   : > { %v2655_v53 = vrot.slane %v2628_v22, 3  ;;  %vm2588_vm0 = vcmp.gt.f32.partialorder %v2586_v40, %v2507_v50  ;;  %v2657_v57 = vrot.slane %v2629_v1, 2  ;;  %v2659_v61 = vrot.slane %v2630_v5, 1 }
 0x4c9   : > { %v2654_v32 = vsel %vm1479_vm4, %v5946_v2, %v2652_v12  ;;  %v2592_v10 = vsel %vm2588_vm0, 8, %v2509_v54  ;;  %v2690_v38 = vrot.slane %v5947_v30, 7  ;;  %v5948_v62 = vrot.slane %v5947_v30, 5  ;;  %v5954_v54 = vld [vmem:[#allocation31_spill] sm:$0xff] }
 0x4ca   : > { %v2656_v13 = vsel %vm1482_vm5, %v2655_v53, %v2654_v32  ;;  %v5949_v6 = vrot.slane %v5947_v30, 6  ;;  %v5952_v26 = vrot.slane %v5951_v3, 7  ;;  %v5953_v60 = vrot.slane %v5224_v29, 6  ;;  %v5965_v3 = vld [vmem:[#allocation36_spill] sm:$0xff] }
 0x4cb   : > { %v2658_v52 = vsel %vm1485_vm6, %v2657_v57, %v2656_v13  ;;  %v2711_v15 = vmul.f32 %v5948_v62, %v5938_v24  ;;  %v2713_v51 = vmul.f32 %v2690_v38, %v4725_v35  ;;  %v2736_v31 = vrot.slane %v5954_v54, 4  ;;  %v5960_v13 = vld [vmem:[#allocation37_spill] sm:$0xff] }
 0x4cc   : > { %v2712_v34 = vmul.f32 %v5949_v6, %v4696_v33  ;;  %v2731_v17 = vsel %vm1470_vm1, %v5952_v26, %v5950_v45  ;;  %v2660_v27 = vsel %vm1488_vm7, %v2659_v61, %v2658_v52  ;;  %v2590_v36 = vsel %vm2588_vm0, %v2586_v40, %v2507_v50  ;;  %v5961_v61 = vld [vmem:[#allocation33_spill] sm:$0xff] }
 0x4cd   : > { %v2733_v42 = vsel %vm1473_vm2, %v5953_v60, %v2731_v17  ;;  %v2669_v22 = vsel %vm2598_vm14, %v2660_v27, -1.0  ;;  %v5955_v19 = vrot.slane %v5233_v16, 5  ;;  %v2738_v1 = vrot.slane %v2711_v15, 3  ;;  %v5957_v16 = vld [vmem:[#allocation7_spill] sm:$0xff] }
 0x4ce   : > { %vm2671_vm15 = vcmp.gt.f32.partialorder %v2669_v22, %v2590_v36  ;;  %vm5854_vm12 = vcmp.lt.s32.totalorder %v4785_v25, 118  ;;  %v2740_v29 = vrot.slane %v2712_v34, 2  ;;  %v2742_v18 = vrot.slane %v2713_v51, 1  ;;  %v5963_v15 = vld [vmem:[#allocation35_spill] sm:$0xff] }
 0x4cf   : > { %v2735_v20 = vsel %vm1476_vm3, %v5955_v19, %v2733_v42  ;;  %v2675_v23 = vsel %vm2671_vm15, 9, %v2592_v10  ;;  %v2772_v50 = vrot.slane %v5956_v48, 6  ;;  %v2773_v4 = vrot.slane %v5956_v48, 7 }
 0x4d0   : > { %v2737_v5 = vsel %vm1479_vm4, %v2736_v31, %v2735_v20  ;;  %v5958_v12 = vrot.slane %v5956_v48, 4  ;;  %v5959_v7 = vrot.slane %v5956_v48, 5  ;;  %v2673_v32 = vsel %vm2671_vm15, %v2669_v22, %v2590_v36  ;;  %v5967_v36 = vld [vmem:[#allocation34_spill] sm:$0xff] }
 0x4d1   : > { %v2739_v56 = vsel %vm1482_vm5, %v2738_v1, %v2737_v5  ;;  %v2795_v10 = vmul.f32 %v2772_v50, %v4696_v33  ;;  %v5962_v30 = vrot.slane %v5961_v61, 7  ;;  %v2796_v62 = vmul.f32 %v2773_v4, %v4725_v35  ;;  %v5971_v48 = vld [vmem:[#allocation42_spill] sm:$0xff] }
 0x4d2   : > { %v2741_v40 = vsel %vm1485_vm6, %v2740_v29, %v2739_v56  ;;  %v2793_v53 = vmul.f32 %v5958_v12, %v5957_v16  ;;  %v2794_v2 = vmul.f32 %v5959_v7, %v5938_v24  ;;  %v5964_v6 = vrot.slane %v5963_v15, 6  ;;  %v5969_v56 = vld [vmem:[#allocation40_spill] sm:$0xff] }
 0x4d3   : > { %v2743_v57 = vsel %vm1488_vm7, %v2742_v18, %v2741_v40  ;;  %v2814_v38 = vsel %vm1470_vm1, %v5962_v30, %v5960_v13  ;;  %vm5853_vm0 = vcmp.lt.s32.totalorder %v4785_v25, 117  ;;  %v5966_v26 = vrot.slane %v5965_v3, 5 }
 0x4d4   : > { %v2752_v52 = vsel %vm5854_vm12, %v2743_v57, -1.0  ;;  %v2816_v34 = vsel %vm1473_vm2, %v5964_v6, %v2814_v38  ;;  %v2819_v45 = vrot.slane %v2793_v53, 4  ;;  %v2821_v27 = vrot.slane %v2794_v2, 3  ;;  %v5972_v57 = vld [vmem:[#allocation41_spill] sm:$0xff] }
 0x4d5   : > { %vm2754_vm13 = vcmp.gt.f32.partialorder %v2752_v52, %v2673_v32  ;;  %v2818_v17 = vsel %vm1476_vm3, %v5966_v26, %v2816_v34  ;;  %v2823_v42 = vrot.slane %v2795_v10, 2  ;;  %v2825_v54 = vrot.slane %v2796_v62, 1 }
 0x4d6   : > { %v2758_v51 = vsel %vm2754_vm13, 10, %v2675_v23  ;;  %v2820_v60 = vsel %vm1479_vm4, %v2819_v45, %v2818_v17  ;;  %v2854_v22 = vrot.slane %v5967_v36, 5  ;;  %v2855_v19 = vrot.slane %v5967_v36, 6  ;;  %v5974_v17 = vld [vmem:[#allocation6_spill] sm:$0xff] }
 0x4d7   : > { %v2822_v31 = vsel %vm1482_vm5, %v2821_v27, %v2820_v60  ;;  %v2856_v20 = vrot.slane %v5967_v36, 7  ;;  %v5968_v5 = vrot.slane %v5967_v36, 4  ;;  %v5970_v23 = vrot.slane %v5297_v58, 7  ;;  %v5976_v60 = vld [vmem:[#allocation45_spill] sm:$0xff]  ;;  %v5979_v36 = vld [vmem:[#allocation15_spill] sm:$0xff] }
 0x4d8   : > { %v2824_v1 = vsel %vm1485_vm6, %v2823_v42, %v2822_v31  ;;  %v2900_v50 = vrot.slane %v5971_v48, 5  ;;  %v2877_v4 = vmul.f32 %v2854_v22, %v5938_v24  ;;  %v2878_v12 = vmul.f32 %v2855_v19, %v4696_v33  ;;  %v5978_v31 = vld [vmem:[#allocation12_spill] sm:$0xff] }
 0x4d9   : > { %v2876_v29 = vmul.f32 %v5968_v5, %v5957_v16  ;;  %v2897_v18 = vsel %vm1470_vm1, %v5970_v23, %v5969_v56  ;;  %v2826_v40 = vsel %vm1488_vm7, %v2825_v54, %v2824_v1  ;;  %v2879_v53 = vmul.f32 %v2856_v20, %v4725_v35  ;;  %v5980_v56 = vld [vmem:[#allocation47_spill] sm:$0xff] }
 0x4da   : > { %v2756_v7 = vsel %vm2754_vm13, %v2752_v52, %v2673_v32  ;;  %v2835_v2 = vsel %vm5853_vm0, %v2826_v40, -1.0  ;;  %v5973_v10 = vrot.slane %v5972_v57, 6  ;;  %v2904_v30 = vrot.slane %v2877_v4, 3 }
 0x4db   : > { %v2902_v13 = vrot.slane %v2876_v29, 4  ;;  %vm2837_vm15 = vcmp.gt.f32.partialorder %v2835_v2, %v2756_v7  ;;  %v2906_v15 = vrot.slane %v2878_v12, 2  ;;  %v2908_v32 = vrot.slane %v2879_v53, 1 }
 0x4dc   : > { %v2899_v58 = vsel %vm1473_vm2, %v5973_v10, %v2897_v18  ;;  %v2841_v38 = vsel %vm2837_vm15, 11, %v2758_v51  ;;  %vm5855_vm13 = vcmp.lt.s32.totalorder %v4785_v25, 115  ;;  %v2936_v6 = vrot.slane %v5299_v49, 4 }
 0x4dd   : > { %v2901_v61 = vsel %vm1476_vm3, %v2900_v50, %v2899_v58  ;;  %v2937_v34 = vrot.slane %v5299_v49, 5  ;;  %v2938_v45 = vrot.slane %v5299_v49, 6  ;;  %v2939_v26 = vrot.slane %v5299_v49, 7 }
 0x4de   : > { %v2903_v62 = vsel %vm1479_vm4, %v2902_v13, %v2901_v61  ;;  %v5975_v27 = vrot.slane %v5299_v49, 3  ;;  %v5977_v42 = vrot.slane %v5976_v60, 7  ;;  %vm2257_vm0 = vcmp.gt.f32.partialorder %v5979_v36, %v5978_v31 }
 0x4df   : > { %v2905_v52 = vsel %vm1482_vm5, %v2904_v30, %v2903_v62  ;;  %v2959_v19 = vmul.f32 %v2936_v6, %v5957_v16  ;;  %v2960_v20 = vmul.f32 %v2937_v34, %v5938_v24  ;;  %v2961_v1 = vmul.f32 %v2938_v45, %v4696_v33  ;;  %v5982_v62 = vld [vmem:[#allocation5_spill] sm:$0xff] }
 0x4e0   : > { %v2907_v3 = vsel %vm1485_vm6, %v2906_v15, %v2905_v52  ;;  %v2958_v51 = vmul.f32 %v5975_v27, %v5974_v17  ;;  %v2980_v54 = vsel %vm1470_vm1, %v5977_v42, %v5347_v9  ;;  %v2839_v5 = vsel %vm2837_vm15, %v2835_v2, %v2756_v7  ;;  %v5981_v7 = vld [vmem:[#allocation46_spill] sm:$0xff] }
 0x4e1   : > { %v2909_v22 = vsel %vm1488_vm7, %v2908_v32, %v2907_v3  ;;  %v2962_v29 = vmul.f32 %v2939_v26, %v4725_v35  ;;  %v2981_v9 = vrot.slane %v5980_v56, 6  ;;  %v2985_v18 = vrot.slane %v2959_v19, 4  ;;  %v5985_v19 = vld [vmem:[#allocation49_spill] sm:$0xff] }
 0x4e2   : > { %v2918_v49 = vsel %vm2847_vm10, %v2909_v22, -1.0  ;;  %v2983_v23 = vrot.slane %v2958_v51, 5  ;;  %v2987_v48 = vrot.slane %v2960_v20, 3  ;;  %v2989_v12 = vrot.slane %v2961_v1, 2  ;;  %v5984_v51 = vld [vmem:[#allocation50_spill] sm:$0xff] }
 0x4e3   : > { %vm2920_vm12 = vcmp.gt.f32.partialorder %v2918_v49, %v2839_v5  ;;  %v2982_v4 = vsel %vm1473_vm2, %v2981_v9, %v2980_v54  ;;  %v2991_v57 = vrot.slane %v2962_v29, 1  ;;  %v3018_v2 = vrot.slane %v5981_v7, 3 }
 0x4e4   : > { %v2922_v50 = vsel %vm2920_vm12, %v2918_v49, %v2839_v5  ;;  %v2924_v40 = vsel %vm2920_vm12, 12, %v2841_v38  ;;  %v2984_v53 = vsel %vm1476_vm3, %v2983_v23, %v2982_v4  ;;  %v3019_v10 = vrot.slane %v5981_v7, 4  ;;  %v5986_v5 = vld [vmem:[#allocation9_spill] sm:$0xff] }
 0x4e5   : > { %v2986_v58 = vsel %vm1479_vm4, %v2985_v18, %v2984_v53  ;;  %v3020_v13 = vrot.slane %v5981_v7, 5  ;;  %v3021_v61 = vrot.slane %v5981_v7, 6  ;;  %v3022_v30 = vrot.slane %v5981_v7, 7 }
 0x4e6   : > { %v2988_v38 = vsel %vm1482_vm5, %v2987_v48, %v2986_v58  ;;  %v5983_v15 = vrot.slane %v5981_v7, 2  ;;  %v3041_v52 = vmul.f32 %v3018_v2, %v5974_v17  ;;  %v3042_v6 = vmul.f32 %v3019_v10, %v5957_v16  ;;  %v5992_v10 = vld [vmem:[#allocation44_spill] sm:$0xff]  ;;  %v5993_v58 = vld [vmem:[#allocation39_spill] sm:$0xff] }
 0x4e7   : > { %v2990_v34 = vsel %vm1485_vm6, %v2989_v12, %v2988_v38  ;;  %v3043_v45 = vmul.f32 %v3020_v13, %v5938_v24  ;;  %v3044_v3 = vmul.f32 %v3021_v61, %v4696_v33  ;;  %v3045_v26 = vmul.f32 %v3022_v30, %v4725_v35  ;;  %v5996_v61 = vld [vmem:[#allocation43_spill] sm:$0xff] }
 0x4e8   : > { %v3040_v32 = vmul.f32 %v5983_v15, %v5982_v62  ;;  %v2992_v27 = vsel %vm1488_vm7, %v2991_v57, %v2990_v34  ;;  %vm3013_vm12 = vcmp.lt.s32.totalorder %v4785_v25, 114  ;;  %v3062_v60 = vrot.slane %v5984_v51, 7  ;;  %v5990_v57 = vld [vmem:[#allocation32_spill] sm:$0xff] }
 0x4e9   : > { %v3001_v17 = vsel %vm5855_vm13, %v2992_v27, -1.0  ;;  %v3066_v54 = vrot.slane %v3041_v52, 5  ;;  %v3068_v16 = vrot.slane %v3042_v6, 4  ;;  %v3070_v22 = vrot.slane %v3043_v45, 3  ;;  %v5998_v52 = vld [vmem:[#allocation38_spill] sm:$0xff] }
 0x4ea   : > { %v3064_v42 = vrot.slane %v3040_v32, 6  ;;  %vm3003_vm15 = vcmp.gt.f32.partialorder %v3001_v17, %v2922_v50  ;;  %v3063_v24 = vsel %vm1470_vm1, %v3062_v60, %v5985_v19  ;;  %v3072_v33 = vrot.slane %v3044_v3, 2 }
 0x4eb   : > { %v3074_v20 = vrot.slane %v3045_v26, 1  ;;  %v3007_v35 = vsel %vm3003_vm15, 13, %v2924_v40  ;;  %v2178_v56 = vsel %vm2174_vm9, 3, %v5986_v5  ;;  %v2259_v9 = vsel %vm2257_vm0, %v5979_v36, %v5978_v31  ;;  %v5989_v40 = vld [vmem:[#allocation21_spill] sm:$0xff]  ;;  %v5995_v36 = vld [vmem:[#allocation48_spill] sm:$0xff] }
 0x4ec   : > { %v3065_v1 = vsel %vm1473_vm2, %v3064_v42, %v3063_v24  ;;  %v3005_v23 = vsel %vm3003_vm15, %v3001_v17, %v2922_v50  ;;  %v2261_v48 = vsel %vm2257_vm0, 4, %v2178_v56  ;;  %vm2340_vm13 = vcmp.gt.f32.partialorder %v5989_v40, %v2259_v9  ;;  %v5991_v50 = vld [vmem:[#allocation27_spill] sm:$0xff] }
 0x4ed   : > { %v3067_v18 = vsel %vm1476_vm3, %v3066_v54, %v3065_v1  ;;  %v2342_v12 = vsel %vm2340_vm13, %v5989_v40, %v2259_v9  ;;  %v2344_v53 = vsel %vm2340_vm13, 5, %v2261_v48  ;;  %v2504_v7 = vsel %vm2432_vm8, %v5990_v57, -1.0 }
 0x4ee   : > { %v3069_v4 = vsel %vm1479_vm4, %v3068_v16, %v3067_v18  ;;  %vm2423_vm9 = vcmp.gt.f32.partialorder %v5991_v50, %v2342_v12  ;;  %v5994_v13 = vrot.slane %v5993_v58, 5  ;;  %v5997_v30 = vrot.slane %v5996_v61, 5 }
 0x4ef   : > { %v3071_v2 = vsel %vm1482_vm5, %v3070_v22, %v3069_v4  ;;  %v2425_v15 = vsel %vm2423_vm9, %v5991_v50, %v2342_v12  ;;  %v2427_v32 = vsel %vm2423_vm9, 6, %v2344_v53  ;;  %v2587_v6 = vsel %vm2515_vm11, %v5998_v52, -1.0 }
 0x4f0   : > { %v2666_v31 = vsel %vm1476_vm3, %v5994_v13, %v5992_v10  ;;  %v2749_v38 = vsel %vm1476_vm3, %v5997_v30, %v5995_v36  ;;  %v3073_v62 = vsel %vm1485_vm6, %v3072_v33, %v3071_v2  ;;  %vm2506_vm4 = vcmp.gt.f32.partialorder %v2504_v7, %v2425_v15 }
 0x4f1   : > { %v3075_v34 = vsel %vm1488_vm7, %v3074_v20, %v3073_v62  ;;  %v2670_v45 = vsel %vm2598_vm14, %v2666_v31, -1.0  ;;  %vm5999_vm5 = vcmp.lt.s32.totalorder %v4785_v25, 118  ;;  %v2508_v27 = vsel %vm2506_vm4, %v2504_v7, %v2425_v15 }
 0x4f2   : > { %v2753_v3 = vsel %vm5999_vm5, %v2749_v38, -1.0  ;;  %v3084_v26 = vsel %vm3013_vm12, %v3075_v34, -1.0  ;;  %v2510_v51 = vsel %vm2506_vm4, 7, %v2427_v32  ;;  %v6000_v60 = vrot.slane %v5361_v8, 5 }
 0x4f3   : > { %vm3086_vm6 = vcmp.gt.f32.partialorder %v3084_v26, %v3005_v23  ;;  %vm2589_vm8 = vcmp.gt.f32.partialorder %v2587_v6, %v2508_v27  ;;  %v2913_v17 = vsel %vm1473_vm2, %v2912_v14, %v5395_v11  ;;  %v2996_v54 = vsel %vm1473_vm2, %v2995_v43, %v5418_v46 }
 0x4f4   : > { %v2832_v42 = vsel %vm1476_vm3, %v6000_v60, %v5385_v0  ;;  %v3088_v16 = vsel %vm3086_vm6, %v3084_v26, %v3005_v23  ;;  %v5743_v22 = vsel %vm3086_vm6, 14, %v3007_v35  ;;  %v2591_v19 = vsel %vm2589_vm8, %v2587_v6, %v2508_v27 }
 0x4f5   : > { %v2593_v24 = vsel %vm2589_vm8, 8, %v2510_v51  ;;  %v2997_v8 = vrot.slane %v5399_v21, 5  ;;  %3092 = vmax.xlane.f32.xlu1 %v3088_v16  ;;  %vm2672_vm7 = vcmp.gt.f32.partialorder %v2670_v45, %v2591_v19  ;;  %v6001_v0 = vrot.slane %v5380_v59, 5 }
 0x4f6   : > { %v3077_v63 = vsel %vm1470_vm1, %v3076_v47, %v5402_v41  ;;  %v2674_v14 = vsel %vm2672_vm7, %v2670_v45, %v2591_v19  ;;  %v2676_v11 = vsel %vm2672_vm7, 9, %v2593_v24  ;;  %vm6002_vm11 = vcmp.lt.s32.totalorder %v4785_v25, 117 }
 0x4f7   : > { %v2915_v39 = vsel %vm1476_vm3, %v6001_v0, %v2913_v17  ;;  %v2836_v43 = vsel %vm6002_vm11, %v2832_v42, -1.0  ;;  %v3080_v46 = vrot.slane %v5428_v55, 5  ;;  %vm2755_vm14 = vcmp.gt.f32.partialorder %v2753_v3, %v2674_v14 }
 0x4f8   : > { %v2998_v21 = vsel %vm1476_vm3, %v2997_v8, %v2996_v54  ;;  %v3079_v59 = vsel %vm1473_vm2, %v3078_v28, %v3077_v63  ;;  %v2757_v33 = vsel %vm2755_vm14, %v2753_v3, %v2674_v14  ;;  %v2759_v20 = vsel %vm2755_vm14, 10, %v2676_v11 }
 0x4f9   : > { %v2919_v44 = vsel %vm2847_vm10, %v2915_v39, -1.0  ;;  %vm2838_vm1 = vcmp.gt.f32.partialorder %v2836_v43, %v2757_v33  ;;  %v3081_v41 = vsel %vm1476_vm3, %v3080_v46, %v3079_v59  ;;  %vm6003_vm0 = vcmp.lt.s32.totalorder %v4785_v25, 115 }
 0x4fa   : > { %v2840_v47 = vsel %vm2838_vm1, %v2836_v43, %v2757_v33  ;;  %v2842_v35 = vsel %vm2838_vm1, 11, %v2759_v20  ;;  %v3002_v55 = vsel %vm6003_vm0, %v2998_v21, -1.0  ;;  %v3085_v37 = vsel %vm3013_vm12, %v3081_v41, -1.0 }
 0x4fb   : > { %vm2921_vm13 = vcmp.gt.f32.partialorder %v2919_v44, %v2840_v47  ;;  %vm6004_vm10 = vcmask 1043456   ;;  %vm3169_vm1 = vcmp.eq.s32.totalorder %v4785_v25, 2  ;;  %vm3166_vm0 = vcmp.eq.s32.totalorder %v4785_v25, 1 }
 0x4fc   : > { %v2923_v1 = vsel %vm2921_vm13, %v2919_v44, %v2840_v47  ;;  %v2925_v5 = vsel %vm2921_vm13, 12, %v2842_v35  ;;  %vm6005_vm12 = vmmov %vm6004_vm10  ;;  %vm3165_vm13 = vcmp.eq.s32.totalorder %v4785_v25, 0 }
 0x4fd   : > { %vm3004_vm2 = vcmp.gt.f32.partialorder %v3002_v55, %v2923_v1  ;;  %vm6006_vm8 = vmmov %vm6004_vm10 }
 0x4fe   : > { %v3006_v28 = vsel %vm3004_vm2, %v3002_v55, %v2923_v1  ;;  %v3008_v49 = vsel %vm3004_vm2, 13, %v2925_v5 }
 0x4ff   : > { %vm3087_vm15 = vcmp.gt.f32.partialorder %v3085_v37, %v3006_v28 }
 0x500   : > { %v3089_v29 = vsel %vm3087_vm15, %v3085_v37, %v3006_v28  ;;  %v3091_v56 = vsel %vm3087_vm15, 14, %v3008_v49 }
 0x501   : > { %v3094_v9 = vsel %vm6004_vm10, %v3089_v29, -inf }
 0x502   : > { %3095 = vmax.xlane.f32.xlu0 %v3094_v9 }
 0x582   : > { %v5768_v23 = vpop.xlane.xlu1 %3092 }
 0x583   : > { %vm3097_vm3 = vcmp.eq.f32.partialorder %v3088_v16, %v5768_v23 }
 0x584   : > { %v3099_v40 = vsel %vm3097_vm3, %v4785_v25, 128 }
 0x585   : > { %v3102_v57 = vshra.s32 %v3099_v40, 16  ;;  %v3101_v58 = vand.u32 65535, %v3099_v40 }
 0x587   : > { %v3104_v7 = vcvt.s32.f32 %v3102_v57  ;;  %v3103_v36 = vcvt.s32.f32 %v3101_v58 }
 0x58f   : > { %v5771_v18 = vpop.xlane.xlu0 %3095 }
 0x590   : > { %vm3098_vm9 = vcmp.eq.f32.partialorder %v3089_v29, %v5771_v18 }
 0x591   : > { %v3100_v48 = vsel %vm3098_vm9, %v4785_v25, 128 }
 0x592   : > { %v3115_v4 = vsel %vm6005_vm12, %v3100_v48, 2147483647 }
 0x593   : > { %v3117_v12 = vshra.s32 %v3115_v4, 16  ;;  %v3116_v2 = vand.u32 65535, %v3115_v4 }
 0x595   : > { %v3119_v53 = vcvt.s32.f32 %v3117_v12  ;;  %v3118_v10 = vcvt.s32.f32 %v3116_v2 }
 0x597   : > { %3120 = vmin.xlane.f32.xlu0 %v3119_v53 }
 0x59b   : > { %3105 = vmin.xlane.f32.xlu0 %v3104_v7 }
 0x624   : > { %v3121_v50 = vpop.xlane.xlu0 %3120 }
 0x625   : > { %vm3122_vm4 = vcmp.eq.f32.partialorder %v3119_v53, %v3121_v50  ;;  %v3127_v30 = vcvt.f32.s32 %v3121_v50 }
 0x626   : > { %v3123_v13 = vsel %vm3122_vm4, %v3118_v10, inf }
 0x627   : > { %3124 = vmin.xlane.f32.xlu0 %v3123_v13  ;;  %v3128_v62 = vshll.u32 %v3127_v30, 16 }
 0x628   : > { %v3106_v31 = vpop.xlane.xlu0 %3105 }
 0x629   : > { %vm3107_vm5 = vcmp.eq.f32.partialorder %v3104_v7, %v3106_v31  ;;  %v3112_v15 = vcvt.f32.s32 %v3106_v31 }
 0x62a   : > { %v3108_v61 = vsel %vm3107_vm5, %v3103_v36, inf }
 0x62b   : > { %3109 = vmin.xlane.f32.xlu1 %v3108_v61  ;;  %v3113_v34 = vshll.u32 %v3112_v15, 16 }
 0x6b4   : > { %v3125_v38 = vpop.xlane.xlu0 %3124 }
 0x6b5   : > { %v3126_v32 = vcvt.f32.s32 %v3125_v38 }
 0x6b7   : > { %v3129_v52 = vadd.s32 %v3128_v62, %v3126_v32 }
 0x6b8   : > { %v3110_v6 = vpop.xlane.xlu1 %3109 }
 0x6b9   : > { %v3111_v45 = vcvt.f32.s32 %v3110_v6  ;;  %vm3131_vm6 = vcmp.eq.s32.totalorder %v4785_v25, %v3129_v52  ;;  %v3168_v55 = vcvt.s32.f32 %v3129_v52 }
 0x6ba   : > { %v3133_v3 = vsel %vm3131_vm6, %v3091_v56, 15 }
 0x6bb   : > { %v3114_v26 = vadd.s32 %v3113_v34, %v3111_v45  ;;  %v3148_v27 = vsel %vm6006_vm8, %v3133_v3, 2147483647 }
 0x6bc   : > { %v3150_v51 = vshra.s32 %v3148_v27, 16  ;;  %v3149_v16 = vand.u32 65535, %v3148_v27 }
 0x6bd   : > { %vm3130_vm7 = vcmp.eq.s32.totalorder %v4785_v25, %v3114_v26  ;;  %v3167_v49 = vcvt.s32.f32 %v3114_v26 }
 0x6be   : > { %v3152_v60 = vcvt.s32.f32 %v3150_v51  ;;  %v3132_v42 = vsel %vm3130_vm7, %v5743_v22, 15  ;;  %v3151_v8 = vcvt.s32.f32 %v3149_v16 }
 0x6bf   : > { %v3135_v17 = vshra.s32 %v3132_v42, 16  ;;  %v3134_v19 = vand.u32 65535, %v3132_v42 }
 0x6c0   : > { %3153 = vmin.xlane.f32.xlu1 %v3152_v60 }
 0x6c1   : > { %v3137_v54 = vcvt.s32.f32 %v3135_v17  ;;  %v3136_v63 = vcvt.s32.f32 %v3134_v19 }
 0x6c3   : > { %3138 = vmin.xlane.f32.xlu0 %v3137_v54 }
 0x74d   : > { %v3154_v24 = vpop.xlane.xlu1 %3153 }
 0x74e   : > { %vm3155_vm11 = vcmp.eq.f32.partialorder %v3152_v60, %v3154_v24  ;;  %v3160_v11 = vcvt.f32.s32 %v3154_v24 }
 0x74f   : > { %v3156_v0 = vsel %vm3155_vm11, %v3151_v8, inf }
 0x750   : > { %v3139_v39 = vpop.xlane.xlu0 %3138  ;;  %3157 = vmin.xlane.f32.xlu1 %v3156_v0  ;;  %v3161_v46 = vshll.u32 %v3160_v11, 16 }
 0x751   : > { %vm3140_vm14 = vcmp.eq.f32.partialorder %v3137_v54, %v3139_v39  ;;  %v3145_v43 = vcvt.f32.s32 %v3139_v39 }
 0x752   : > { %v3141_v14 = vsel %vm3140_vm14, %v3136_v63, inf }
 0x753   : > { %3142 = vmin.xlane.f32.xlu0 %v3141_v14  ;;  %v3146_v20 = vshll.u32 %v3145_v43, 16 }
 0x7dd   : > { %v3158_v22 = vpop.xlane.xlu1 %3157 }
 0x7de   : > { %v3159_v21 = vcvt.f32.s32 %v3158_v22 }
 0x7e0   : > { %v3162_v59 = vadd.s32 %v3161_v46, %v3159_v21  ;;  %v3143_v33 = vpop.xlane.xlu0 %3142 }
 0x7e1   : > { %v3144_v44 = vcvt.f32.s32 %v3143_v33 }
 0x7e2   : > { %v3164_v41 = vadd.s32 %v3162_v59, %v3129_v52 }
 0x7e3   : > { %v3147_v47 = vadd.s32 %v3146_v20, %v3144_v44 }
 0x7e4   : > { %v3171_v35 = vcvt.s32.f32 %v3164_v41 }
 0x7e5   : > { %v3163_v1 = vadd.s32 %v3147_v47, %v3114_v26 }
 0x7e6   : > { %v3173_v5 = vsel %vm3169_vm1, %v3171_v35, 0.0 }
 0x7e7   : > { %v3175_v37 = vsel %vm3166_vm0, %v3168_v55, %v3173_v5  ;;  %v3170_v28 = vcvt.s32.f32 %v3163_v1 }
 0x7e8   : > { %v3177_v29 = vsel %vm3165_vm13, %v5771_v18, %v3175_v37 }
 0x7e9   : > { %3179 = vst [vmem:[%s205_s28 + $0x8] sm:$0xf] %v3177_v29  ;;  %v3172_v56 = vsel %vm3169_vm1, %v3170_v28, 0.0 }
 0x7ea   : > { %v3174_v9 = vsel %vm3166_vm0, %v3167_v49, %v3172_v56 }
 0x7eb   : > { %v3176_v48 = vsel %vm3165_vm13, %v5768_v23, %v3174_v9 }
 0x7ec   : > { %3178 = vst [vmem:[%s205_s28] sm:$0xff] %v3176_v48 }
 0x7ed PF: > { %s15_s14 = sadd.s32 1, %s4088_s14   ;;  %s6007_s9 = smov %s4072_s10 }
 0x7ee   : > { %p12_p9 = scmp.ge.s32.totalorder %s15_s14, 4   ;;  %s6008_s10 = smov %s4076_s11 }
 0x7ef   : > { %s6009_s11 = smov %s4170_s20  ;;  %s6010_s12 = smov %s4084_s13 }
 0x7f0   : > { %s6011_s13 = smov %s6013_s16  ;;  %14 = sbr.rel (!%p12_p9) target bundleno = 4 (0x4), region = 71 }
 0x7f7   :  { %3210 = vsyncpa [#allocation3], 1 }
 0x7f8   :  { %3212 = vsyncpa [#allocation3 + $0x1], 1 }

</bundles_post_ra>
